<compile_context>
chip_gen: v6e
topology: v6e:2x2x1
jax: 0.10.0
libtpu: 0.0.40
codegen_flags: <defaults>
</compile_context>

<pallas_src>
import jax
import jax.numpy as jnp
from jax import lax
from jax.experimental import pallas as pl
from jax.experimental.pallas import tpu as pltpu

_LANE = 128
_SUBLANE = 8


def _round_up(x, m):
    return ((x + m - 1) // m) * m


def _cdiv(a, b):
    return (a + b - 1) // b


# ---------------------------------------------------------------------------
# chip introspection (best effort, safe fallbacks)
# ---------------------------------------------------------------------------
def _tpu_info():
    try:
        return pltpu.get_tpu_info()
    except Exception:
        return None


def _vmem_capacity_bytes():
    info = _tpu_info()
    if info is not None:
        for name in ("vmem_capacity_bytes", "vmem_size_bytes", "vmem_bytes"):
            try:
                v = int(getattr(info, name))
                if v > 0:
                    return v
            except (AttributeError, TypeError, ValueError):
                pass
    return 64 * 1024 * 1024          # conservative: v7x per-TensorCore VMEM


def _num_tensorcores():
    info = _tpu_info()
    if info is not None:
        for name in ("num_cores", "core_count", "num_tensorcores",
                     "tensorcore_count"):
            try:
                v = int(getattr(info, name))
                if v > 0:
                    return v
            except (AttributeError, TypeError, ValueError):
                pass
    return 1


def _vmem_block_bytes(shape, itemsize):
    """Approximate VMEM footprint of a block, honoring (sublane, lane) tiling."""
    if len(shape) == 1:
        lead, s, l = 1, 1, shape[0]
    else:
        lead = 1
        for d in shape[:-2]:
            lead *= d
        s, l = shape[-2], shape[-1]
    sub = max(_SUBLANE, 32 // itemsize)          # 8 f32 / 16 bf16 / 32 int8
    return lead * _round_up(max(s, 1), sub) * _round_up(max(l, 1), _LANE) * itemsize


# ---------------------------------------------------------------------------
# kernel
# ---------------------------------------------------------------------------
def _make_conv_kernel(kh, kw, st, oh, owp, cin, activation):
    taps = [(i, j) for i in range(kh) for j in range(kw)]
    m = oh * owp

    def kernel(x_ref, w_ref, b_ref, o_ref):
        # x_ref: (st*st, hq, wq, cin)  one padded image, phase-decomposed
        # w_ref: (kh*kw, cin, tcout)   full weight slab (resident; no K axis)
        # b_ref: (1, tcout) f32        bias (epilogue add)
        # o_ref: (oh*owp, tcout)       lane-dense output block
        acc = jnp.zeros((m, o_ref.shape[-1]), jnp.float32)
        for t, (i, j) in enumerate(taps):                 # static unrolled loop
            p = (i % st) * st + (j % st)
            a0 = i // st
            b0 = j // st
            tap = x_ref[p, a0:a0 + oh, b0:b0 + owp, :]    # (oh, owp, cin)
            lhs = tap.reshape(m, cin)                     # owp % 8 == 0 -> cheap
            acc = acc + jnp.dot(lhs, w_ref[t],
                                preferred_element_type=jnp.float32)
        y = acc + b_ref[...]                              # (1, tcout) broadcast
        if activation == "relu":
            y = jnp.maximum(y, 0.0)
        elif activation == "lrelu":
            y = jnp.where(y > 0.0, y, 0.2 * y)
        elif activation == "tanh":
            y = jnp.tanh(y)
        o_ref[...] = y.astype(o_ref.dtype)

    return kernel


# ---------------------------------------------------------------------------
# wrapper
# ---------------------------------------------------------------------------
def conv2d_block_forward(x_nchw, weight, bias=None, *, ks, st, padding=0,
                         pad_type="zero", activation="relu",
                         activation_first=False,
                         compute_dtype=jnp.bfloat16,
                         vmem_budget_bytes=None):
    """Forward of Conv2dBlock(..., norm='none').  NCHW in / NCHW out.

    compute_dtype controls the streamed x / weight dtype (accumulation and the
    bias / activation epilogue stay f32).  Default bf16 feeds the MXU at full
    rate on v5e/v6e/v7x and halves the dominant HBM stream.
    """
    n, cin, h, w = map(int, x_nchw.shape)
    cout = int(weight.shape[0])
    kh = kw = int(ks)
    st = int(st)
    padding = int(padding)
    out_dtype = x_nchw.dtype
    cdt = jnp.dtype(compute_dtype) if compute_dtype is not None else jnp.dtype(out_dtype)

    hp = h + 2 * padding
    wp = w + 2 * padding
    oh = (hp - kh) // st + 1
    ow = (wp - kw) // st + 1
    assert oh >= 1 and ow >= 1, "conv output would be empty"

    # lane / sublane friendly sizes
    owp = _round_up(ow, _SUBLANE)                    # padded output width
    hq = _cdiv(hp, st)                               # phase-grid rows
    wq = max(_cdiv(wp, st), (kw - 1) // st + owp)    # phase-grid cols
    cout_pad = _round_up(cout, _LANE)
    m_rows = oh * owp

    # ---- plain-JAX layout glue: NCHW->NHWC, activation_first, padding ------
    x_nhwc = jnp.transpose(x_nchw, (0, 2, 3, 1))
    if activation_first:
        if activation == "relu":
            x_nhwc = jnp.maximum(x_nhwc, 0.0)
        elif activation == "lrelu":
            x_nhwc = jnp.where(x_nhwc > 0.0, x_nhwc, 0.2 * x_nhwc)
        elif activation == "tanh":
            x_nhwc = jnp.tanh(x_nhwc)
    x_nhwc = x_nhwc.astype(cdt)

    extra_b = hq * st - hp                # alignment-only padding; never read
    extra_r = wq * st - wp                # by the kept output columns
    if pad_type == "zero" or padding == 0:
        xp = jnp.pad(x_nhwc, ((0, 0), (padding, padding + extra_b),
                              (padding, padding + extra_r), (0, 0)))
    else:
        mode = "reflect" if pad_type == "reflect" else "edge"
        xp = jnp.pad(x_nhwc, ((0, 0), (padding, padding),
                              (padding, padding), (0, 0)), mode=mode)
        xp = jnp.pad(xp, ((0, 0), (0, extra_b), (0, extra_r), (0, 0)))

    # ---- fused-im2col input: stride-phase decomposition (1x input traffic) -
    # x_phase[n*st*st + p*st + q, a, b, c] == xp[n, a*st + p, b*st + q, c]
    xph = xp.reshape(n, hq, st, wq, st, cin)
    xph = jnp.transpose(xph, (0, 2, 4, 1, 3, 5)).reshape(n * st * st, hq, wq, cin)

    # ---- weight (Cout,Cin,KH,KW) -> (KH*KW, Cin, Cout_pad); bias (1,Cout_pad)
    w_mat = jnp.transpose(weight, (2, 3, 1, 0)).reshape(kh * kw, cin, cout)
    w_mat = jnp.pad(w_mat, ((0, 0), (0, 0), (0, cout_pad - cout))).astype(cdt)
    b_vec = jnp.zeros((cout,), jnp.float32) if bias is None else bias.astype(jnp.float32)
    b_mat = jnp.pad(b_vec.reshape(1, cout), ((0, 0), (0, cout_pad - cout)))

    # ---- Cout tiling + VMEM budget (itemsize & tiling aware) ----------------
    in_isz = cdt.itemsize
    out_isz = jnp.dtype(out_dtype).itemsize
    capacity = _vmem_capacity_bytes()
    if vmem_budget_bytes is None:
        vmem_budget_bytes = min(48 * 1024 * 1024, int(capacity * 0.4))

    def est(tco):
        x_blk = _vmem_block_bytes((st * st, hq, wq, cin), in_isz)
        w_blk = _vmem_block_bytes((kh * kw, cin, tco), in_isz)
        b_blk = _vmem_block_bytes((1, tco), 4)
        o_blk = _vmem_block_bytes((m_rows, tco), out_isz)
        acc = _vmem_block_bytes((m_rows, tco), 4)
        # double-buffered pipeline operands + accumulator + tap temporaries
        return 2 * (x_blk + w_blk + b_blk + o_blk) + 2 * acc + (2 << 20)

    units = cout_pad // _LANE
    divisors = [d for d in range(units, 0, -1) if units % d == 0]   # descending
    feasible = [d for d in divisors if est(d * _LANE) <= vmem_budget_bytes]
    if not feasible:
        feasible = [1]
    tco_units = feasible[0]                       # biggest tile that fits
    num_cores = _num_tensorcores()
    if num_cores >= 2:
        # keep the tile as large as possible while still giving every
        # TensorCore at least one of the fully-parallel grid steps
        for d in feasible:
            if n * (units // d) >= num_cores:
                tco_units = d
                break
        else:
            tco_units = feasible[-1]
    tcout = tco_units * _LANE
    n_co = units // tco_units

    vmem_limit = max(32 * 1024 * 1024, est(tcout) + (4 << 20))
    vmem_limit = min(vmem_limit, max(16 * 1024 * 1024, int(capacity * 0.9)))

    kernel = _make_conv_kernel(
        kh, kw, st, oh, owp, cin,
        None if (activation_first or activation == "none") else activation)

    out_mat = pl.pallas_call(
        kernel,
        out_shape=jax.ShapeDtypeStruct((n * m_rows, cout_pad), out_dtype),
        grid=(n, n_co),
        in_specs=[
            pl.BlockSpec((st * st, hq, wq, cin), lambda b, c: (b, 0, 0, 0)),
            pl.BlockSpec((kh * kw, cin, tcout), lambda b, c: (0, 0, c)),
            pl.BlockSpec((1, tcout), lambda b, c: (0, c)),
        ],
        out_specs=pl.BlockSpec((m_rows, tcout), lambda b, c: (b, c)),
        compiler_params=pltpu.CompilerParams(
            dimension_semantics=("parallel", "parallel"),
            vmem_limit_bytes=int(vmem_limit),
        ),
    )(xph, w_mat, b_mat)

    # drop column / lane padding, back to NCHW (module contract)
    out = out_mat.reshape(n, oh, owp, cout_pad)[:, :, :ow, :cout]
    return jnp.transpose(out, (0, 3, 1, 2))


# ---------------------------------------------------------------------------
# self-test
# ---------------------------------------------------------------------------
def _reference(x, weight, bias, st, pad):
    ref = lax.conv_general_dilated(
        x, weight, window_strides=(st, st),
        padding=[(pad, pad), (pad, pad)],
        dimension_numbers=("NCHW", "OIHW", "NCHW"))
    return jnp.maximum(ref + bias[None, :, None, None], 0.0)


if __name__ == "__main__":
    key = jax.random.PRNGKey(0)

    # (name, N, Cin, H, W, Cout, ks, st, pad, compute_dtype, tol)
    # Tolerances are loose because both the kernel and the XLA reference run
    # f32 matmuls at TPU default precision (bf16 MXU passes); bf16 streaming
    # additionally quantizes the operands.
    cases = [
        ("3x3/s1/p1 bf16-stream", 2, 4, 16, 16, 8, 3, 1, 1, jnp.bfloat16, 3e-2),
        ("3x3/s1/p1 f32-stream ", 2, 4, 16, 16, 8, 3, 1, 1, jnp.float32, 2e-2),
        ("4x4/s2/p1 f32-stream ", 2, 3, 9, 9, 5, 4, 2, 1, jnp.float32, 2e-2),
    ]

    ok = True
    for idx, (name, N, CIN, H, W, COUT, KS, ST, PAD, cdt, tol) in enumerate(cases):
        k = jax.random.fold_in(key, idx)
        kx, kw_, kb = jax.random.split(k, 3)
        x = jax.random.normal(kx, (N, CIN, H, W), dtype=jnp.float32)
        fan_in = CIN * KS * KS
        bound = 1.0 / (fan_in ** 0.5)
        weight = jax.random.uniform(kw_, (COUT, CIN, KS, KS), jnp.float32,
                                    -bound, bound)
        bias = jax.random.uniform(kb, (COUT,), jnp.float32, -bound, bound)

        out = conv2d_block_forward(x, weight, bias, ks=KS, st=ST, padding=PAD,
                                   compute_dtype=cdt)
        out = jax.block_until_ready(out)
        ref = _reference(x, weight, bias, ST, PAD)
        if out.shape != ref.shape:
            ok = False
            print(f"FAIL {name}: shape {out.shape} vs {ref.shape}")
            continue
        if not bool(jnp.allclose(out, ref, atol=tol, rtol=tol)):
            ok = False
            err = float(jnp.max(jnp.abs(out - ref)))
            print(f"FAIL {name}: max abs err {err:.3e} (tol {tol:.1e})")

    if ok:
        print("KERNEL_OK")
</pallas_src>

<mosaic_0001>
module attributes {stable_mosaic.version = 11 : i64} {
  func.func @kernel(%arg0: i32, %arg1: i32, %arg2: memref<1x18x18x4xbf16, #tpu.memory_space<vmem>>, %arg3: memref<9x4x128xbf16, #tpu.memory_space<vmem>>, %arg4: memref<1x128xf32, #tpu.memory_space<vmem>>, %arg5: memref<256x128xf32, #tpu.memory_space<vmem>>) attributes {dimension_semantics = [#tpu.dimension_semantics<parallel>, #tpu.dimension_semantics<parallel>], iteration_bounds = array<i64: 2, 1>, scalar_prefetch = 0 : i64, scratch_operands = 0 : i64, tpu.core_type = #tpu.core_type<tc>, window_params = [{transform_indices = @transform_0, window_bounds = array<i64: 1, 18, 18, 4>}, {transform_indices = @transform_1, window_bounds = array<i64: 9, 4, 128>}, {transform_indices = @transform_2, window_bounds = array<i64: 1, 128>}, {transform_indices = @transform_3, window_bounds = array<i64: 256, 128>}]} {
    %cst = arith.constant 0.000000e+00 : f32
    %0 = vector.broadcast %cst : f32 to vector<256x128xf32>
    %c0 = arith.constant 0 : index
    %c0_0 = arith.constant 0 : index
    %c0_1 = arith.constant 0 : index
    %c0_2 = arith.constant 0 : index
    %1 = vector.load %arg2[%c0, %c0_0, %c0_1, %c0_2] : memref<1x18x18x4xbf16, #tpu.memory_space<vmem>>, vector<1x16x16x4xbf16>
    %2 = vector.shape_cast %1 : vector<1x16x16x4xbf16> to vector<16x16x4xbf16>
    %3 = vector.shape_cast %2 : vector<16x16x4xbf16> to vector<256x4xbf16>
    %c0_3 = arith.constant 0 : index
    %c0_4 = arith.constant 0 : index
    %c0_5 = arith.constant 0 : index
    %4 = vector.load %arg3[%c0_3, %c0_4, %c0_5] : memref<9x4x128xbf16, #tpu.memory_space<vmem>>, vector<1x4x128xbf16>
    %5 = vector.shape_cast %4 : vector<1x4x128xbf16> to vector<4x128xbf16>
    %cst_6 = arith.constant dense<0.000000e+00> : vector<256x128xf32>
    %6 = tpu.matmul %3, %5, %cst_6 {dimension_numbers = #tpu.dot_dimension_numbers<[1], [0], [0], [1], [0, 0, 1, 1], [], []>} : vector<256x4xbf16>, vector<4x128xbf16>, vector<256x128xf32> -> vector<256x128xf32>
    %7 = arith.addf %0, %6 : vector<256x128xf32>
    %c0_7 = arith.constant 0 : index
    %c0_8 = arith.constant 0 : index
    %c1 = arith.constant 1 : index
    %c0_9 = arith.constant 0 : index
    %8 = vector.load %arg2[%c0_7, %c0_8, %c1, %c0_9] : memref<1x18x18x4xbf16, #tpu.memory_space<vmem>>, vector<1x16x16x4xbf16>
    %9 = vector.shape_cast %8 : vector<1x16x16x4xbf16> to vector<16x16x4xbf16>
    %10 = vector.shape_cast %9 : vector<16x16x4xbf16> to vector<256x4xbf16>
    %c1_10 = arith.constant 1 : index
    %c0_11 = arith.constant 0 : index
    %c0_12 = arith.constant 0 : index
    %11 = vector.load %arg3[%c1_10, %c0_11, %c0_12] : memref<9x4x128xbf16, #tpu.memory_space<vmem>>, vector<1x4x128xbf16>
    %12 = vector.shape_cast %11 : vector<1x4x128xbf16> to vector<4x128xbf16>
    %cst_13 = arith.constant dense<0.000000e+00> : vector<256x128xf32>
    %13 = tpu.matmul %10, %12, %cst_13 {dimension_numbers = #tpu.dot_dimension_numbers<[1], [0], [0], [1], [0, 0, 1, 1], [], []>} : vector<256x4xbf16>, vector<4x128xbf16>, vector<256x128xf32> -> vector<256x128xf32>
    %14 = arith.addf %7, %13 : vector<256x128xf32>
    %c0_14 = arith.constant 0 : index
    %c0_15 = arith.constant 0 : index
    %c2 = arith.constant 2 : index
    %c0_16 = arith.constant 0 : index
    %15 = vector.load %arg2[%c0_14, %c0_15, %c2, %c0_16] : memref<1x18x18x4xbf16, #tpu.memory_space<vmem>>, vector<1x16x16x4xbf16>
    %16 = vector.shape_cast %15 : vector<1x16x16x4xbf16> to vector<16x16x4xbf16>
    %17 = vector.shape_cast %16 : vector<16x16x4xbf16> to vector<256x4xbf16>
    %c2_17 = arith.constant 2 : index
    %c0_18 = arith.constant 0 : index
    %c0_19 = arith.constant 0 : index
    %18 = vector.load %arg3[%c2_17, %c0_18, %c0_19] : memref<9x4x128xbf16, #tpu.memory_space<vmem>>, vector<1x4x128xbf16>
    %19 = vector.shape_cast %18 : vector<1x4x128xbf16> to vector<4x128xbf16>
    %cst_20 = arith.constant dense<0.000000e+00> : vector<256x128xf32>
    %20 = tpu.matmul %17, %19, %cst_20 {dimension_numbers = #tpu.dot_dimension_numbers<[1], [0], [0], [1], [0, 0, 1, 1], [], []>} : vector<256x4xbf16>, vector<4x128xbf16>, vector<256x128xf32> -> vector<256x128xf32>
    %21 = arith.addf %14, %20 : vector<256x128xf32>
    %c0_21 = arith.constant 0 : index
    %c1_22 = arith.constant 1 : index
    %c0_23 = arith.constant 0 : index
    %c0_24 = arith.constant 0 : index
    %22 = vector.load %arg2[%c0_21, %c1_22, %c0_23, %c0_24] : memref<1x18x18x4xbf16, #tpu.memory_space<vmem>>, vector<1x16x16x4xbf16>
    %23 = vector.shape_cast %22 : vector<1x16x16x4xbf16> to vector<16x16x4xbf16>
    %24 = vector.shape_cast %23 : vector<16x16x4xbf16> to vector<256x4xbf16>
    %c3 = arith.constant 3 : index
    %c0_25 = arith.constant 0 : index
    %c0_26 = arith.constant 0 : index
    %25 = vector.load %arg3[%c3, %c0_25, %c0_26] : memref<9x4x128xbf16, #tpu.memory_space<vmem>>, vector<1x4x128xbf16>
    %26 = vector.shape_cast %25 : vector<1x4x128xbf16> to vector<4x128xbf16>
    %cst_27 = arith.constant dense<0.000000e+00> : vector<256x128xf32>
    %27 = tpu.matmul %24, %26, %cst_27 {dimension_numbers = #tpu.dot_dimension_numbers<[1], [0], [0], [1], [0, 0, 1, 1], [], []>} : vector<256x4xbf16>, vector<4x128xbf16>, vector<256x128xf32> -> vector<256x128xf32>
    %28 = arith.addf %21, %27 : vector<256x128xf32>
    %c0_28 = arith.constant 0 : index
    %c1_29 = arith.constant 1 : index
    %c1_30 = arith.constant 1 : index
    %c0_31 = arith.constant 0 : index
    %29 = vector.load %arg2[%c0_28, %c1_29, %c1_30, %c0_31] : memref<1x18x18x4xbf16, #tpu.memory_space<vmem>>, vector<1x16x16x4xbf16>
    %30 = vector.shape_cast %29 : vector<1x16x16x4xbf16> to vector<16x16x4xbf16>
    %31 = vector.shape_cast %30 : vector<16x16x4xbf16> to vector<256x4xbf16>
    %c4 = arith.constant 4 : index
    %c0_32 = arith.constant 0 : index
    %c0_33 = arith.constant 0 : index
    %32 = vector.load %arg3[%c4, %c0_32, %c0_33] : memref<9x4x128xbf16, #tpu.memory_space<vmem>>, vector<1x4x128xbf16>
    %33 = vector.shape_cast %32 : vector<1x4x128xbf16> to vector<4x128xbf16>
    %cst_34 = arith.constant dense<0.000000e+00> : vector<256x128xf32>
    %34 = tpu.matmul %31, %33, %cst_34 {dimension_numbers = #tpu.dot_dimension_numbers<[1], [0], [0], [1], [0, 0, 1, 1], [], []>} : vector<256x4xbf16>, vector<4x128xbf16>, vector<256x128xf32> -> vector<256x128xf32>
    %35 = arith.addf %28, %34 : vector<256x128xf32>
    %c0_35 = arith.constant 0 : index
    %c1_36 = arith.constant 1 : index
    %c2_37 = arith.constant 2 : index
    %c0_38 = arith.constant 0 : index
    %36 = vector.load %arg2[%c0_35, %c1_36, %c2_37, %c0_38] : memref<1x18x18x4xbf16, #tpu.memory_space<vmem>>, vector<1x16x16x4xbf16>
    %37 = vector.shape_cast %36 : vector<1x16x16x4xbf16> to vector<16x16x4xbf16>
    %38 = vector.shape_cast %37 : vector<16x16x4xbf16> to vector<256x4xbf16>
    %c5 = arith.constant 5 : index
    %c0_39 = arith.constant 0 : index
    %c0_40 = arith.constant 0 : index
    %39 = vector.load %arg3[%c5, %c0_39, %c0_40] : memref<9x4x128xbf16, #tpu.memory_space<vmem>>, vector<1x4x128xbf16>
    %40 = vector.shape_cast %39 : vector<1x4x128xbf16> to vector<4x128xbf16>
    %cst_41 = arith.constant dense<0.000000e+00> : vector<256x128xf32>
    %41 = tpu.matmul %38, %40, %cst_41 {dimension_numbers = #tpu.dot_dimension_numbers<[1], [0], [0], [1], [0, 0, 1, 1], [], []>} : vector<256x4xbf16>, vector<4x128xbf16>, vector<256x128xf32> -> vector<256x128xf32>
    %42 = arith.addf %35, %41 : vector<256x128xf32>
    %c0_42 = arith.constant 0 : index
    %c2_43 = arith.constant 2 : index
    %c0_44 = arith.constant 0 : index
    %c0_45 = arith.constant 0 : index
    %43 = vector.load %arg2[%c0_42, %c2_43, %c0_44, %c0_45] : memref<1x18x18x4xbf16, #tpu.memory_space<vmem>>, vector<1x16x16x4xbf16>
    %44 = vector.shape_cast %43 : vector<1x16x16x4xbf16> to vector<16x16x4xbf16>
    %45 = vector.shape_cast %44 : vector<16x16x4xbf16> to vector<256x4xbf16>
    %c6 = arith.constant 6 : index
    %c0_46 = arith.constant 0 : index
    %c0_47 = arith.constant 0 : index
    %46 = vector.load %arg3[%c6, %c0_46, %c0_47] : memref<9x4x128xbf16, #tpu.memory_space<vmem>>, vector<1x4x128xbf16>
    %47 = vector.shape_cast %46 : vector<1x4x128xbf16> to vector<4x128xbf16>
    %cst_48 = arith.constant dense<0.000000e+00> : vector<256x128xf32>
    %48 = tpu.matmul %45, %47, %cst_48 {dimension_numbers = #tpu.dot_dimension_numbers<[1], [0], [0], [1], [0, 0, 1, 1], [], []>} : vector<256x4xbf16>, vector<4x128xbf16>, vector<256x128xf32> -> vector<256x128xf32>
    %49 = arith.addf %42, %48 : vector<256x128xf32>
    %c0_49 = arith.constant 0 : index
    %c2_50 = arith.constant 2 : index
    %c1_51 = arith.constant 1 : index
    %c0_52 = arith.constant 0 : index
    %50 = vector.load %arg2[%c0_49, %c2_50, %c1_51, %c0_52] : memref<1x18x18x4xbf16, #tpu.memory_space<vmem>>, vector<1x16x16x4xbf16>
    %51 = vector.shape_cast %50 : vector<1x16x16x4xbf16> to vector<16x16x4xbf16>
    %52 = vector.shape_cast %51 : vector<16x16x4xbf16> to vector<256x4xbf16>
    %c7 = arith.constant 7 : index
    %c0_53 = arith.constant 0 : index
    %c0_54 = arith.constant 0 : index
    %53 = vector.load %arg3[%c7, %c0_53, %c0_54] : memref<9x4x128xbf16, #tpu.memory_space<vmem>>, vector<1x4x128xbf16>
    %54 = vector.shape_cast %53 : vector<1x4x128xbf16> to vector<4x128xbf16>
    %cst_55 = arith.constant dense<0.000000e+00> : vector<256x128xf32>
    %55 = tpu.matmul %52, %54, %cst_55 {dimension_numbers = #tpu.dot_dimension_numbers<[1], [0], [0], [1], [0, 0, 1, 1], [], []>} : vector<256x4xbf16>, vector<4x128xbf16>, vector<256x128xf32> -> vector<256x128xf32>
    %56 = arith.addf %49, %55 : vector<256x128xf32>
    %c0_56 = arith.constant 0 : index
    %c2_57 = arith.constant 2 : index
    %c2_58 = arith.constant 2 : index
    %c0_59 = arith.constant 0 : index
    %57 = vector.load %arg2[%c0_56, %c2_57, %c2_58, %c0_59] : memref<1x18x18x4xbf16, #tpu.memory_space<vmem>>, vector<1x16x16x4xbf16>
    %58 = vector.shape_cast %57 : vector<1x16x16x4xbf16> to vector<16x16x4xbf16>
    %59 = vector.shape_cast %58 : vector<16x16x4xbf16> to vector<256x4xbf16>
    %c8 = arith.constant 8 : index
    %c0_60 = arith.constant 0 : index
    %c0_61 = arith.constant 0 : index
    %60 = vector.load %arg3[%c8, %c0_60, %c0_61] : memref<9x4x128xbf16, #tpu.memory_space<vmem>>, vector<1x4x128xbf16>
    %61 = vector.shape_cast %60 : vector<1x4x128xbf16> to vector<4x128xbf16>
    %cst_62 = arith.constant dense<0.000000e+00> : vector<256x128xf32>
    %62 = tpu.matmul %59, %61, %cst_62 {dimension_numbers = #tpu.dot_dimension_numbers<[1], [0], [0], [1], [0, 0, 1, 1], [], []>} : vector<256x4xbf16>, vector<4x128xbf16>, vector<256x128xf32> -> vector<256x128xf32>
    %63 = arith.addf %56, %62 : vector<256x128xf32>
    %c0_63 = arith.constant 0 : index
    %c0_64 = arith.constant 0 : index
    %64 = vector.load %arg4[%c0_63, %c0_64] : memref<1x128xf32, #tpu.memory_space<vmem>>, vector<1x128xf32>
    %65 = vector.broadcast %64 : vector<1x128xf32> to vector<256x128xf32>
    %66 = arith.addf %63, %65 : vector<256x128xf32>
    %cst_65 = arith.constant 0.000000e+00 : f32
    %67 = vector.broadcast %cst_65 : f32 to vector<256x128xf32>
    %68 = arith.maximumf %66, %67 : vector<256x128xf32>
    %c0_66 = arith.constant 0 : index
    %c0_67 = arith.constant 0 : index
    %69 = vector.load %arg5[%c0_66, %c0_67] : memref<256x128xf32, #tpu.memory_space<vmem>>, vector<256x128xf32>
    tpu.vector_store %arg5[%c0_66, %c0_67], %68 {strides = array<i32>} : memref<256x128xf32, #tpu.memory_space<vmem>>, vector<256x128xf32>,
    return
  }
  func.func @transform_0(%arg0: i32, %arg1: i32) -> (i32, i32, i32, i32) {
    %c0_i32 = arith.constant 0 : i32
    %c0_i32_0 = arith.constant 0 : i32
    %c0_i32_1 = arith.constant 0 : i32
    %c0_i32_2 = arith.constant 0 : i32
    return %arg0, %c0_i32, %c0_i32_0, %c0_i32_1 : i32, i32, i32, i32
  }
  func.func @transform_1(%arg0: i32, %arg1: i32) -> (i32, i32, i32) {
    %c0_i32 = arith.constant 0 : i32
    %c0_i32_0 = arith.constant 0 : i32
    %c0_i32_1 = arith.constant 0 : i32
    return %c0_i32, %c0_i32_0, %arg1 : i32, i32, i32
  }
  func.func @transform_2(%arg0: i32, %arg1: i32) -> (i32, i32) {
    %c0_i32 = arith.constant 0 : i32
    %c0_i32_0 = arith.constant 0 : i32
    return %c0_i32, %arg1 : i32, i32
  }
  func.func @transform_3(%arg0: i32, %arg1: i32) -> (i32, i32) {
    %c0_i32 = arith.constant 0 : i32
    return %arg0, %arg1 : i32, i32
  }
}

</mosaic_0001>

<bundles_post_ra>
// kernel: tpu_custom_call.1
= control target key start
LH: loop header
LB: loop body
LE: loop exit
PB: predicated region body
PF: predicated region fallthrough
CT: control target
= control target key end

     0   :  { %8 = vsyncpa [#allocation3], 0  ;;  %s8967_s0 = inlined_call_operand.vmem [shape: bf16[2,18,18,4], index: 0, kind: input, shape index: {}]   ;;  %s8968_s1 = inlined_call_operand.vmem [shape: bf16[9,4,128], index: 1, kind: input, shape index: {}]   ;;  %s8969_s2 = inlined_call_operand.vmem [shape: f32[1,128], index: 2, kind: input, shape index: {}]   ;;  %s8970_s3 = inlined_call_operand.hbm [shape: f32[512,128], index: 3, kind: output, shape index: {}]  }
   0x1   :  { %10 = vsyncpa [#allocation3 + $0x1], 0  ;;  %s6224_s12 = smov 0   ;;  %s6226_s13 = smov 0  }
   0x2   :  { %s6228_s14 = smov 0   ;;  %s6230_s15 = smov 0  }
   0x3   :  { %s6232_s16 = smov 0   ;;  %s6234_s17 = smov 0  }
   0x4 LB: > { %s4992_s18 = sadd.s32 4294967295, %s6199_s17   ;;  %s4993_s19 = sadd.s32 4294967294, %s6199_s17   ;;  %s6199_s17 = sphi %s6234_s17, %s16_s17   ;;  %s6195_s16 = sphi %s6232_s16, %s9251_s16   ;;  %s6191_s15 = sphi %s6230_s15, %s9250_s15   ;;  %s6187_s14 = sphi %s6228_s14, %s9249_s14   ;;  %s6183_s13 = sphi %s6226_s13, %s9248_s13   ;;  %s6179_s12 = sphi %s6224_s12, %s9247_s12  }
   0x5   : > { %s28_s20 = sadd.s32 1, %s6195_s16  ;;  %s115_s21 = sadd.s32 1, %s6187_s14 }
   0x6   : > { %p30_p0 = scmp.ge.s32.totalorder %s28_s20, 2  ;;  %p125_p1 = scmp.ne.s32.totalorder %s6187_s14, %s6183_s13 }
   0x7   : > { %p126_p2 = scmp.eq.s32.totalorder %s4992_s18, 1  ;;  %p131_p3 = scmp.ne.s32.totalorder %s6183_s13, %s6179_s12 }
   0x8   : > { %s9253_s20 = smov (%p30_p0, %s28_s20), 0  ;;  %p132_p5 = scmp.eq.s32.totalorder %s4993_s19, 1 }
   0x9   : > { %p6264_p4 = por %p126_p2, %p125_p1  ;;  %s110_s23 = ssub.s32 %s6195_s16, %s9253_s20 }
   0xa   : > { %p4998_p6 = scmp.ge.s32.totalorder %s6199_s17, 1  ;;  %p113_p7 = scmp.eq.s32.totalorder %s110_s23, 0 }
   0xb   : > { %p6271_p8 = por %p132_p5, %p131_p3  ;;  %p171_p9 = scmp.lt.s32.totalorder %s6199_s17, 3 }
   0xc   : > { %s6277_s25 = scalar_select %p113_p7, %s6187_s14, %s115_s21  }
   0xd   : > { %p172_p10 = pnand %p4998_p6, %p171_p9 }
   0xf   : > { %175 = sbr.rel (%p172_p10) target bundleno = 579 (0x243), region = 32 }
  0x14   : > { %v5001_v0 = vld [vmem:[%s8968_s1 + $0x2] sm:$0x3]  ;;  %vm751_vm0 = vcmask 1041408   ;;  %p202_p11 = scmp.lt.s32.totalorder %s6191_s15, 1  ;;  %v248_v2 = vld [vmem:[%s8968_s1] sm:$0x3] }
  0x15   : > { %6006 = vmatprep.subr.msk.bf16.mxu1 %vm751_vm0, %v5001_v0  ;;  %6005 = vmatprep.subr.msk.bf16.mxu0 %vm751_vm0, %v5001_v0  ;;  %v753_v1 = vsel %vm751_vm0, %v5001_v0, 0  ;;  %v5082_v3 = vld [vmem:[%s8968_s1 + $0x4] sm:$0x3]  ;;  %vm265_vm1 = vsmask.f32 3328  ;;  %v6301_v4 = vsel %vm751_vm0, %v248_v2, 0 }
  0x16   : > { %6004 = vmatpush3.bf16.msra.mxu1 %v753_v1  ;;  %5698 = vmatpush3.bf16.msra.mxu0 %v753_v1  ;;  %s203_s30 = scalar_select %p202_p11, %s6191_s15, 1  ;;  %vm266_vm2 = vsmask.f32 7440  ;;  %vm702_vm3 = vcmask 31744   ;;  %v6327_v16 = vsel %vm751_vm0, %v5082_v3, 0  ;;  %vm1256_vm5 = vcmask 1042432  }
  0x17   : > { %6007 = vmatprep.subr.msk.bf16.mxu1 %vm751_vm0, %v248_v2  ;;  %6008 = vmatprep.subr.msk.bf16.mxu0 %vm751_vm0, %v5082_v3  ;;  %vm6342_vm4 = vmor %vm265_vm1, %vm266_vm2  ;;  %vm1257_vm6 = vcmask 1046532   ;;  %s199_s5 = sand.u32 1, %s6183_s13   ;;  %s5543_s10 = sshll.u32 %s6191_s15, 12 }
  0x18   : > { %s6015_s6 = smul.u32 216, %s203_s30  ;;  %vm6628_vm7 = vmor %vm1256_vm5, %vm1257_vm6  ;;  %s4999_s8 = sshll.u32 %s199_s5, 8 }
  0x19   : > { %s8914_s21 = scalar_lea.hbm %s8970_s3, %s5543_s10  ;;  %s8922_s15 = scalar_lea.sflag [#allocation3], %s199_s5 }
  0x1a   : > { %s6298_s9 = scalar_lea.vmem %s8967_s0, %s6015_s6  ;;  %s6201_s26 = smov [#allocation2]  }
  0x1b   : > { %v6304_v5 = vld [vmem:[%s6298_s9] sm:$0xf]  ;;  %v6307_v6 = vld [vmem:[%s6298_s9 + $0x4] sm:$0xf]  ;;  %v6310_v7 = vld [vmem:[%s6298_s9 + $0x8] sm:$0x1] }
  0x1c   : > { %v269_v8 = vshrl.u32 %v6304_v5, 16  ;;  %v272_v9 = vshll.u32 %v6304_v5, 16  ;;  %v278_v10 = vshll.u32 %v6307_v6, 16  ;;  %v282_v11 = vshrl.u32 %v6307_v6, 16  ;;  %v6317_v12 = vld [vmem:[%s6298_s9 + $0x60] sm:$0xf] }
  0x1d   : > { %v288_v13 = vshll.u32 %v6310_v7, 16  ;;  %v6321_v14 = vld [vmem:[%s6298_s9 + $0x64] sm:$0xf]  ;;  %v6324_v15 = vld [vmem:[%s6298_s9 + $0x68] sm:$0x1]  ;;  %v461_v22 = vshrl.u32 %v6317_v12, 16 }
  0x1e   : > { %v271_v17 = vrot.slane %v269_v8, 4  ;;  %v274_v18 = vrot.slane %v272_v9, 5  ;;  %v280_v19 = vrot.slane %v278_v10, 5  ;;  %v284_v20 = vrot.slane %v282_v11, 4  ;;  %v6335_v29 = vld [vmem:[%s6298_s9 + $0xc] sm:$0xf] }
  0x1f   : > { %v290_v21 = vrot.slane %v288_v13, 5  ;;  %v464_v23 = vshll.u32 %v6317_v12, 16  ;;  %v470_v24 = vshll.u32 %v6321_v14, 16  ;;  %v474_v27 = vshrl.u32 %v6321_v14, 16  ;;  %v6338_v30 = vld [vmem:[%s6298_s9 + $0x10] sm:$0xf] }
  0x20   : > { %v275_v25 = vor.u32 %v274_v18, %v271_v17  ;;  %v285_v26 = vor.u32 %v284_v20, %v280_v19  ;;  %v480_v28 = vshll.u32 %v6324_v15, 16  ;;  %v463_v33 = vrot.slane %v461_v22, 4  ;;  %v6348_v41 = vld [vmem:[%s6298_s9 + $0x14] sm:$0x1]  ;;  %v6359_v53 = vld [vmem:[%s6298_s9 + $0x6c] sm:$0xf] }
  0x21   : > { %v466_v34 = vrot.slane %v464_v23, 5  ;;  %v472_v35 = vrot.slane %v470_v24, 5  ;;  %v476_v38 = vrot.slane %v474_v27, 4  ;;  %v293_v42 = vshrl.u32 %v6335_v29, 16  ;;  %v6363_v58 = vld [vmem:[%s6298_s9 + $0x70] sm:$0xf] }
  0x22   : > { %v276_v36 = vrot.slane %v275_v25, 4  ;;  %v286_v37 = vrot.slane %v285_v26, 4  ;;  %v482_v39 = vrot.slane %v480_v28, 5  ;;  %v296_v43 = vshll.u32 %v6335_v29, 16  ;;  %v6371_v63 = vld [vmem:[%s6298_s9 + $0x74] sm:$0x1] }
  0x23   : > { %v467_v40 = vor.u32 %v466_v34, %v463_v33  ;;  %v302_v44 = vshll.u32 %v6338_v30, 16  ;;  %v477_v47 = vor.u32 %v476_v38, %v472_v35  ;;  %v306_v48 = vshrl.u32 %v6338_v30, 16  ;;  %v6377_v8 = vld [vmem:[%s6298_s9 + $0x18] sm:$0xf]  ;;  %v6390_v25 = vld [vmem:[%s6298_s9 + $0x20] sm:$0x1] }
  0x24   : > { %v281_v45 = vsel %vm6342_vm4, %v276_v36, %v280_v19  ;;  %v291_v46 = vsel %vm6342_vm4, %v286_v37, %v290_v21  ;;  %v295_v51 = vrot.slane %v293_v42, 4  ;;  %v298_v52 = vrot.slane %v296_v43, 5  ;;  %v6384_v21 = vld [vmem:[%s6298_s9 + $0x1c] sm:$0xf]  ;;  %s6127_s27 = sshll.u32 %s6201_s26, 4  ;;  %s6128_s27 = int_to_ptr.vmem [resolvable:$false] %s6127_s27 }
  0x25   : > { %v5002_v49 = vcombine.low %v281_v45, %v291_v46  ;;  %v468_v50 = vrot.slane %v467_v40, 4  ;;  %v478_v54 = vrot.slane %v477_v47, 4  ;;  %v304_v55 = vrot.slane %v302_v44, 5  ;;  %v6403_v40 = vld [vmem:[%s8968_s1 + $0x8] sm:$0x3]  ;;  %s6129_s28 = scalar_lea.vmem %s6128_s27, 8192 }
  0x26   : > { %v308_v56 = vrot.slane %v306_v48, 4  ;;  %v312_v57 = vshll.u32 %v6348_v41, 16  ;;  %v299_v60 = vor.u32 %v298_v52, %v295_v51  ;;  %v485_v3 = vshrl.u32 %v6359_v53, 16  ;;  %v6408_v46 = vld [vmem:[%s6298_s9 + $0x7c] sm:$0xf] }
  0x27   : > { %5699 = vmatprep.mubr.msk.bf16.mxu0 %vm702_vm3, %v5002_v49  ;;  %v473_v59 = vsel %vm6342_vm4, %v468_v50, %v472_v35  ;;  %v483_v0 = vsel %vm6342_vm4, %v478_v54, %v482_v39  ;;  %v488_v11 = vshll.u32 %v6359_v53, 16  ;;  %v494_v13 = vshll.u32 %v6363_v58, 16  ;;  %v6397_v35 = vld [vmem:[%s6298_s9 + $0x78] sm:$0xf] }
  0x28   : > { %v309_v1 = vor.u32 %v308_v56, %v304_v55  ;;  %v314_v2 = vrot.slane %v312_v57, 5  ;;  %v5010_v9 = vcombine.low %v473_v59, %v483_v0  ;;  %v300_v10 = vrot.slane %v299_v60, 4  ;;  %v6415_v56 = vld [vmem:[%s6298_s9 + $0x80] sm:$0x1] }
  0x29   : > { %v487_v18 = vrot.slane %v485_v3, 4  ;;  %v498_v19 = vshrl.u32 %v6363_v58, 16  ;;  %v504_v20 = vshll.u32 %v6371_v63, 16  ;;  %v490_v23 = vrot.slane %v488_v11, 5  ;;  %9008 = vst [vmem:[#allocation5_spill] sm:$0xff] %v6415_v56 }
  0x2a   : > { %v310_v17 = vrot.slane %v309_v1, 4  ;;  %5715 = vmatprep.mubr.msk.bf16.mxu1 %vm702_vm3, %v5010_v9  ;;  %v305_v22 = vsel %vm6342_vm4, %v300_v10, %v304_v55  ;;  %v496_v24 = vrot.slane %v494_v13, 5  ;;  %v317_v26 = vshrl.u32 %v6377_v8, 16  ;;  %v6421_v1 = vld [vmem:[%s6298_s9 + $0x24] sm:$0xf] }
  0x2b   : > { %v500_v28 = vrot.slane %v498_v19, 4  ;;  %v506_v33 = vrot.slane %v504_v20, 5  ;;  %v320_v34 = vshll.u32 %v6377_v8, 16  ;;  %v491_v37 = vor.u32 %v490_v23, %v487_v18  ;;  %v6429_v10 = vld [vmem:[%s6298_s9 + $0x28] sm:$0xf] }
  0x2c   : > { %v315_v27 = vsel %vm6342_vm4, %v310_v17, %v314_v2  ;;  %v319_v38 = vrot.slane %v317_v26, 4  ;;  %v326_v39 = vshll.u32 %v6384_v21, 16  ;;  %v330_v44 = vshrl.u32 %v6384_v21, 16  ;;  %v6435_v19 = vld [vmem:[%s8968_s1 + $0x6] sm:$0x3] }
  0x2d   : > { %v5003_v36 = vcombine.low %v305_v22, %v315_v27  ;;  %v501_v42 = vor.u32 %v500_v28, %v496_v24  ;;  %v322_v43 = vrot.slane %v320_v34, 5  ;;  %v336_v45 = vshll.u32 %v6390_v25, 16 }
  0x2e   : > { %v492_v47 = vrot.slane %v491_v37, 4  ;;  %v328_v48 = vrot.slane %v326_v39, 5  ;;  %v509_v49 = vshrl.u32 %v6397_v35, 16  ;;  %v512_v50 = vshll.u32 %v6397_v35, 16 }
  0x2f   : > { %5700 = vmatmul.mubr.msk.bf16.vlgmr.msra.gmra.mxu0 %vm702_vm3, %v5003_v36  ;;  %v502_v51 = vrot.slane %v501_v42, 4  ;;  %v323_v52 = vor.u32 %v322_v43, %v319_v38  ;;  %v332_v54 = vrot.slane %v330_v44, 4  ;;  %v338_v55 = vrot.slane %v336_v45, 5  ;;  %v6447_v36 = vld [vmem:[%s6298_s9 + $0x84] sm:$0xf] }
  0x30   : > { %5766 = vmatpush3.bf16.msra.mxu0 %v6327_v16  ;;  %v497_v57 = vsel %vm6342_vm4, %v492_v47, %v496_v24  ;;  %v511_v59 = vrot.slane %v509_v49, 4  ;;  %v514_v60 = vrot.slane %v512_v50, 5  ;;  %v518_v0 = vshll.u32 %v6408_v46, 16  ;;  %v6440_v24 = vld [vmem:[%s6298_s9 + $0x2c] sm:$0x1] }
  0x31   : > { %6010 = vmatprep.subr.msk.bf16.mxu0 %vm751_vm0, %v6403_v40  ;;  %v507_v16 = vsel %vm6342_vm4, %v502_v51, %v506_v33  ;;  %v324_v2 = vrot.slane %v323_v52, 4  ;;  %v333_v3 = vor.u32 %v332_v54, %v328_v48  ;;  %v522_v9 = vshrl.u32 %v6408_v46, 16  ;;  %v6454_v43 = vld [vmem:[%s6298_s9 + $0x88] sm:$0xf]  ;;  %v6462_v51 = vld [vmem:[%s6298_s9 + $0x8c] sm:$0x1] }
  0x32   : > { %v5011_v11 = vcombine.low %v497_v57, %v507_v16  ;;  %v515_v13 = vor.u32 %v514_v60, %v511_v59  ;;  %v520_v17 = vrot.slane %v518_v0, 5  ;;  %v528_v18 = vshll.u32 %v6415_v56, 16  ;;  %9009 = vst [vmem:[#allocation6_spill] sm:$0xff] %v6462_v51  ;;  %v6470_v60 = vld [vmem:[%s6298_s9 + $0x30] sm:$0xf] }
  0x33   : > { %v329_v20 = vsel %vm6342_vm4, %v324_v2, %v328_v48  ;;  %v334_v22 = vrot.slane %v333_v3, 4  ;;  %v524_v23 = vrot.slane %v522_v9, 4  ;;  %v341_v26 = vshrl.u32 %v6421_v1, 16  ;;  %v6475_v9 = vld [vmem:[%s6298_s9 + $0x34] sm:$0xf] }
  0x34   : > { %5716 = vmatmul.mubr.msk.bf16.vlgmr.msra.gmra.mxu1 %vm702_vm3, %v5011_v11  ;;  %v516_v27 = vrot.slane %v515_v13, 4  ;;  %v530_v28 = vrot.slane %v528_v18, 5  ;;  %v344_v33 = vshll.u32 %v6421_v1, 16  ;;  %v350_v34 = vshll.u32 %v6429_v10, 16 }
  0x35   : > { %5732 = vmatpush3.bf16.msra.mxu1 %v6301_v4  ;;  %v339_v37 = vsel %vm6342_vm4, %v334_v22, %v338_v55  ;;  %v525_v38 = vor.u32 %v524_v23, %v520_v17  ;;  %v343_v39 = vrot.slane %v341_v26, 4  ;;  %v354_v42 = vshrl.u32 %v6429_v10, 16 }
  0x36   : > { %v5004_v44 = vcombine.low %v329_v20, %v339_v37  ;;  %v521_v45 = vsel %vm6342_vm4, %v516_v27, %v520_v17  ;;  %v346_v47 = vrot.slane %v344_v33, 5  ;;  %v352_v48 = vrot.slane %v350_v34, 5  ;;  %6009 = vmatprep.subr.msk.bf16.mxu1 %vm751_vm0, %v6435_v19  ;;  %v6483_v33 = vld [vmem:[%s6298_s9 + $0x38] sm:$0x1] }
  0x37   : > { %v526_v4 = vrot.slane %v525_v38, 4  ;;  %v356_v49 = vrot.slane %v354_v42, 4  ;;  %v360_v50 = vshll.u32 %v6440_v24, 16  ;;  %v533_v52 = vshrl.u32 %v6447_v36, 16  ;;  %v6488_v38 = vld [vmem:[%s6298_s9 + $0x90] sm:$0xf] }
  0x38   : > { %5703 = vmatprep.mubr.msk.bf16.mxu0 %vm702_vm3, %v5004_v44  ;;  %v347_v54 = vor.u32 %v346_v47, %v343_v39  ;;  %v536_v55 = vshll.u32 %v6447_v36, 16  ;;  %v542_v57 = vshll.u32 %v6454_v43, 16  ;;  %v546_v59 = vshrl.u32 %v6454_v43, 16  ;;  %9010 = vst [vmem:[#allocation7_spill] sm:$0xff] %v6488_v38  ;;  %v6493_v47 = vld [vmem:[%s6298_s9 + $0x94] sm:$0xf] }
  0x39   : > { %v531_v0 = vsel %vm6342_vm4, %v526_v4, %v530_v28  ;;  %v357_v16 = vor.u32 %v356_v49, %v352_v48  ;;  %v362_v2 = vrot.slane %v360_v50, 5  ;;  %v535_v3 = vrot.slane %v533_v52, 4  ;;  %9011 = vst [vmem:[#allocation8_spill] sm:$0xff] %v6493_v47 }
  0x3a   : > { %v5012_v11 = vcombine.low %v521_v45, %v531_v0  ;;  %v348_v13 = vrot.slane %v347_v54, 4  ;;  %v538_v17 = vrot.slane %v536_v55, 5  ;;  %v544_v18 = vrot.slane %v542_v57, 5 }
  0x3b   : > { %v358_v20 = vrot.slane %v357_v16, 4  ;;  %v548_v22 = vrot.slane %v546_v59, 4  ;;  %v552_v23 = vshll.u32 %v6462_v51, 16  ;;  %v365_v26 = vshrl.u32 %v6470_v60, 16  ;;  %v6502_v16 = vld [vmem:[%s6298_s9 + $0x98] sm:$0x1] }
  0x3c   : > { %5719 = vmatprep.mubr.msk.bf16.mxu1 %vm702_vm3, %v5012_v11  ;;  %v353_v27 = vsel %vm6342_vm4, %v348_v13, %v352_v48  ;;  %v539_v28 = vor.u32 %v538_v17, %v535_v3  ;;  %v368_v34 = vshll.u32 %v6470_v60, 16  ;;  %v374_v37 = vshll.u32 %v6475_v9, 16  ;;  %9012 = vst [vmem:[#allocation9_spill] sm:$0xff] %v6502_v16  ;;  %v6507_v11 = vld [vmem:[%s6298_s9 + $0x3c] sm:$0xf] }
  0x3d   : > { %v363_v39 = vsel %vm6342_vm4, %v358_v20, %v362_v2  ;;  %v549_v42 = vor.u32 %v548_v22, %v544_v18  ;;  %v554_v44 = vrot.slane %v552_v23, 5  ;;  %v367_v45 = vrot.slane %v365_v26, 4  ;;  %v6512_v23 = vld [vmem:[%s6298_s9 + $0x40] sm:$0xf]  ;;  %v1209_v51 = vld [vmem:[%s6298_s9 + $0xc] sm:$0xe] }
  0x3e   : > { %v5005_v48 = vcombine.low %v353_v27, %v363_v39  ;;  %v540_v4 = vrot.slane %v539_v28, 4  ;;  %v370_v49 = vrot.slane %v368_v34, 5  ;;  %v376_v50 = vrot.slane %v374_v37, 5 }
  0x3f   : > { %v550_v52 = vrot.slane %v549_v42, 4  ;;  %v378_v54 = vshrl.u32 %v6475_v9, 16  ;;  %v384_v55 = vshll.u32 %v6483_v33, 16  ;;  %v557_v57 = vshrl.u32 %v6488_v38, 16 }
  0x40   : > { %5704 = vmatmul.mubr.msk.bf16.gmra.mxu0 %vm702_vm3, %v5005_v48  ;;  %v545_v59 = vsel %vm6342_vm4, %v540_v4, %v544_v18  ;;  %v371_v0 = vor.u32 %v370_v49, %v367_v45  ;;  %v560_v2 = vshll.u32 %v6488_v38, 16  ;;  %v566_v3 = vshll.u32 %v6493_v47, 16  ;;  %v6521_v48 = vld [vmem:[%s6298_s9 + $0x44] sm:$0x1] }
  0x41   : > { %v555_v13 = vsel %vm6342_vm4, %v550_v52, %v554_v44  ;;  %v380_v17 = vrot.slane %v378_v54, 4  ;;  %v386_v20 = vrot.slane %v384_v55, 5  ;;  %v559_v22 = vrot.slane %v557_v57, 4  ;;  %v6526_v52 = vld [vmem:[%s6298_s9 + $0x9c] sm:$0xf] }
  0x42   : > { %v5013_v18 = vcombine.low %v545_v59, %v555_v13  ;;  %v372_v26 = vrot.slane %v371_v0, 4  ;;  %v562_v27 = vrot.slane %v560_v2, 5  ;;  %v568_v28 = vrot.slane %v566_v3, 5  ;;  %9013 = vst [vmem:[#allocation10_spill] sm:$0xff] %v6526_v52  ;;  %v6530_v13 = vld [vmem:[%s6298_s9 + $0xa0] sm:$0xf] }
  0x43   : > { %v381_v34 = vor.u32 %v380_v17, %v376_v50  ;;  %v570_v37 = vshrl.u32 %v6493_v47, 16  ;;  %v576_v39 = vshll.u32 %v6502_v16, 16  ;;  %v389_v42 = vshrl.u32 %v6507_v11, 16  ;;  %9014 = vst [vmem:[#allocation11_spill] sm:$0xff] %v6530_v13 }
  0x44   : > { %5720 = vmatmul.mubr.msk.bf16.gmra.mxu1 %vm702_vm3, %v5013_v18  ;;  %v377_v44 = vsel %vm6342_vm4, %v372_v26, %v376_v50  ;;  %v563_v45 = vor.u32 %v562_v27, %v559_v22  ;;  %v392_v4 = vshll.u32 %v6507_v11, 16  ;;  %v398_v49 = vshll.u32 %v6512_v23, 16  ;;  %v6536_v26 = vld [vmem:[%s6298_s9 + $0xa4] sm:$0x1] }
  0x45   : > { %v382_v54 = vrot.slane %v381_v34, 4  ;;  %v572_v55 = vrot.slane %v570_v37, 4  ;;  %v578_v57 = vrot.slane %v576_v39, 5  ;;  %v391_v59 = vrot.slane %v389_v42, 4  ;;  %9015 = vst [vmem:[#allocation12_spill] sm:$0xff] %v6536_v26 }
  0x46   : > { %v564_v0 = vrot.slane %v563_v45, 4  ;;  %v394_v2 = vrot.slane %v392_v4, 5  ;;  %v400_v3 = vrot.slane %v398_v49, 5  ;;  %v402_v50 = vshrl.u32 %v6512_v23, 16  ;;  %v6540_v34 = vld [vmem:[%s6298_s9 + $0x48] sm:$0xf] }
  0x47   : > { %v387_v17 = vsel %vm6342_vm4, %v382_v54, %v386_v20  ;;  %v573_v22 = vor.u32 %v572_v55, %v568_v28  ;;  %v408_v18 = vshll.u32 %v6521_v48, 16  ;;  %v581_v27 = vshrl.u32 %v6526_v52, 16 }
  0x48   : > { %v5006_v37 = vcombine.low %v377_v44, %v387_v17  ;;  %v569_v39 = vsel %vm6342_vm4, %v564_v0, %v568_v28  ;;  %v395_v42 = vor.u32 %v394_v2, %v391_v59  ;;  %v404_v45 = vrot.slane %v402_v50, 4  ;;  %v6549_v17 = vld [vmem:[%s6298_s9 + $0x4c] sm:$0xf]  ;;  %v6555_v2 = vld [vmem:[%s6298_s9 + $0x50] sm:$0x1] }
  0x49   : > { %v574_v4 = vrot.slane %v573_v22, 4  ;;  %v410_v49 = vrot.slane %v408_v18, 5  ;;  %v583_v20 = vrot.slane %v581_v27, 4  ;;  %v584_v54 = vshll.u32 %v6526_v52, 16 }
  0x4a   : > { %5707 = vmatprep.mubr.msk.bf16.mxu0 %vm702_vm3, %v5006_v37  ;;  %v396_v55 = vrot.slane %v395_v42, 4  ;;  %v405_v62 = vor.u32 %v404_v45, %v400_v3  ;;  %v590_v32 = vshll.u32 %v6530_v13, 16  ;;  %v594_v44 = vshrl.u32 %v6530_v13, 16  ;;  %v6561_v42 = vld [vmem:[%s6298_s9 + $0xa8] sm:$0xf] }
  0x4b   : > { %v579_v28 = vsel %vm6342_vm4, %v574_v4, %v578_v57  ;;  %v586_v59 = vrot.slane %v584_v54, 5  ;;  %v600_v0 = vshll.u32 %v6536_v26, 16  ;;  %v413_v50 = vshrl.u32 %v6540_v34, 16  ;;  %9016 = vst [vmem:[#allocation13_spill] sm:$0xff] %v6561_v42 }
  0x4c   : > { %v5014_v22 = vcombine.low %v569_v39, %v579_v28  ;;  %v401_v18 = vsel %vm6342_vm4, %v396_v55, %v400_v3  ;;  %v406_v27 = vrot.slane %v405_v62, 4  ;;  %v592_v37 = vrot.slane %v590_v32, 5 }
  0x4d   : > { %v587_v45 = vor.u32 %v586_v59, %v583_v20  ;;  %v596_v61 = vrot.slane %v594_v44, 4  ;;  %v602_v57 = vrot.slane %v600_v0, 5  ;;  %v415_v4 = vrot.slane %v413_v50, 4  ;;  %v6571_v44 = vld [vmem:[%s6298_s9 + $0xac] sm:$0xf] }
  0x4e   : > { %5723 = vmatprep.mubr.msk.bf16.mxu1 %vm702_vm3, %v5014_v22  ;;  %v411_v54 = vsel %vm6342_vm4, %v406_v27, %v410_v49  ;;  %v416_v39 = vshll.u32 %v6540_v34, 16  ;;  %v422_v28 = vshll.u32 %v6549_v17, 16  ;;  %v426_v62 = vshrl.u32 %v6549_v17, 16  ;;  %9017 = vst [vmem:[#allocation14_spill] sm:$0xff] %v6571_v44  ;;  %v6574_v22 = vld [vmem:[%s6298_s9 + $0xb0] sm:$0x1] }
  0x4f   : > { %v5007_v3 = vcombine.low %v401_v18, %v411_v54  ;;  %v588_v32 = vrot.slane %v587_v45, 4  ;;  %v597_v55 = vor.u32 %v596_v61, %v592_v37  ;;  %v432_v20 = vshll.u32 %v6555_v2, 16  ;;  %9018 = vst [vmem:[#allocation15_spill] sm:$0xff] %v6574_v22 }
  0x50   : > { %v418_v59 = vrot.slane %v416_v39, 5  ;;  %v424_v0 = vrot.slane %v422_v28, 5  ;;  %v428_v50 = vrot.slane %v426_v62, 4  ;;  %v605_v49 = vshrl.u32 %v6561_v42, 16  ;;  %v6583_v62 = vld [vmem:[%s6298_s9 + $0x54] sm:$0xf] }
  0x51   : > { %5708 = vmatmul.mubr.msk.bf16.gmra.mxu0 %vm702_vm3, %v5007_v3  ;;  %v593_v18 = vsel %vm6342_vm4, %v588_v32, %v592_v37  ;;  %v598_v27 = vrot.slane %v597_v55, 4  ;;  %v434_v61 = vrot.slane %v432_v20, 5  ;;  %v608_v45 = vshll.u32 %v6561_v42, 16  ;;  %v6590_v55 = vld [vmem:[%s6298_s9 + $0x58] sm:$0xf] }
  0x52   : > { %v419_v54 = vor.u32 %v418_v59, %v415_v4  ;;  %v429_v56 = vor.u32 %v428_v50, %v424_v0  ;;  %v607_v39 = vrot.slane %v605_v49, 4  ;;  %v614_v28 = vshll.u32 %v6571_v44, 16  ;;  %v6593_v49 = vld [vmem:[%s6298_s9 + $0x5c] sm:$0x1] }
  0x53   : > { %v603_v3 = vsel %vm6342_vm4, %v598_v27, %v602_v57  ;;  %v610_v26 = vrot.slane %v608_v45, 5  ;;  %v618_v37 = vshrl.u32 %v6571_v44, 16  ;;  %v624_v32 = vshll.u32 %v6574_v22, 16  ;;  %v1208_v22 = vld [vmem:[%s6298_s9] sm:$0xe] }
  0x54   : > { %v5015_v4 = vcombine.low %v593_v18, %v603_v3  ;;  %v420_v20 = vrot.slane %v419_v54, 4  ;;  %v430_v59 = vrot.slane %v429_v56, 4  ;;  %v616_v50 = vrot.slane %v614_v28, 5  ;;  %v6604_v54 = vld [vmem:[%s6298_s9 + $0xb4] sm:$0xf] }
  0x55   : > { %v611_v42 = vor.u32 %v610_v26, %v607_v39  ;;  %v620_v52 = vrot.slane %v618_v37, 4  ;;  %v626_v13 = vrot.slane %v624_v32, 5  ;;  %v437_v57 = vshrl.u32 %v6583_v62, 16  ;;  %9019 = vst [vmem:[#allocation16_spill] sm:$0xff] %v6604_v54  ;;  %v6607_v37 = vld [vmem:[%s6298_s9 + $0xb8] sm:$0xf] }
  0x56   : > { %5724 = vmatmul.mubr.msk.bf16.gmra.mxu1 %vm702_vm3, %v5015_v4  ;;  %v425_v27 = vsel %vm6342_vm4, %v420_v20, %v424_v0  ;;  %v435_v18 = vsel %vm6342_vm4, %v430_v59, %v434_v61  ;;  %v440_v56 = vshll.u32 %v6583_v62, 16  ;;  %v446_v45 = vshll.u32 %v6590_v55, 16  ;;  %v6612_v61 = vld [vmem:[%s6298_s9 + $0xbc] sm:$0x1] }
  0x57   : > { %v5008_v26 = vcombine.low %v425_v27, %v435_v18  ;;  %v612_v39 = vrot.slane %v611_v42, 4  ;;  %v621_v28 = vor.u32 %v620_v52, %v616_v50  ;;  %v439_v3 = vrot.slane %v437_v57, 4 }
  0x58   : > { %v442_v32 = vrot.slane %v440_v56, 5  ;;  %v448_v4 = vrot.slane %v446_v45, 5  ;;  %v450_v0 = vshrl.u32 %v6590_v55, 16  ;;  %v456_v20 = vshll.u32 %v6593_v49, 16 }
  0x59   : > { %5711 = vmatprep.mubr.msk.bf16.mxu0 %vm702_vm3, %v5008_v26  ;;  %v617_v59 = vsel %vm6342_vm4, %v612_v39, %v616_v50  ;;  %v622_v27 = vrot.slane %v621_v28, 4  ;;  %v629_v52 = vshrl.u32 %v6604_v54, 16  ;;  %v632_v42 = vshll.u32 %v6604_v54, 16 }
  0x5a   : > { %v443_v57 = vor.u32 %v442_v32, %v439_v3  ;;  %v452_v18 = vrot.slane %v450_v0, 4  ;;  %v458_v56 = vrot.slane %v456_v20, 5  ;;  %v638_v45 = vshll.u32 %v6607_v37, 16 }
  0x5b   : > { %v627_v44 = vsel %vm6342_vm4, %v622_v27, %v626_v13  ;;  %v631_v16 = vrot.slane %v629_v52, 4  ;;  %v634_v26 = vrot.slane %v632_v42, 5  ;;  %v642_v38 = vshrl.u32 %v6607_v37, 16 }
  0x5c   : > { %v5016_v50 = vcombine.low %v617_v59, %v627_v44  ;;  %v444_v39 = vrot.slane %v443_v57, 4  ;;  %v453_v28 = vor.u32 %v452_v18, %v448_v4  ;;  %v640_v47 = vrot.slane %v638_v45, 5  ;;  %v1210_v57 = vld [vmem:[%s6298_s9 + $0x18] sm:$0xe] }
  0x5d   : > { %v635_v54 = vor.u32 %v634_v26, %v631_v16  ;;  %v644_v3 = vrot.slane %v642_v38, 4  ;;  %v648_v32 = vshll.u32 %v6612_v61, 16  ;;  %v5066_v13 = vrot.slane %v1208_v22, 9 }
  0x5e   : > { %5727 = vmatprep.mubr.msk.bf16.mxu1 %vm702_vm3, %v5016_v50  ;;  %v449_v44 = vsel %vm6342_vm4, %v444_v39, %v448_v4  ;;  %v454_v20 = vrot.slane %v453_v28, 4  ;;  %v1261_v59 = vrot.slane %v6307_v6, 5  ;;  %v5035_v38 = vcombine.low %v6335_v29, %v6338_v30 }
  0x5f   : > { %v636_v16 = vrot.slane %v635_v54, 4  ;;  %v645_v27 = vor.u32 %v644_v3, %v640_v47  ;;  %v650_v52 = vrot.slane %v648_v32, 5  ;;  %v5067_v42 = vrot.slane %v1209_v51, 9 }
  0x60   : > { %v459_v18 = vsel %vm6342_vm4, %v454_v20, %v458_v56  ;;  %v1262_v22 = vsel %vm6628_vm7, %v5066_v13, %v1261_v59  ;;  %v1263_v45 = vrot.slane %v1261_v59, 4  ;;  %v9022_v4 = vrot.slane %v6338_v30, 5 }
  0x61   : > { %v5009_v50 = vcombine.low %v449_v44, %v459_v18  ;;  %v641_v54 = vsel %vm6342_vm4, %v636_v16, %v640_v47  ;;  %v646_v39 = vrot.slane %v645_v27, 4  ;;  %v5034_v51 = vcombine.low %v6304_v5, %v6307_v6  ;;  %v1211_v27 = vld [vmem:[%s6298_s9 + $0x24] sm:$0xe] }
  0x62   : > { %v1270_v26 = vrot.slane %v9022_v4, 4  ;;  %v9023_v28 = vrot.slane %v6310_v7, 5  ;;  %v9024_v3 = vmov %v9022_v4  ;;  %v5036_v13 = vcombine.low %v6377_v8, %v6384_v21  ;;  %v1213_v4 = vld [vmem:[%s6298_s9 + $0x3c] sm:$0xe] }
  0x63   : > { %v1269_v32 = vsel %vm6628_vm7, %v5067_v42, %v9024_v3  ;;  %v5068_v44 = vrot.slane %v1210_v57, 9  ;;  %5712 = vmatmul.mubr.msk.bf16.gmra.mxu0 %vm702_vm3, %v5009_v50  ;;  %v651_v47 = vsel %vm6342_vm4, %v646_v39, %v650_v52  ;;  %v9025_v6 = vrot.slane %v6348_v41, 5  ;;  %v1212_v42 = vld [vmem:[%s6298_s9 + $0x30] sm:$0xe]  ;;  %v1214_v39 = vld [vmem:[%s6298_s9 + $0x48] sm:$0xe] }
  0x64   : > { %v1265_v56 = vsel %vm6628_vm7, %v1263_v45, %v9023_v28  ;;  %v1275_v20 = vrot.slane %v6384_v21, 5  ;;  %v5017_v59 = vcombine.low %v641_v54, %v651_v47  ;;  %v1278_v16 = vrot.slane %v6390_v25, 5  ;;  %v1215_v47 = vld [vmem:[%s6298_s9 + $0x54] sm:$0xe]  ;;  %v6923_v21 = vld [vmem:[%s6298_s9 + $0x2c] sm:$0x1] }
  0x65   : > { %v5083_v5 = vcombine.low %v1262_v22, %v1265_v56  ;;  %v1272_v7 = vsel %vm6628_vm7, %v1270_v26, %v9025_v6  ;;  %v1829_v52 = vsel %vm751_vm0, %v6435_v19, 0  ;;  %v1282_v18 = vrot.slane %v6429_v10, 5 }
  0x66   : > { %v1276_v41 = vsel %vm6628_vm7, %v5068_v44, %v1275_v20  ;;  %v1277_v57 = vrot.slane %v1275_v20, 4  ;;  %5728 = vmatmul.mubr.msk.bf16.gmra.mxu1 %vm702_vm3, %v5017_v59  ;;  %v5084_v22 = vcombine.low %v1269_v32, %v1272_v7  ;;  %v2555_v25 = vsel %vm751_vm0, %v6403_v40, 0 }
  0x67   : > { %5767 = vmatprep.mubr.msk.bf16.mxu0 %vm702_vm3, %v5083_v5  ;;  %v1289_v45 = vrot.slane %v6475_v9, 5  ;;  %5733 = vmatprep.mubr.msk.bf16.mxu1 %vm702_vm3, %v5034_v51  ;;  %v5069_v26 = vrot.slane %v1211_v27, 9  ;;  %v1285_v50 = vrot.slane %v6440_v24, 5  ;;  %v5070_v54 = vrot.slane %v1212_v42, 9  ;;  %v6695_v24 = vld [vmem:[%s8968_s1 + $0xc] sm:$0x3] }
  0x68   : > { %v1279_v19 = vsel %vm6628_vm7, %v1277_v57, %v1278_v16  ;;  %v1284_v56 = vrot.slane %v1282_v18, 4  ;;  %v1292_v32 = vrot.slane %v6483_v33, 5  ;;  %v5071_v44 = vrot.slane %v1213_v4, 9 }
  0x69   : > { %v5085_v28 = vcombine.low %v1276_v41, %v1279_v19  ;;  %v1291_v3 = vrot.slane %v1289_v45, 4  ;;  %v1296_v40 = vrot.slane %v6512_v23, 5  ;;  %v1320_v5 = vrot.slane %v6324_v15, 5 }
  0x6a   : > { %v1299_v51 = vrot.slane %v6521_v48, 5  ;;  %v5072_v6 = vrot.slane %v1214_v39, 9  ;;  %v1303_v7 = vrot.slane %v6549_v17, 5  ;;  %v5037_v33 = vcombine.low %v6421_v1, %v6429_v10  ;;  %v1216_v1 = vld [vmem:[%s6298_s9 + $0x60] sm:$0xe] }
  0x6b   : > { %5768 = vmatmul.mubr.msk.bf16.vlgmr.msra.gmra.mxu0 %vm702_vm3, %v5084_v22  ;;  %v1283_v20 = vsel %vm6628_vm7, %v5069_v26, %v1282_v18  ;;  %v1298_v59 = vrot.slane %v1296_v40, 4  ;;  %v1306_v16 = vrot.slane %v6555_v2, 5  ;;  %v1286_v48 = vsel %vm6628_vm7, %v1284_v56, %v1285_v50  ;;  %v6723_v22 = vld [vmem:[%s8968_s1 + $0xa] sm:$0x3]  ;;  %v6748_v50 = vld [vmem:[%s6298_s9 + $0x6c] sm:$0xe] }
  0x6c   : > { %5834 = vmatpush3.bf16.msra.mxu0 %v2555_v25  ;;  %5771 = vmatprep.mubr.msk.bf16.mxu0 %vm702_vm3, %v5085_v28  ;;  %v1290_v27 = vsel %vm6628_vm7, %v5070_v54, %v1289_v45  ;;  %v1293_v42 = vsel %vm6628_vm7, %v1291_v3, %v1292_v32  ;;  %v1305_v41 = vrot.slane %v1303_v7, 4  ;;  %v6713_v10 = vsel %vm6628_vm7, %v5071_v44, %v1296_v40  ;;  %v1219_v39 = vld [vmem:[%s6298_s9 + $0x84] sm:$0xe]  ;;  %v6777_v44 = vld [vmem:[%s6298_s9 + $0x78] sm:$0xe] }
  0x6d   : > { %v6717_v2 = vsel %vm6628_vm7, %v5072_v6, %v1303_v7  ;;  %v5073_v57 = vrot.slane %v1215_v47, 9  ;;  %v1310_v18 = vrot.slane %v6590_v55, 5  ;;  %6012 = vmatprep.subr.msk.bf16.mxu0 %vm751_vm0, %v6695_v24  ;;  %v6733_v25 = vsel %vm6628_vm7, %v1298_v59, %v1299_v51  ;;  %v1220_v40 = vld [vmem:[%s6298_s9 + $0x90] sm:$0xe] }
  0x6e   : > { %5734 = vmatmul.mubr.msk.bf16.vlgmr.msra.gmra.mxu1 %vm702_vm3, %v5035_v38  ;;  %v6737_v45 = vsel %vm6628_vm7, %v1305_v41, %v1306_v16  ;;  %v1313_v4 = vrot.slane %v6593_v49, 5  ;;  %v1317_v19 = vrot.slane %v6321_v14, 5  ;;  %v5086_v29 = vcombine.low %v1283_v20, %v1286_v48  ;;  %v9026_v48 = vld [vmem:[#allocation6_spill] sm:$0xff] }
  0x6f   : > { %5800 = vmatpush3.bf16.msra.mxu1 %v1829_v52  ;;  %5737 = vmatprep.mubr.msk.bf16.mxu1 %vm702_vm3, %v5036_v13  ;;  %v5038_v30 = vcombine.low %v6470_v60, %v6475_v9  ;;  %v1312_v38 = vrot.slane %v1310_v18, 4  ;;  %v5074_v26 = vrot.slane %v1216_v1, 9  ;;  %v5087_v49 = vcombine.low %v1290_v27, %v1293_v42  ;;  %v1221_v42 = vld [vmem:[%s6298_s9 + $0x9c] sm:$0xe] }
  0x70   : > { %v5039_v52 = vcombine.low %v6507_v11, %v6512_v23  ;;  %v5040_v8 = vcombine.low %v6540_v34, %v6549_v17  ;;  %6011 = vmatprep.subr.msk.bf16.mxu1 %vm751_vm0, %v6723_v22  ;;  %v5088_v60 = vcombine.low %v6713_v10, %v6733_v25  ;;  %v5089_v9 = vcombine.low %v6717_v2, %v6737_v45  ;;  %v9027_v10 = vld [vmem:[#allocation8_spill] sm:$0xff]  ;;  %v9028_v2 = vld [vmem:[#allocation7_spill] sm:$0xff] }
  0x71   : > { %v1319_v54 = vrot.slane %v1317_v19, 4  ;;  %v6767_v28 = vsel %vm6628_vm7, %v5073_v57, %v1310_v18  ;;  %v6771_v56 = vsel %vm6628_vm7, %v1312_v38, %v1313_v4  ;;  %v5075_v32 = vrot.slane %v6748_v50, 9  ;;  %v1222_v18 = vld [vmem:[%s6298_s9 + $0xa8] sm:$0xe]  ;;  %v9030_v38 = vld [vmem:[#allocation11_spill] sm:$0xff] }
  0x72   : > { %v6783_v47 = vsel %vm6628_vm7, %v5074_v26, %v1317_v19  ;;  %v1324_v51 = vrot.slane %v6363_v58, 5  ;;  %v1327_v6 = vrot.slane %v6371_v63, 5  ;;  %v5077_v59 = vrot.slane %v1219_v39, 9  ;;  %v9029_v19 = vld [vmem:[#allocation9_spill] sm:$0xff]  ;;  %v9031_v26 = vld [vmem:[#allocation10_spill] sm:$0xff] }
  0x73   : > { %5772 = vmatmul.mubr.msk.bf16.gmra.mxu0 %vm702_vm3, %v5086_v29  ;;  %v1338_v16 = vrot.slane %v6454_v43, 5  ;;  %v1341_v27 = vrot.slane %v9026_v48, 5  ;;  %v5090_v41 = vcombine.low %v6767_v28, %v6771_v56  ;;  %v6801_v63 = vsel %vm6628_vm7, %v1319_v54, %v1320_v5  ;;  %v9033_v48 = vld [vmem:[#allocation14_spill] sm:$0xff] }
  0x74   : > { %5775 = vmatprep.mubr.msk.bf16.mxu0 %vm702_vm3, %v5087_v49  ;;  %v5076_v1 = vrot.slane %v6777_v44, 9  ;;  %v5078_v4 = vrot.slane %v1220_v40, 9  ;;  %v1345_v15 = vrot.slane %v9027_v10, 5  ;;  %v1326_v5 = vrot.slane %v1324_v51, 4  ;;  %v5180_v57 = vld [vmem:[%s6298_s9 + $0xc] sm:$0xf] }
  0x75   : > { %v6810_v25 = vsel %vm6628_vm7, %v5077_v59, %v1338_v16  ;;  %v1340_v45 = vrot.slane %v1338_v16, 4  ;;  %v1348_v29 = vrot.slane %v9029_v19, 5  ;;  %v5079_v49 = vrot.slane %v1221_v42, 9  ;;  %v9032_v59 = vld [vmem:[#allocation12_spill] sm:$0xff]  ;;  %v9034_v42 = vld [vmem:[#allocation13_spill] sm:$0xff] }
  0x76   : > { %5738 = vmatmul.mubr.msk.bf16.gmra.mxu1 %vm702_vm3, %v5037_v33  ;;  %v1331_v33 = vrot.slane %v6408_v46, 5  ;;  %v6824_v39 = vsel %vm6628_vm7, %v5078_v4, %v1345_v15  ;;  %v1347_v44 = vrot.slane %v1345_v15, 4  ;;  %v1352_v40 = vrot.slane %v9030_v38, 5  ;;  %v9035_v15 = vld [vmem:[#allocation15_spill] sm:$0xff] }
  0x77   : > { %5741 = vmatprep.mubr.msk.bf16.mxu1 %vm702_vm3, %v5038_v30  ;;  %v6820_v54 = vsel %vm6628_vm7, %v1340_v45, %v1341_v27  ;;  %v1355_v16 = vrot.slane %v9032_v59, 5  ;;  %v5080_v45 = vrot.slane %v1222_v18, 9  ;;  %v1359_v4 = vrot.slane %v9033_v48, 5 }
  0x78   : > { %v6834_v27 = vsel %vm6628_vm7, %v1347_v44, %v1348_v29  ;;  %v1362_v50 = vrot.slane %v9035_v15, 5  ;;  %v6844_v19 = vsel %vm6628_vm7, %v5079_v49, %v1352_v40  ;;  %v1354_v7 = vrot.slane %v1352_v40, 4  ;;  %v9036_v29 = vld [vmem:[#allocation16_spill] sm:$0xff]  ;;  %v9037_v15 = vld [vmem:[#allocation5_spill] sm:$0xff]  ;;  %v6859_v49 = vld [vmem:[%s6298_s9 + $0x10] sm:$0xf] }
  0x79   : > { %v6851_v18 = vsel %vm6628_vm7, %v5075_v32, %v1324_v51  ;;  %v6856_v59 = vsel %vm6628_vm7, %v5080_v45, %v1359_v4  ;;  %v1361_v30 = vrot.slane %v1359_v4, 4  ;;  %v5183_v40 = vld [vmem:[%s6298_s9 + $0x18] sm:$0xf]  ;;  %v1333_v20 = vrot.slane %v1331_v33, 4 }
  0x7a   : > { %v2073_v44 = vshrl.u32 %v5180_v57, 16  ;;  %v2076_v32 = vshll.u32 %v5180_v57, 16  ;;  %v5091_v51 = vcombine.low %v6783_v47, %v6801_v63  ;;  %v6874_v45 = vsel %vm6628_vm7, %v1326_v5, %v1327_v6  ;;  %v1223_v57 = vld [vmem:[%s6298_s9 + $0xb4] sm:$0xe]  ;;  %v6895_v47 = vld [vmem:[%s6298_s9 + $0x14] sm:$0x1] }
  0x7b   : > { %5776 = vmatmul.mubr.msk.bf16.gmra.mxu0 %vm702_vm3, %v5088_v60  ;;  %v1334_v60 = vrot.slane %v9037_v15, 5  ;;  %v6889_v11 = vsel %vm6628_vm7, %v5076_v1, %v1331_v33  ;;  %v2082_v6 = vshll.u32 %v6859_v49, 16  ;;  %v5184_v63 = vld [vmem:[%s6298_s9 + $0x1c] sm:$0xf]  ;;  %v2086_v17 = vshrl.u32 %v6859_v49, 16 }
  0x7c   : > { %5779 = vmatprep.mubr.msk.bf16.mxu0 %vm702_vm3, %v5089_v9  ;;  %v6864_v9 = vsel %vm6628_vm7, %v1354_v7, %v1355_v16  ;;  %v6880_v7 = vsel %vm6628_vm7, %v1361_v30, %v1362_v50  ;;  %v2075_v5 = vrot.slane %v2073_v44, 4  ;;  %v2078_v34 = vrot.slane %v2076_v32, 5  ;;  %v5186_v15 = vld [vmem:[%s6298_s9 + $0x24] sm:$0xf]  ;;  %v6908_v44 = vld [vmem:[%s6298_s9 + $0x28] sm:$0xf] }
  0x7d   : > { %v2097_v50 = vshrl.u32 %v5183_v40, 16  ;;  %v1335_v1 = vsel %vm6628_vm7, %v1333_v20, %v1334_v60  ;;  %v5081_v33 = vrot.slane %v1223_v57, 9  ;;  %v6903_v30 = vrot.slane %v2082_v6, 5 }
  0x7e   : > { %5742 = vmatmul.mubr.msk.bf16.gmra.mxu1 %vm702_vm3, %v5039_v52  ;;  %v1366_v52 = vrot.slane %v6607_v37, 5  ;;  %v2100_v16 = vshll.u32 %v5183_v40, 16  ;;  %v1369_v23 = vrot.slane %v6612_v61, 5  ;;  %v2088_v4 = vrot.slane %v2086_v17, 4 }
  0x7f   : > { %5745 = vmatprep.mubr.msk.bf16.mxu1 %vm702_vm3, %v5040_v8  ;;  %v5185_v8 = vld [vmem:[%s6298_s9 + $0x20] sm:$0x1]  ;;  %v2099_v3 = vrot.slane %v2097_v50, 4  ;;  %v2106_v13 = vshll.u32 %v5184_v63, 16  ;;  %v2092_v20 = vshll.u32 %v6895_v47, 16  ;;  %v2110_v57 = vshrl.u32 %v5184_v63, 16 }
  0x80   : > { %v1368_v32 = vrot.slane %v1366_v52, 4  ;;  %v2102_v60 = vrot.slane %v2100_v16, 5  ;;  %v5092_v61 = vcombine.low %v6851_v18, %v6874_v45  ;;  %v5093_v40 = vcombine.low %v6889_v11, %v1335_v1 }
  0x81   : > { %v2079_v6 = vor.u32 %v2078_v34, %v2075_v5  ;;  %v6919_v17 = vrot.slane %v2106_v13, 5  ;;  %v2089_v28 = vor.u32 %v2088_v4, %v6903_v30  ;;  %v2116_v50 = vshll.u32 %v5185_v8, 16  ;;  %v6946_v5 = vld [vmem:[%s6298_s9 + $0x34] sm:$0xf] }
  0x82   : > { %v2103_v56 = vor.u32 %v2102_v60, %v2099_v3  ;;  %v6931_v18 = vsel %vm6628_vm7, %v5081_v33, %v1366_v52  ;;  %v2121_v13 = vshrl.u32 %v5186_v15, 16  ;;  %v2124_v45 = vshll.u32 %v5186_v15, 16  ;;  %v5189_v52 = vld [vmem:[%s6298_s9 + $0x30] sm:$0xf] }
  0x83   : > { %5780 = vmatmul.mubr.msk.bf16.gmra.mxu0 %vm702_vm3, %v5090_v41  ;;  %v2112_v41 = vrot.slane %v2110_v57, 4  ;;  %v2130_v11 = vshll.u32 %v6908_v44, 16  ;;  %v9039_v3 = vcombine.low %v6317_v12, %v6321_v14  ;;  %v6940_v4 = vsel %vm6628_vm7, %v1368_v32, %v1369_v23 }
  0x84   : > { %5783 = vmatprep.mubr.msk.bf16.mxu0 %vm702_vm3, %v5091_v51  ;;  %v9038_v51 = vcombine.low %v6583_v62, %v6590_v55  ;;  %v2094_v62 = vrot.slane %v2092_v20, 5  ;;  %v2134_v63 = vshrl.u32 %v6908_v44, 16  ;;  %v2080_v34 = vrot.slane %v2079_v6, 4 }
  0x85   : > { %v2113_v55 = vor.u32 %v2112_v41, %v6919_v17  ;;  %v2123_v8 = vrot.slane %v2121_v13, 4  ;;  %v2126_v1 = vrot.slane %v2124_v45, 5  ;;  %v6948_v33 = vrot.slane %v2130_v11, 5  ;;  %v6954_v41 = vld [vmem:[%s6298_s9 + $0x38] sm:$0x1] }
  0x86   : > { %5746 = vmatmul.mubr.msk.bf16.gmra.mxu1 %vm702_vm3, %v9038_v51  ;;  %v2090_v12 = vrot.slane %v2089_v28, 4  ;;  %v2104_v14 = vrot.slane %v2103_v56, 4  ;;  %v2118_v16 = vrot.slane %v2116_v50, 5  ;;  %v2136_v23 = vrot.slane %v2134_v63, 4  ;;  %v5192_v13 = vld [vmem:[%s6298_s9 + $0x3c] sm:$0xf] }
  0x87   : > { %5749 = vmatprep.mubr.msk.bf16.mxu1 %vm702_vm3, %v9039_v3  ;;  %v2114_v15 = vrot.slane %v2113_v55, 4  ;;  %v2140_v32 = vshll.u32 %v6923_v21, 16  ;;  %v2145_v20 = vshrl.u32 %v5189_v52, 16  ;;  %v2148_v60 = vshll.u32 %v5189_v52, 16 }
  0x88   : > { %v2127_v57 = vor.u32 %v2126_v1, %v2123_v8  ;;  %v2137_v6 = vor.u32 %v2136_v23, %v6948_v33  ;;  %v2154_v28 = vshll.u32 %v6946_v5, 16  ;;  %v2158_v56 = vshrl.u32 %v6946_v5, 16  ;;  %v5195_v8 = vld [vmem:[%s6298_s9 + $0x48] sm:$0xf]  ;;  %v6981_v1 = vld [vmem:[%s6298_s9 + $0x4c] sm:$0xf] }
  0x89   : > { %v2147_v50 = vrot.slane %v2145_v20, 4  ;;  %v2150_v51 = vrot.slane %v2148_v60, 5  ;;  %v9040_v3 = vcombine.low %v6359_v53, %v6363_v58  ;;  %v5098_v55 = vcombine.low %v6931_v18, %v6940_v4 }
  0x8a   : > { %v6960_v45 = vrot.slane %v2154_v28, 5  ;;  %v2160_v11 = vrot.slane %v2158_v56, 4  ;;  %v2095_v63 = vsel %vm6342_vm4, %v2090_v12, %v2094_v62  ;;  %v2109_v52 = vsel %vm6342_vm4, %v2104_v14, %v6919_v17 }
  0x8b   : > { %5784 = vmatmul.mubr.msk.bf16.gmra.mxu0 %vm702_vm3, %v5092_v61  ;;  %v6963_v61 = vld [vmem:[%s6298_s9 + $0x40] sm:$0xf]  ;;  %v9041_v53 = vcombine.low %v6397_v35, %v6408_v46  ;;  %v2119_v58 = vsel %vm6342_vm4, %v2114_v15, %v2118_v16  ;;  %v2128_v23 = vrot.slane %v2127_v57, 4  ;;  %v2151_v20 = vor.u32 %v2150_v51, %v2147_v50  ;;  %v7015_v50 = vld [vmem:[%s6298_s9 + $0x44] sm:$0x1] }
  0x8c   : > { %5787 = vmatprep.mubr.msk.bf16.mxu0 %vm702_vm3, %v5093_v40  ;;  %v2085_v40 = vsel %vm6342_vm4, %v2080_v34, %v6903_v30  ;;  %v2138_v30 = vrot.slane %v2137_v6, 4  ;;  %v2142_v34 = vrot.slane %v2140_v32, 5  ;;  %v2164_v62 = vshll.u32 %v6954_v41, 16  ;;  %v5198_v51 = vld [vmem:[%s6298_s9 + $0x54] sm:$0xf] }
  0x8d   : > { %v2169_v12 = vshrl.u32 %v5192_v13, 16  ;;  %v2172_v17 = vshll.u32 %v5192_v13, 16  ;;  %v6992_v14 = vsel %vm751_vm0, %v6723_v22, 0  ;;  %v2161_v35 = vor.u32 %v2160_v11, %v6960_v45 }
  0x8e   : > { %5750 = vmatmul.mubr.msk.bf16.gmra.mxu1 %vm702_vm3, %v9040_v3  ;;  %v2178_v46 = vshll.u32 %v6963_v61, 16  ;;  %v2182_v16 = vshrl.u32 %v6963_v61, 16  ;;  %v6997_v15 = vcombine.low %v2085_v40, %v2095_v63  ;;  %v7001_v32 = vsel %vm751_vm0, %v6695_v24, 0  ;;  %v7024_v40 = vld [vmem:[%s6298_s9 + $0x58] sm:$0xf] }
  0x8f   : > { %5753 = vmatprep.mubr.msk.bf16.mxu1 %vm702_vm3, %v9041_v53  ;;  %v2193_v60 = vshrl.u32 %v5195_v8, 16  ;;  %v2196_v57 = vshll.u32 %v5195_v8, 16  ;;  %v9042_v6 = vcombine.low %v6810_v25, %v6820_v54  ;;  %v7007_v22 = vcombine.low %v2109_v52, %v2119_v58  ;;  %v7029_v8 = vld [vmem:[%s6298_s9 + $0x50] sm:$0x1] }
  0x90   : > { %v2133_v28 = vsel %vm6342_vm4, %v2128_v23, %v6948_v33  ;;  %v2143_v56 = vsel %vm6342_vm4, %v2138_v30, %v2142_v34  ;;  %v2202_v24 = vshll.u32 %v6981_v1, 16  ;;  %v9043_v25 = vcombine.low %v6824_v39, %v6834_v27  ;;  %v5201_v34 = vld [vmem:[%s6298_s9 + $0x60] sm:$0xf] }
  0x91   : > { %v2152_v54 = vrot.slane %v2151_v20, 4  ;;  %v2166_v13 = vrot.slane %v2164_v62, 5  ;;  %v2171_v11 = vrot.slane %v2169_v12, 4  ;;  %v2174_v3 = vrot.slane %v2172_v17, 5 }
  0x92   : > { %v2162_v33 = vrot.slane %v2161_v35, 4  ;;  %v7026_v63 = vrot.slane %v2178_v46, 5  ;;  %v2184_v52 = vrot.slane %v2182_v16, 4  ;;  %v2206_v53 = vshrl.u32 %v6981_v1, 16  ;;  %v7046_v35 = vld [vmem:[%s6298_s9 + $0x5c] sm:$0x1] }
  0x93   : > { %5788 = vmatmul.mubr.msk.bf16.gmra.mxu0 %vm702_vm3, %v9042_v6  ;;  %v9044_v39 = vcombine.low %v6447_v36, %v6454_v43  ;;  %v2195_v27 = vrot.slane %v2193_v60, 4  ;;  %v2198_v58 = vrot.slane %v2196_v57, 5  ;;  %v2217_v23 = vshrl.u32 %v5198_v51, 16 }
  0x94   : > { %5791 = vmatprep.mubr.msk.bf16.mxu0 %vm702_vm3, %v9043_v25  ;;  %v2220_v30 = vshll.u32 %v5198_v51, 16  ;;  %v9045_v20 = vcombine.low %v9028_v2, %v9027_v10  ;;  %v7041_v62 = vcombine.low %v2133_v28, %v2143_v56  ;;  %v7043_v12 = vrot.slane %v2202_v24, 5  ;;  %v7059_v28 = vld [vmem:[%s6298_s9 + $0x64] sm:$0xf] }
  0x95   : > { %v2208_v17 = vrot.slane %v2206_v53, 4  ;;  %v2226_v36 = vshll.u32 %v7024_v40, 16  ;;  %v2188_v43 = vshll.u32 %v7015_v50, 16  ;;  %v2219_v46 = vrot.slane %v2217_v23, 4 }
  0x96   : > { %5754 = vmatmul.mubr.msk.bf16.gmra.mxu1 %vm702_vm3, %v9044_v39  ;;  %v2222_v16 = vrot.slane %v2220_v30, 5  ;;  %v2230_v60 = vshrl.u32 %v7024_v40, 16  ;;  %v2157_v10 = vsel %vm6342_vm4, %v2152_v54, %v6960_v45  ;;  %v2167_v2 = vsel %vm6342_vm4, %v2162_v33, %v2166_v13  ;;  %v7081_v30 = vld [vmem:[%s6298_s9 + $0x68] sm:$0x1] }
  0x97   : > { %5757 = vmatprep.mubr.msk.bf16.mxu1 %vm702_vm3, %v9045_v20  ;;  %v2175_v57 = vor.u32 %v2174_v3, %v2171_v11  ;;  %v7056_v6 = vrot.slane %v2226_v36, 5  ;;  %v2185_v56 = vor.u32 %v2184_v52, %v7026_v63  ;;  %v2199_v24 = vor.u32 %v2198_v58, %v2195_v27  ;;  %v5204_v3 = vld [vmem:[%s6298_s9 + $0x6c] sm:$0xf]  ;;  %v7078_v27 = vld [vmem:[%s6298_s9 + $0x70] sm:$0xf] }
  0x98   : > { %v2212_v51 = vshll.u32 %v7029_v8, 16  ;;  %v2232_v25 = vrot.slane %v2230_v60, 4  ;;  %v9046_v53 = vcombine.low %v6844_v19, %v6864_v9  ;;  %v2209_v45 = vor.u32 %v2208_v17, %v7043_v12 }
  0x99   : > { %v2223_v54 = vor.u32 %v2222_v16, %v2219_v46  ;;  %v2241_v13 = vshrl.u32 %v5201_v34, 16  ;;  %v2244_v11 = vshll.u32 %v5201_v34, 16  ;;  %v9047_v33 = vcombine.low %v6856_v59, %v6880_v7  ;;  %v5207_v16 = vld [vmem:[%s6298_s9 + $0x78] sm:$0xf] }
  0x9a   : > { %v2233_v52 = vor.u32 %v2232_v25, %v7056_v6  ;;  %v2236_v39 = vshll.u32 %v7046_v35, 16  ;;  %v2250_v19 = vshll.u32 %v7059_v28, 16  ;;  %v2254_v9 = vshrl.u32 %v7059_v28, 16 }
  0x9b   : > { %5792 = vmatmul.mubr.msk.bf16.gmra.mxu0 %vm702_vm3, %v9046_v53  ;;  %v2176_v58 = vrot.slane %v2175_v57, 4  ;;  %v2190_v23 = vrot.slane %v2188_v43, 5  ;;  %v2243_v34 = vrot.slane %v2241_v13, 4  ;;  %v2246_v20 = vrot.slane %v2244_v11, 5 }
  0x9c   : > { %5795 = vmatprep.mubr.msk.bf16.mxu0 %vm702_vm3, %v9047_v33  ;;  %v9048_v59 = vcombine.low %v9031_v26, %v9030_v38  ;;  %v7087_v7 = vcombine.low %v2157_v10, %v2167_v2  ;;  %v2186_v17 = vrot.slane %v2185_v56, 4  ;;  %v2200_v36 = vrot.slane %v2199_v24, 4  ;;  %v7097_v2 = vld [vmem:[%s6298_s9 + $0x7c] sm:$0xf] }
  0x9d   : > { %v7089_v46 = vrot.slane %v2250_v19, 5  ;;  %v9049_v43 = vcombine.low %v9034_v42, %v9033_v48  ;;  %v2210_v60 = vrot.slane %v2209_v45, 4  ;;  %v2214_v57 = vrot.slane %v2212_v51, 5  ;;  %9050 = vst [vmem:[#allocation6_spill] sm:$0xff] %v7097_v2  ;;  %v5210_v19 = vld [vmem:[%s6298_s9 + $0x84] sm:$0xf] }
  0x9e   : > { %5758 = vmatmul.mubr.msk.bf16.gmra.mxu1 %vm702_vm3, %v9048_v59  ;;  %v2224_v25 = vrot.slane %v2223_v54, 4  ;;  %v2256_v38 = vrot.slane %v2254_v9, 4  ;;  %v2234_v26 = vrot.slane %v2233_v52, 4  ;;  %v2238_v53 = vrot.slane %v2236_v39, 5 }
  0x9f   : > { %5761 = vmatprep.mubr.msk.bf16.mxu1 %vm702_vm3, %v9049_v43  ;;  %v2247_v13 = vor.u32 %v2246_v20, %v2243_v34  ;;  %v2265_v10 = vshrl.u32 %v5204_v3, 16  ;;  %v2181_v56 = vsel %vm6342_vm4, %v2176_v58, %v7026_v63  ;;  %v2268_v24 = vshll.u32 %v5204_v3, 16  ;;  %v6089_v63 = vld [vmem:[%s6298_s9 + $0xc] sm:$0xff]   ;;  %v7131_v34 = vld [vmem:[%s6298_s9 + $0x88] sm:$0xf] }
  0xa0   : > { %v2274_v48 = vshll.u32 %v7078_v27, 16  ;;  %v2278_v42 = vshrl.u32 %v7078_v27, 16  ;;  %v2191_v51 = vsel %vm6342_vm4, %v2186_v17, %v2190_v23  ;;  %v2205_v45 = vsel %vm6342_vm4, %v2200_v36, %v7043_v12  ;;  %9051 = vst [vmem:[#allocation8_spill] sm:$0xff] %v7131_v34  ;;  %v7140_v36 = vld [vmem:[%s6298_s9 + $0x74] sm:$0x1] }
  0xa1   : > { %v2257_v54 = vor.u32 %v2256_v38, %v7089_v46  ;;  %v2260_v11 = vshll.u32 %v7081_v30, 16  ;;  %v2215_v3 = vsel %vm6342_vm4, %v2210_v60, %v2214_v57  ;;  %v2229_v33 = vsel %vm6342_vm4, %v2224_v25, %v7056_v6  ;;  %9053 = vst [vmem:[#allocation7_spill] sm:$0xff] %v7140_v36  ;;  %v7150_v38 = vld [vmem:[%s6298_s9 + $0x80] sm:$0x1] }
  0xa2   : > { %v2289_v52 = vshrl.u32 %v5207_v16, 16  ;;  %v2292_v12 = vshll.u32 %v5207_v16, 16  ;;  %v2239_v18 = vsel %vm6342_vm4, %v2234_v26, %v2238_v53  ;;  %v2248_v4 = vrot.slane %v2247_v13, 4  ;;  %9054 = vst [vmem:[#allocation9_spill] sm:$0xff] %v7150_v38  ;;  %v7153_v26 = vld [vmem:[%s6298_s9 + $0x8c] sm:$0x1] }
  0xa3   : > { %5796 = vmatmul.mubr.msk.bf16.gmra.mxu0 %vm702_vm3, %v5098_v55  ;;  %v2267_v55 = vrot.slane %v2265_v10, 4  ;;  %v2298_v39 = vshll.u32 %v7097_v2, 16  ;;  %v2270_v9 = vrot.slane %v2268_v24, 5  ;;  %v7127_v58 = vrot.slane %v2274_v48, 5  ;;  %9055 = vst [vmem:[#allocation11_spill] sm:$0xff] %v7153_v26  ;;  %v6090_v10 = vld [vmem:[%s6298_s9 + $0x18] sm:$0xff]  }
  0xa4   : > { %5835 = vmatprep.mubr.msk.bf16.mxu0 %vm702_vm3, %v6997_v15  ;;  %v2280_v23 = vrot.slane %v2278_v42, 4  ;;  %v2302_v6 = vshrl.u32 %v7097_v2, 16  ;;  %v9052_v15 = vcombine.low %v9036_v29, %v6607_v37  ;;  %v7137_v20 = vcombine.low %v2181_v56, %v2191_v51  ;;  %v5213_v51 = vld [vmem:[%s6298_s9 + $0x90] sm:$0xf] }
  0xa5   : > { %v2258_v59 = vrot.slane %v2257_v54, 4  ;;  %v2262_v17 = vrot.slane %v2260_v11, 5  ;;  %v2291_v16 = vrot.slane %v2289_v52, 4  ;;  %v2294_v43 = vrot.slane %v2292_v12, 5 }
  0xa6   : > { %5762 = vmatmul.mubr.msk.bf16.gmra.mxu1 %vm702_vm3, %v9052_v15  ;;  %v7143_v60 = vrot.slane %v2298_v39, 5  ;;  %v2304_v57 = vrot.slane %v2302_v6, 4  ;;  %v2313_v25 = vshrl.u32 %v5210_v19, 16  ;;  %v7145_v37 = vcombine.low %v2205_v45, %v2215_v3  ;;  %v7164_v45 = vld [vmem:[%s6298_s9 + $0x94] sm:$0xf] }
  0xa7   : > { %5801 = vmatprep.mubr.msk.bf16.mxu1 %vm702_vm3, %v6089_v63  ;;  %v7147_v29 = vcombine.low %v2229_v33, %v2239_v18  ;;  %v2316_v53 = vshll.u32 %v5210_v19, 16  ;;  %v2322_v13 = vshll.u32 %v7131_v34, 16  ;;  %v2253_v56 = vsel %vm6342_vm4, %v2248_v4, %v7089_v46  ;;  %9056 = vst [vmem:[#allocation10_spill] sm:$0xff] %v7164_v45  ;;  %v7172_v33 = vld [vmem:[%s8968_s1 + $0x10] sm:$0x3]  ;;  %v6091_v46 = vld [vmem:[%s6298_s9 + $0x24] sm:$0xff]  }
  0xa8   : > { %v2271_v24 = vor.u32 %v2270_v9, %v2267_v55  ;;  %v2281_v48 = vor.u32 %v2280_v23, %v7127_v58  ;;  %v2284_v42 = vshll.u32 %v7140_v36, 16  ;;  %v2315_v54 = vrot.slane %v2313_v25, 4  ;;  %9057 = vst [vmem:[#allocation12_spill] sm:$0xff] %v7172_v33 }
  0xa9   : > { %v2318_v11 = vrot.slane %v2316_v53, 5  ;;  %v7166_v63 = vrot.slane %v2322_v13, 5  ;;  %v2326_v3 = vshrl.u32 %v7131_v34, 16  ;;  %v2263_v52 = vsel %vm6342_vm4, %v2258_v59, %v2262_v17 }
  0xaa   : > { %v2295_v12 = vor.u32 %v2294_v43, %v2291_v16  ;;  %v2305_v18 = vor.u32 %v2304_v57, %v7143_v60  ;;  %v2308_v4 = vshll.u32 %v7150_v38, 16  ;;  %v2337_v19 = vshrl.u32 %v5213_v51, 16  ;;  %v7206_v57 = vld [vmem:[%s6298_s9 + $0xa0] sm:$0xf] }
  0xab   : > { %5836 = vmatmul.mubr.msk.bf16.vlgmr.msra.gmra.mxu0 %vm702_vm3, %v7007_v22  ;;  %v2319_v55 = vor.u32 %v2318_v11, %v2315_v54  ;;  %v2328_v39 = vrot.slane %v2326_v3, 4  ;;  %v2340_v9 = vshll.u32 %v5213_v51, 16  ;;  %v5216_v22 = vld [vmem:[%s6298_s9 + $0x9c] sm:$0xf]  ;;  %v7185_v23 = vrot.slane %v2271_v24, 4  ;;  %9059 = vst [vmem:[#allocation13_spill] sm:$0xff] %v7206_v57 }
  0xac   : > { %5902 = vmatpush3.bf16.msra.mxu0 %v7001_v32  ;;  %5839 = vmatprep.mubr.msk.bf16.mxu0 %vm702_vm3, %v7041_v62  ;;  %v7187_v6 = vrot.slane %v2284_v42, 5  ;;  %v2332_v15 = vshll.u32 %v7153_v26, 16  ;;  %v2346_v59 = vshll.u32 %v7164_v45, 16  ;;  %v7194_v32 = vld [vmem:[%s8968_s1 + $0xe] sm:$0x3]  ;;  %v7199_v62 = vcombine.low %v2253_v56, %v2263_v52 }
  0xad   : > { %9058 = vst [vmem:[#allocation14_spill] sm:$0xff] %v7194_v32  ;;  %6014 = vmatprep.subr.msk.bf16.mxu0 %vm751_vm0, %v7172_v33  ;;  %v7201_v17 = vrot.slane %v2281_v48, 4  ;;  %v2329_v16 = vor.u32 %v2328_v39, %v7166_v63  ;;  %v2350_v43 = vshrl.u32 %v7164_v45, 16  ;;  %v7210_v25 = vrot.slane %v2295_v12, 4  ;;  %v7219_v56 = vld [vmem:[%s6298_s9 + $0x98] sm:$0x1] }
  0xae   : > { %5802 = vmatmul.mubr.msk.bf16.vlgmr.msra.gmra.mxu1 %vm702_vm3, %v6090_v10  ;;  %v7212_v53 = vrot.slane %v2305_v18, 4  ;;  %v7214_v13 = vrot.slane %v2308_v4, 5  ;;  %v7216_v10 = vrot.slane %v2319_v55, 4  ;;  %9060 = vst [vmem:[#allocation15_spill] sm:$0xff] %v7219_v56  ;;  %v2339_v24 = vrot.slane %v2337_v19, 4  ;;  %v6093_v19 = vld [vmem:[%s6298_s9 + $0x3c] sm:$0xff]  }
  0xaf   : > { %5868 = vmatpush3.bf16.msra.mxu1 %v6992_v14  ;;  %5805 = vmatprep.mubr.msk.bf16.mxu1 %vm702_vm3, %v6091_v46  ;;  %v2342_v48 = vrot.slane %v2340_v9, 5  ;;  %v2361_v42 = vshrl.u32 %v5216_v22, 16  ;;  %v2364_v51 = vshll.u32 %v5216_v22, 16  ;;  %v6092_v14 = vld [vmem:[%s6298_s9 + $0x30] sm:$0xff]   ;;  %v7228_v11 = vrot.slane %v2332_v15, 5 }
  0xb0   : > { %6013 = vmatprep.subr.msk.bf16.mxu1 %vm751_vm0, %v7194_v32  ;;  %v7230_v3 = vrot.slane %v2346_v59, 5  ;;  %v2370_v46 = vshll.u32 %v7206_v57, 16  ;;  %v5219_v52 = vld [vmem:[%s6298_s9 + $0xa8] sm:$0xf]  ;;  %v7234_v12 = vrot.slane %v2329_v16, 4  ;;  %v2352_v18 = vrot.slane %v2350_v43, 4 }
  0xb1   : > { %v2356_v4 = vshll.u32 %v7219_v56, 16  ;;  %v2374_v55 = vshrl.u32 %v7206_v57, 16  ;;  %v7239_v39 = vld [vmem:[%s6298_s9 + $0xac] sm:$0xf]  ;;  %v2343_v59 = vor.u32 %v2342_v48, %v2339_v24  ;;  %v7263_v16 = vld [vmem:[%s6298_s9 + $0xa4] sm:$0x1] }
  0xb2   : > { %9061 = vst [vmem:[#allocation16_spill] sm:$0xff] %v7239_v39  ;;  %9062 = vst [vmem:[#allocation5_spill] sm:$0xff] %v7263_v16  ;;  %v2363_v43 = vrot.slane %v2361_v42, 4  ;;  %v2366_v22 = vrot.slane %v2364_v51, 5  ;;  %v2385_v54 = vshrl.u32 %v5219_v52, 16  ;;  %v7265_v9 = vrot.slane %v2370_v46, 5 }
  0xb3   : > { %5840 = vmatmul.mubr.msk.bf16.gmra.mxu0 %vm702_vm3, %v7087_v7  ;;  %v2376_v32 = vrot.slane %v2374_v55, 4  ;;  %v2388_v15 = vshll.u32 %v5219_v52, 16  ;;  %v2394_v33 = vshll.u32 %v7239_v39, 16  ;;  %v5222_v57 = vld [vmem:[%s6298_s9 + $0xb4] sm:$0xf]  ;;  %v2353_v24 = vor.u32 %v2352_v18, %v7230_v3 }
  0xb4   : > { %5843 = vmatprep.mubr.msk.bf16.mxu0 %vm702_vm3, %v7137_v20  ;;  %v2335_v20 = vsel %vm6342_vm4, %v7234_v12, %v7228_v11  ;;  %v7275_v48 = vrot.slane %v2356_v4, 5  ;;  %v7278_v42 = vld [vmem:[%s6298_s9 + $0xb0] sm:$0x1]  ;;  %v2387_v51 = vrot.slane %v2385_v54, 4  ;;  %v7281_v46 = vld [vmem:[%s6298_s9 + $0xb8] sm:$0xf]  ;;  %v2367_v18 = vor.u32 %v2366_v22, %v2363_v43 }
  0xb5   : > { %9063 = vst [vmem:[#allocation17_spill] sm:$0xff] %v7278_v42  ;;  %9064 = vst [vmem:[#allocation18_spill] sm:$0xff] %v7281_v46  ;;  %v2390_v52 = vrot.slane %v2388_v15, 5  ;;  %v7285_v55 = vrot.slane %v2394_v33, 5  ;;  %v2398_v11 = vshrl.u32 %v7239_v39, 16  ;;  %v7288_v12 = vrot.slane %v2343_v59, 4 }
  0xb6   : > { %5806 = vmatmul.mubr.msk.bf16.gmra.mxu1 %vm702_vm3, %v6092_v14  ;;  %v2380_v14 = vshll.u32 %v7263_v16, 16  ;;  %v7291_v4 = vld [vmem:[%s6298_s9 + $0xbc] sm:$0x1]  ;;  %v2409_v54 = vshrl.u32 %v5222_v57, 16  ;;  %v2412_v7 = vshll.u32 %v5222_v57, 16  ;;  %v2377_v56 = vor.u32 %v2376_v32, %v7265_v9  ;;  %v6094_v16 = vld [vmem:[%s6298_s9 + $0x48] sm:$0xff]  }
  0xb7   : > { %5809 = vmatprep.mubr.msk.bf16.mxu1 %vm702_vm3, %v6093_v19  ;;  %v2400_v45 = vrot.slane %v2398_v11, 4  ;;  %v2404_v19 = vshll.u32 %v7278_v42, 16  ;;  %v2418_v15 = vshll.u32 %v7281_v46, 16  ;;  %v5225_v33 = vld [vmem:[%s6298_s9 + $0xc0] sm:$0xf]  ;;  %v2391_v26 = vor.u32 %v2390_v52, %v2387_v51  ;;  %v6095_v57 = vld [vmem:[%s6298_s9 + $0x54] sm:$0xff]  }
  0xb8   : > { %v2411_v39 = vrot.slane %v2409_v54, 4  ;;  %v2414_v34 = vrot.slane %v2412_v7, 5  ;;  %v2422_v59 = vshrl.u32 %v7281_v46, 16  ;;  %v7300_v22 = vld [vmem:[%s6298_s9 + $0xc4] sm:$0xf]  ;;  %v2354_v43 = vrot.slane %v2353_v24, 4 }
  0xb9   : > { %v2382_v32 = vrot.slane %v2380_v14, 5  ;;  %v2401_v11 = vor.u32 %v2400_v45, %v7285_v55  ;;  %v2420_v42 = vrot.slane %v2418_v15, 5  ;;  %v2428_v7 = vshll.u32 %v7291_v4, 16  ;;  %v7312_v45 = vld [vmem:[%s6298_s9 + $0xc8] sm:$0x1] }
  0xba   : > { %v2415_v51 = vor.u32 %v2414_v34, %v2411_v39  ;;  %v2424_v52 = vrot.slane %v2422_v59, 4  ;;  %v2433_v54 = vshrl.u32 %v5225_v33, 16  ;;  %v2368_v46 = vrot.slane %v2367_v18, 4 }
  0xbb   : > { %5844 = vmatmul.mubr.msk.bf16.gmra.mxu0 %vm702_vm3, %v7145_v37  ;;  %v2378_v38 = vrot.slane %v2377_v56, 4  ;;  %v2436_v2 = vshll.u32 %v5225_v33, 16  ;;  %v2442_v37 = vshll.u32 %v7300_v22, 16  ;;  %v2392_v24 = vrot.slane %v2391_v26, 4 }
  0xbc   : > { %5847 = vmatprep.mubr.msk.bf16.mxu0 %vm702_vm3, %v7147_v29  ;;  %v2406_v14 = vrot.slane %v2404_v19, 5  ;;  %v2425_v36 = vor.u32 %v2424_v52, %v2420_v42  ;;  %v2435_v15 = vrot.slane %v2433_v54, 4  ;;  %v2402_v34 = vrot.slane %v2401_v11, 4 }
  0xbd   : > { %v2438_v29 = vrot.slane %v2436_v2, 5  ;;  %v7315_v39 = vrot.slane %v2442_v37, 5  ;;  %v2446_v56 = vshrl.u32 %v7300_v22, 16  ;;  %v9065_v26 = vsel %vm6342_vm4, %v7201_v17, %v7187_v6 }
  0xbe   : > { %5810 = vmatmul.mubr.msk.bf16.gmra.mxu1 %vm702_vm3, %v6094_v16  ;;  %v9066_v16 = vsel %vm6342_vm4, %v7185_v23, %v7127_v58  ;;  %v2416_v19 = vrot.slane %v2415_v51, 4  ;;  %v2426_v33 = vrot.slane %v2425_v36, 4  ;;  %v2430_v2 = vrot.slane %v2428_v7, 5  ;;  %v6096_v23 = vld [vmem:[%s6298_s9 + $0x60] sm:$0xff]  }
  0xbf   : > { %5813 = vmatprep.mubr.msk.bf16.mxu1 %vm702_vm3, %v6095_v57  ;;  %v5237_v18 = vcombine.low %v9066_v16, %v9065_v26  ;;  %v9067_v59 = vsel %vm6342_vm4, %v7212_v53, %v7214_v13  ;;  %v9068_v6 = vsel %vm6342_vm4, %v7210_v25, %v7143_v60  ;;  %v2439_v57 = vor.u32 %v2438_v29, %v2435_v15  ;;  %v5263_v13 = vld [vmem:[%s6298_s9 + $0x24] sm:$0xe]  ;;  %v5266_v26 = vld [vmem:[%s6298_s9 + $0x48] sm:$0xe] }
  0xc0   : > { %v5238_v17 = vcombine.low %v9068_v6, %v9067_v59  ;;  %v2448_v11 = vrot.slane %v2446_v56, 4  ;;  %v2452_v58 = vshll.u32 %v7312_v45, 16  ;;  %v9069_v36 = vsel %vm6342_vm4, %v7216_v10, %v7166_v63  ;;  %v6097_v63 = vld [vmem:[%s6298_s9 + $0x6c] sm:$0xff]   ;;  %v5267_v6 = vld [vmem:[%s6298_s9 + $0x54] sm:$0xe] }
  0xc1   : > { %v5239_v51 = vcombine.low %v9069_v36, %v2335_v20  ;;  %v2349_v53 = vsel %vm6342_vm4, %v7288_v12, %v7230_v3  ;;  %v2359_v60 = vsel %vm6342_vm4, %v2354_v43, %v7275_v48  ;;  %v2373_v25 = vsel %vm6342_vm4, %v2368_v46, %v7265_v9  ;;  %v7368_v12 = vld [vmem:[%s6298_s9 + $0xc] sm:$0xe] }
  0xc2   : > { %v2383_v10 = vsel %vm6342_vm4, %v2378_v38, %v2382_v32  ;;  %v2397_v3 = vsel %vm6342_vm4, %v2392_v24, %v7285_v55  ;;  %v2407_v20 = vsel %vm6342_vm4, %v2402_v34, %v2406_v14  ;;  %v2449_v48 = vor.u32 %v2448_v11, %v7315_v39  ;;  %v5264_v55 = vld [vmem:[%s6298_s9 + $0x30] sm:$0xe]  ;;  %v5265_v14 = vld [vmem:[%s6298_s9 + $0x3c] sm:$0xe] }
  0xc3   : > { %5848 = vmatmul.mubr.msk.bf16.gmra.mxu0 %vm702_vm3, %v7199_v62  ;;  %v2421_v62 = vsel %vm6342_vm4, %v2416_v19, %v2420_v42  ;;  %v2431_v38 = vsel %vm6342_vm4, %v2426_v33, %v2430_v2  ;;  %v7375_v9 = vrot.slane %v2439_v57, 4  ;;  %v2816_v46 = vrot.slane %v6859_v49, 5  ;;  %v6098_v57 = vld [vmem:[%s6298_s9 + $0x78] sm:$0xff]  }
  0xc4   : > { %5851 = vmatprep.mubr.msk.bf16.mxu0 %vm702_vm3, %v5237_v18  ;;  %v7379_v43 = vcombine.low %v2349_v53, %v2359_v60  ;;  %v7381_v32 = vrot.slane %v2449_v48, 4  ;;  %v7383_v52 = vrot.slane %v2452_v58, 5  ;;  %v5279_v7 = vrot.slane %v5263_v13, 9  ;;  %v6099_v53 = vld [vmem:[%s6298_s9 + $0x84] sm:$0xff]   ;;  %v5268_v13 = vld [vmem:[%s6298_s9 + $0x60] sm:$0xe] }
  0xc5   : > { %v7386_v54 = vcombine.low %v2373_v25, %v2383_v10  ;;  %v7388_v42 = vcombine.low %v2397_v3, %v2407_v20  ;;  %v5277_v37 = vrot.slane %v7368_v12, 9  ;;  %v2830_v24 = vrot.slane %v6908_v44, 5  ;;  %v6105_v49 = vld [vmem:[%s6298_s9 + $0x18] sm:$0xff]  }
  0xc6   : > { %5814 = vmatmul.mubr.msk.bf16.gmra.mxu1 %vm702_vm3, %v6096_v23  ;;  %v7394_v15 = vcombine.low %v2421_v62, %v2431_v38  ;;  %v2819_v34 = vrot.slane %v6895_v47, 5  ;;  %v2833_v29 = vrot.slane %v6923_v21, 5  ;;  %v5280_v56 = vrot.slane %v5264_v55, 9  ;;  %v5270_v55 = vld [vmem:[%s6298_s9 + $0x78] sm:$0xe] }
  0xc7   : > { %5817 = vmatprep.mubr.msk.bf16.mxu1 %vm702_vm3, %v6097_v63  ;;  %v2445_v16 = vsel %vm6342_vm4, %v7375_v9, %v7315_v39  ;;  %v7405_v44 = vrot.slane %v2816_v46, 4  ;;  %v7409_v18 = vsel %vm6628_vm7, %v5279_v7, %v2830_v24  ;;  %v2832_v19 = vrot.slane %v2830_v24, 4 }
  0xc8   : > { %v2455_v21 = vsel %vm6342_vm4, %v7381_v32, %v7383_v52  ;;  %v2837_v33 = vrot.slane %v6946_v5, 5  ;;  %v2840_v2 = vrot.slane %v6954_v41, 5  ;;  %v5281_v59 = vrot.slane %v5265_v14, 9  ;;  %v6104_v52 = vld [vmem:[%s6298_s9 + $0xc0] sm:$0xff]  }
  0xc9   : > { %v7421_v11 = vsel %vm6628_vm7, %v2832_v19, %v2833_v29  ;;  %v2844_v58 = vrot.slane %v6963_v61, 5  ;;  %v2847_v23 = vrot.slane %v7015_v50, 5  ;;  %v5282_v36 = vrot.slane %v5266_v26, 9  ;;  %v5271_v19 = vld [vmem:[%s6298_s9 + $0x84] sm:$0xe] }
  0xca   : > { %v5296_v5 = vcombine.low %v7409_v18, %v7421_v11  ;;  %v7431_v41 = vsel %vm6628_vm7, %v5280_v56, %v2837_v33  ;;  %v2839_v60 = vrot.slane %v2837_v33, 4  ;;  %v2851_v25 = vrot.slane %v6981_v1, 5 }
  0xcb   : > { %5852 = vmatmul.mubr.msk.bf16.gmra.mxu0 %vm702_vm3, %v5238_v17  ;;  %v7438_v61 = vsel %vm6628_vm7, %v5281_v59, %v2844_v58  ;;  %v2846_v50 = vrot.slane %v2844_v58, 4  ;;  %v2854_v17 = vrot.slane %v7029_v8, 5  ;;  %v5283_v63 = vrot.slane %v5267_v6, 9  ;;  %v9070_v59 = vld [vmem:[#allocation7_spill] sm:$0xff] }
  0xcc   : > { %5855 = vmatprep.mubr.msk.bf16.mxu0 %vm702_vm3, %v5239_v51  ;;  %v7443_v10 = vsel %vm6628_vm7, %v2839_v60, %v2840_v2  ;;  %v7447_v3 = vsel %vm6628_vm7, %v5282_v36, %v2851_v25  ;;  %v2853_v1 = vrot.slane %v2851_v25, 4  ;;  %v2858_v20 = vrot.slane %v7024_v40, 5  ;;  %v5269_v51 = vld [vmem:[%s6298_s9 + $0x6c] sm:$0xe]  ;;  %v6100_v58 = vld [vmem:[%s6298_s9 + $0x90] sm:$0xff]  }
  0xcd   : > { %v5297_v48 = vcombine.low %v7431_v41, %v7443_v10  ;;  %v7456_v8 = vsel %vm6628_vm7, %v2846_v50, %v2847_v23  ;;  %v2861_v62 = vrot.slane %v7046_v35, 5  ;;  %v5284_v38 = vrot.slane %v5268_v13, 9  ;;  %v9071_v36 = vld [vmem:[#allocation6_spill] sm:$0xff]  ;;  %v5272_v60 = vld [vmem:[%s6298_s9 + $0x90] sm:$0xe]  ;;  %v9072_v50 = vld [vmem:[#allocation9_spill] sm:$0xff] }
  0xce   : > { %5818 = vmatmul.mubr.msk.bf16.gmra.mxu1 %vm702_vm3, %v6098_v57  ;;  %v5298_v40 = vcombine.low %v7438_v61, %v7456_v8  ;;  %v7465_v7 = vsel %vm6628_vm7, %v2853_v1, %v2854_v17  ;;  %v7469_v24 = vsel %vm6628_vm7, %v5283_v63, %v2858_v20  ;;  %v2860_v14 = vrot.slane %v2858_v20, 4 }
  0xcf   : > { %5821 = vmatprep.mubr.msk.bf16.mxu1 %vm702_vm3, %v6099_v53  ;;  %v5299_v35 = vcombine.low %v7447_v3, %v7465_v7  ;;  %v2865_v29 = vrot.slane %v7059_v28, 5  ;;  %v2868_v56 = vrot.slane %v7081_v30, 5  ;;  %v5285_v26 = vrot.slane %v5269_v51, 9  ;;  %v9073_v51 = vld [vmem:[#allocation8_spill] sm:$0xff]  ;;  %v5403_v3 = vld [vmem:[%s6298_s9 + $0x48] sm:$0xf] }
  0xd0   : > { %v7478_v33 = vsel %vm6628_vm7, %v2860_v14, %v2861_v62  ;;  %v2872_v2 = vrot.slane %v7078_v27, 5  ;;  %v2875_v6 = vrot.slane %v9070_v59, 5  ;;  %v5286_v57 = vrot.slane %v5270_v55, 9  ;;  %v6101_v27 = vld [vmem:[%s6298_s9 + $0x9c] sm:$0xff]   ;;  %v9081_v55 = vld [vmem:[#allocation18_spill] sm:$0xff] }
  0xd1   : > { %v5300_v23 = vcombine.low %v7469_v24, %v7478_v33  ;;  %v7487_v28 = vsel %vm6628_vm7, %v5284_v38, %v2865_v29  ;;  %v2867_v30 = vrot.slane %v2865_v29, 4  ;;  %v2879_v53 = vrot.slane %v9071_v36, 5  ;;  %v5273_v38 = vld [vmem:[%s6298_s9 + $0x9c] sm:$0xe]  ;;  %v9076_v36 = vld [vmem:[#allocation15_spill] sm:$0xff] }
  0xd2   : > { %v7496_v25 = vsel %vm6628_vm7, %v5285_v26, %v2872_v2  ;;  %v2874_v13 = vrot.slane %v2872_v2, 4  ;;  %v2882_v17 = vrot.slane %v9072_v50, 5  ;;  %v5287_v63 = vrot.slane %v5271_v19, 9  ;;  %v5274_v26 = vld [vmem:[%s6298_s9 + $0xa8] sm:$0xe] }
  0xd3   : > { %5856 = vmatmul.mubr.msk.bf16.gmra.mxu0 %vm702_vm3, %v7379_v43  ;;  %v7503_v1 = vsel %vm6628_vm7, %v2867_v30, %v2868_v56  ;;  %v7507_v43 = vsel %vm6628_vm7, %v5286_v57, %v2879_v53  ;;  %v2881_v20 = vrot.slane %v2879_v53, 4  ;;  %v2886_v62 = vrot.slane %v9073_v51, 5  ;;  %v5276_v57 = vld [vmem:[%s6298_s9 + $0xc0] sm:$0xe]  ;;  %v6102_v19 = vld [vmem:[%s6298_s9 + $0xa8] sm:$0xff]  }
  0xd4   : > { %5859 = vmatprep.mubr.msk.bf16.mxu0 %vm702_vm3, %v7386_v54  ;;  %v7515_v14 = vsel %vm6628_vm7, %v2874_v13, %v2875_v6  ;;  %v9074_v54 = vld [vmem:[#allocation11_spill] sm:$0xff]  ;;  %v5288_v56 = vrot.slane %v5272_v60, 9  ;;  %v2896_v53 = vrot.slane %v9076_v36, 5  ;;  %v5289_v60 = vrot.slane %v5273_v38, 9  ;;  %v9079_v38 = vld [vmem:[#allocation16_spill] sm:$0xff] }
  0xd5   : > { %v2889_v29 = vrot.slane %v9074_v54, 5  ;;  %v7524_v2 = vsel %vm6628_vm7, %v2881_v20, %v2882_v17  ;;  %v7528_v59 = vsel %vm6628_vm7, %v5287_v63, %v2886_v62  ;;  %v2888_v6 = vrot.slane %v2886_v62, 4  ;;  %v5275_v13 = vld [vmem:[%s6298_s9 + $0xb4] sm:$0xe]  ;;  %v9077_v17 = vld [vmem:[#allocation13_spill] sm:$0xff] }
  0xd6   : > { %5822 = vmatmul.mubr.msk.bf16.gmra.mxu1 %vm702_vm3, %v6100_v58  ;;  %v9075_v58 = vld [vmem:[#allocation10_spill] sm:$0xff]  ;;  %v2900_v63 = vrot.slane %v9077_v17, 5  ;;  %v9078_v20 = vld [vmem:[#allocation5_spill] sm:$0xff]  ;;  %v5290_v62 = vrot.slane %v5274_v26, 9  ;;  %v2907_v36 = vrot.slane %v9079_v38, 5  ;;  %v5291_v26 = vrot.slane %v5275_v13, 9 }
  0xd7   : > { %5825 = vmatprep.mubr.msk.bf16.mxu1 %vm702_vm3, %v6101_v27  ;;  %v2893_v30 = vrot.slane %v9075_v58, 5  ;;  %v7538_v50 = vsel %vm6628_vm7, %v2888_v6, %v2889_v29  ;;  %v2903_v51 = vrot.slane %v9078_v20, 5  ;;  %v9080_v17 = vld [vmem:[#allocation17_spill] sm:$0xff]  ;;  %v6103_v27 = vld [vmem:[%s6298_s9 + $0xb4] sm:$0xff]   ;;  %v2820_v39 = vsel %vm6628_vm7, %v7405_v44, %v2819_v34  ;;  %v7755_v7 = vld [vmem:[%s6298_s9 + $0x4c] sm:$0xf] }
  0xd8   : > { %v7553_v29 = vsel %vm6628_vm7, %v5289_v60, %v2900_v63  ;;  %v2902_v6 = vrot.slane %v2900_v63, 4  ;;  %v2910_v20 = vrot.slane %v9080_v17, 5  ;;  %v2909_v38 = vrot.slane %v2907_v36, 4  ;;  %v6122_v44 = vld [vmem:[%s6298_s9 + $0x20] sm:$0x1] }
  0xd9   : > { %v7546_v54 = vsel %vm6628_vm7, %v5288_v56, %v2893_v30  ;;  %v2895_v58 = vrot.slane %v2893_v30, 4  ;;  %v7565_v30 = vsel %vm6628_vm7, %v5290_v62, %v2907_v36  ;;  %v2914_v60 = vrot.slane %v9081_v55, 5 }
  0xda   : > { %v5292_v63 = vrot.slane %v5276_v57, 9  ;;  %v7581_v55 = vsel %vm6628_vm7, %v2909_v38, %v2910_v20  ;;  %v2921_v57 = vrot.slane %v7300_v22, 5  ;;  %v2817_v22 = vsel %vm6628_vm7, %v5277_v37, %v2816_v46  ;;  %v6107_v38 = vld [vmem:[%s6298_s9 + $0x30] sm:$0xff]  }
  0xdb   : > { %5860 = vmatmul.mubr.msk.bf16.gmra.mxu0 %vm702_vm3, %v7388_v42  ;;  %v7561_v56 = vsel %vm6628_vm7, %v2895_v58, %v2896_v53  ;;  %v7574_v42 = vsel %vm6628_vm7, %v2902_v6, %v2903_v51  ;;  %v2917_v53 = vrot.slane %v7291_v4, 5  ;;  %v2916_v58 = vrot.slane %v2914_v60, 4 }
  0xdc   : > { %5863 = vmatprep.mubr.msk.bf16.mxu0 %vm702_vm3, %v7394_v15  ;;  %v7585_v15 = vsel %vm6628_vm7, %v5291_v26, %v2914_v60  ;;  %v2924_v51 = vrot.slane %v7312_v45, 5  ;;  %v5262_v45 = vld [vmem:[%s6298_s9 + $0x18] sm:$0xe]  ;;  %v7625_v9 = vsel %vm6628_vm7, %v5292_v63, %v2921_v57  ;;  %v2923_v46 = vrot.slane %v2921_v57, 4  ;;  %v6106_v26 = vld [vmem:[%s6298_s9 + $0x24] sm:$0xff]  }
  0xdd   : > { %v7613_v32 = vsel %vm6628_vm7, %v2916_v58, %v2917_v53  ;;  %v5278_v37 = vrot.slane %v5262_v45, 9  ;;  %v5294_v34 = vcombine.low %v2817_v22, %v2820_v39  ;;  %v9082_v60 = vld [vmem:[#allocation12_spill] sm:$0xff] }
  0xde   : > { %5826 = vmatmul.mubr.msk.bf16.gmra.mxu1 %vm702_vm3, %v6102_v19  ;;  %v5244_v19 = vcombine.low %v2445_v16, %v2455_v21  ;;  %v7630_v47 = vsel %vm6628_vm7, %v2923_v46, %v2924_v51  ;;  %v2826_v21 = vrot.slane %v6122_v44, 5  ;;  %v4580_v53 = vsel %vm751_vm0, %v9082_v60, 0  ;;  %v5391_v63 = vld [vmem:[%s6298_s9 + $0x18] sm:$0xf]  ;;  %v5392_v57 = vld [vmem:[%s6298_s9 + $0x1c] sm:$0xf] }
  0xdf   : > { %5829 = vmatprep.mubr.msk.bf16.mxu1 %vm702_vm3, %v6103_v27  ;;  %v6121_v27 = vld [vmem:[%s6298_s9 + $0x1c] sm:$0xf]  ;;  %v5394_v51 = vld [vmem:[%s6298_s9 + $0x24] sm:$0xf]  ;;  %v3628_v45 = vshrl.u32 %v5391_v63, 16  ;;  %v3637_v39 = vshll.u32 %v5392_v57, 16 }
  0xe0   : > { %v2823_v36 = vrot.slane %v6121_v27, 5  ;;  %v3631_v27 = vshll.u32 %v5391_v63, 16  ;;  %v3652_v46 = vshrl.u32 %v5394_v51, 16  ;;  %v6109_v44 = vld [vmem:[%s6298_s9 + $0x48] sm:$0xff]   ;;  %v5472_v60 = vld [vmem:[%s6298_s9 + $0x18] sm:$0xe] }
  0xe1   : > { %v7671_v63 = vld [vmem:[%s6298_s9 + $0x2c] sm:$0x1] }
  0xe2   : > { %v2825_v16 = vrot.slane %v2823_v36, 4  ;;  %v2824_v17 = vsel %vm6628_vm7, %v5278_v37, %v2823_v36  ;;  %v7655_v36 = vld [vmem:[%s6298_s9 + $0x28] sm:$0xf]  ;;  %v6108_v37 = vld [vmem:[%s6298_s9 + $0x3c] sm:$0xff]   ;;  %v3654_v18 = vrot.slane %v3652_v46, 4 }
  0xe3   : > { %5864 = vmatmul.mubr.msk.bf16.gmra.mxu0 %vm702_vm3, %v5244_v19  ;;  %v9083_v19 = vld [vmem:[#allocation14_spill] sm:$0xff] }
  0xe4   : > { %5903 = vmatprep.mubr.msk.bf16.mxu0 %vm702_vm3, %v6105_v49  ;;  %v2827_v20 = vsel %vm6628_vm7, %v2825_v16, %v2826_v21  ;;  %v4110_v22 = vsel %vm751_vm0, %v9083_v19, 0  ;;  %v3641_v49 = vshrl.u32 %v5392_v57, 16  ;;  %v3665_v16 = vshrl.u32 %v7655_v36, 16  ;;  %v5393_v21 = vld [vmem:[%s6298_s9 + $0x20] sm:$0x1] }
  0xe5   : > { %v5295_v58 = vcombine.low %v2824_v17, %v2827_v20  ;;  %v3630_v17 = vrot.slane %v3628_v45, 4  ;;  %v3633_v20 = vrot.slane %v3631_v27, 5  ;;  %v5397_v19 = vld [vmem:[%s6298_s9 + $0x30] sm:$0xf]  ;;  %v3647_v45 = vshll.u32 %v5393_v21, 16 }
  0xe6   : > { %5830 = vmatmul.mubr.msk.bf16.gmra.mxu1 %vm702_vm3, %v6104_v52  ;;  %v3655_v52 = vshll.u32 %v5394_v51, 16  ;;  %v3667_v51 = vrot.slane %v3665_v16, 4  ;;  %v5488_v27 = vrot.slane %v5472_v60, 9  ;;  %v4374_v46 = vrot.slane %v5393_v21, 5  ;;  %v5473_v16 = vld [vmem:[%s6298_s9 + $0x24] sm:$0xe] }
  0xe7   : > { %5869 = vmatprep.mubr.msk.bf16.mxu1 %vm702_vm3, %v5294_v34  ;;  %v3661_v34 = vshll.u32 %v7655_v36, 16  ;;  %v6110_v21 = vld [vmem:[%s6298_s9 + $0x54] sm:$0xff]   ;;  %v3679_v10 = vshll.u32 %v5397_v19, 16  ;;  %v6111_v60 = vld [vmem:[%s6298_s9 + $0x60] sm:$0xff]  }
  0xe8   : > { %v3657_v11 = vrot.slane %v3655_v52, 5  ;;  %v3671_v52 = vshll.u32 %v7671_v63, 16 }
  0xeb   : > { %5904 = vmatmul.mubr.msk.bf16.vlgmr.msra.gmra.mxu0 %vm702_vm3, %v6106_v26  ;;  %v7667_v26 = vrot.slane %v3637_v39, 5 }
  0xec   : > { %5970 = vmatpush3.bf16.msra.mxu0 %v4580_v53  ;;  %5907 = vmatprep.mubr.msk.bf16.mxu0 %vm702_vm3, %v6107_v38  ;;  %v3643_v38 = vrot.slane %v3641_v49, 4  ;;  %v4371_v53 = vrot.slane %v5392_v57, 5  ;;  %v7681_v57 = vld [vmem:[%s6298_s9 + $0x34] sm:$0xf] }
  0xee   : > { %5870 = vmatmul.mubr.msk.bf16.vlgmr.msra.gmra.mxu1 %vm702_vm3, %v5295_v58  ;;  %v7676_v58 = vrot.slane %v3661_v34, 5  ;;  %v3644_v39 = vor.u32 %v3643_v38, %v7667_v26  ;;  %v4373_v49 = vrot.slane %v4371_v53, 4  ;;  %v3658_v34 = vor.u32 %v3657_v11, %v3654_v18 }
  0xef   : > { %5936 = vmatpush3.bf16.msra.mxu1 %v4110_v22  ;;  %5873 = vmatprep.mubr.msk.bf16.mxu1 %vm702_vm3, %v5296_v5  ;;  %v7674_v5 = vpop.f32.mrf.mxu0  ;;  %v3634_v22 = vor.u32 %v3633_v20, %v3630_v17  ;;  %v3676_v17 = vshrl.u32 %v5397_v19, 16  ;;  %v3689_v38 = vshrl.u32 %v7681_v57, 16  ;;  %v7706_v61 = vsel %vm6628_vm7, %v5488_v27, %v4371_v53  ;;  %v5400_v19 = vld [vmem:[%s6298_s9 + $0x3c] sm:$0xf] }
  0xf0   : > { %v3668_v41 = vor.u32 %v3667_v51, %v7676_v58  ;;  %v3645_v8 = vrot.slane %v3644_v39, 4  ;;  %v3673_v11 = vrot.slane %v3671_v52, 5  ;;  %v5489_v51 = vrot.slane %v5473_v16, 9  ;;  %v7720_v39 = vld [vmem:[%s6298_s9 + $0x38] sm:$0x1] }
  0xf1   : > { %v7698_v20 = vpop.f32.mrf.mxu0  ;;  %v3635_v18 = vrot.slane %v3634_v22, 4  ;;  %v3659_v12 = vrot.slane %v3658_v34, 4  ;;  %v4381_v22 = vrot.slane %v7671_v63, 5  ;;  %v3691_v52 = vrot.slane %v3689_v38, 4 }
  0xf2   : > { %v3669_v27 = vrot.slane %v3668_v41, 4  ;;  %v3700_v34 = vshrl.u32 %v5400_v19, 16  ;;  %v3703_v16 = vshll.u32 %v5400_v19, 16  ;;  %v7733_v41 = vld [vmem:[%s6298_s9 + $0x40] sm:$0xf] }
  0xf3   : > { %5908 = vmatmul.mubr.msk.bf16.gmra.mxu0 %vm702_vm3, %v6108_v37  ;;  %v7717_v53 = vpop.f32.mrf.mxu0  ;;  %v3640_v63 = vsel %vm6342_vm4, %v3635_v18, %v7667_v26  ;;  %v3664_v26 = vsel %vm6342_vm4, %v3659_v12, %v7676_v58  ;;  %v5474_v18 = vld [vmem:[%s6298_s9 + $0x30] sm:$0xe]  ;;  %v3709_v24 = vshll.u32 %v7733_v41, 16  ;;  %v3713_v33 = vshrl.u32 %v7733_v41, 16 }
  0xf4   : > { %5911 = vmatprep.mubr.msk.bf16.mxu0 %vm702_vm3, %v6109_v44  ;;  %v7689_v37 = vpop.f32.mrf.mxu1  ;;  %v4378_v44 = vrot.slane %v7655_v36, 5  ;;  %v3649_v36 = vrot.slane %v3647_v45, 5  ;;  %v3678_v45 = vrot.slane %v3676_v17, 4  ;;  %v3674_v58 = vsel %vm6342_vm4, %v3669_v27, %v3673_v11 }
  0xf5   : > { %9084 = vst [vmem:[#allocation7_spill] sm:$0xff] %v7689_v37  ;;  %v7762_v12 = vpop.f32.mrf.mxu0  ;;  %v3705_v19 = vrot.slane %v3703_v16, 5  ;;  %v3737_v11 = vshrl.u32 %v7755_v7, 16 }
  0xf6   : > { %5874 = vmatmul.mubr.msk.bf16.gmra.mxu1 %vm702_vm3, %v5297_v48  ;;  %v3685_v48 = vshll.u32 %v7681_v57, 16  ;;  %v7713_v6 = vpop.f32.mrf.mxu1  ;;  %v4380_v4 = vrot.slane %v4378_v44, 4  ;;  %v3650_v17 = vsel %vm6342_vm4, %v3645_v8, %v3649_v36  ;;  %v4385_v36 = vrot.slane %v7681_v57, 5  ;;  %v6113_v8 = vld [vmem:[%s6298_s9 + $0x78] sm:$0xff]  }
  0xf7   : > { %5877 = vmatprep.mubr.msk.bf16.mxu1 %vm702_vm3, %v5298_v40  ;;  %v7710_v40 = vsel %vm6628_vm7, %v4373_v49, %v4374_v46  ;;  %9085 = vst [vmem:[#allocation6_spill] sm:$0xff] %v7713_v6  ;;  %v3681_v49 = vrot.slane %v3679_v10, 5  ;;  %v7776_v27 = vcombine.low %v3640_v63, %v3650_v17  ;;  %v7778_v57 = vcombine.low %v3664_v26, %v3674_v58  ;;  %v7792_v17 = vld [vmem:[%s6298_s9 + $0x58] sm:$0xf]  ;;  %v7798_v58 = vld [vmem:[%s6298_s9 + $0x44] sm:$0x1] }
  0xf8   : > { %v7722_v46 = vrot.slane %v3685_v48, 5  ;;  %v7739_v10 = vpop.f32.mrf.mxu1  ;;  %v7746_v48 = vsel %vm6628_vm7, %v5489_v51, %v4378_v44  ;;  %v7750_v38 = vsel %vm6628_vm7, %v4380_v4, %v4381_v22  ;;  %v3702_v51 = vrot.slane %v3700_v34, 4  ;;  %v5406_v34 = vld [vmem:[%s6298_s9 + $0x54] sm:$0xf] }
  0xf9   : > { %9086 = vst [vmem:[#allocation9_spill] sm:$0xff] %v7739_v10  ;;  %v3682_v44 = vor.u32 %v3681_v49, %v3678_v45  ;;  %v3727_v22 = vshll.u32 %v5403_v3, 16  ;;  %v4387_v13 = vrot.slane %v4385_v36, 4  ;;  %v4388_v63 = vrot.slane %v7720_v39, 5  ;;  %v5475_v49 = vld [vmem:[%s6298_s9 + $0x3c] sm:$0xe] }
  0xfa   : > { %v3692_v4 = vor.u32 %v3691_v52, %v7722_v46  ;;  %v7774_v45 = vpop.f32.mrf.mxu1  ;;  %v5490_v52 = vrot.slane %v5474_v18, 9  ;;  %v3706_v18 = vor.u32 %v3705_v19, %v3702_v51  ;;  %v9089_v6 = vcombine.low %v7487_v28, %v7503_v1 }
  0xfb   : > { %5912 = vmatmul.mubr.msk.bf16.gmra.mxu0 %vm702_vm3, %v6110_v21  ;;  %v3733_v21 = vshll.u32 %v7755_v7, 16  ;;  %9087 = vst [vmem:[#allocation8_spill] sm:$0xff] %v7774_v45  ;;  %v3729_v45 = vrot.slane %v3727_v22, 5  ;;  %v3748_v51 = vshrl.u32 %v5406_v34, 16  ;;  %v3751_v19 = vshll.u32 %v5406_v34, 16 }
  0xfc   : > { %5915 = vmatprep.mubr.msk.bf16.mxu0 %vm702_vm3, %v6111_v60  ;;  %v3695_v60 = vshll.u32 %v7720_v39, 16  ;;  %v7795_v26 = vrot.slane %v3692_v4, 4  ;;  %v3739_v39 = vrot.slane %v3737_v11, 4  ;;  %v7833_v22 = vsel %vm6628_vm7, %v4387_v13, %v4388_v63 }
  0xfd   : > { %v7803_v10 = vrot.slane %v3733_v21, 5  ;;  %v9091_v21 = vcombine.low %v7496_v25, %v7515_v14  ;;  %v4392_v25 = vrot.slane %v7733_v41, 5  ;;  %v6115_v14 = vld [vmem:[%s6298_s9 + $0x90] sm:$0xff]   ;;  %v5491_v1 = vrot.slane %v5475_v49, 9  ;;  %v5409_v41 = vld [vmem:[%s6298_s9 + $0x60] sm:$0xf] }
  0xfe   : > { %5878 = vmatmul.mubr.msk.bf16.gmra.mxu1 %vm702_vm3, %v5299_v35  ;;  %v6112_v35 = vld [vmem:[%s6298_s9 + $0x6c] sm:$0xff]   ;;  %v7788_v62 = vrot.slane %v3695_v60, 5  ;;  %v3750_v37 = vrot.slane %v3748_v51, 4 }
  0xff   : > { %5881 = vmatprep.mubr.msk.bf16.mxu1 %vm702_vm3, %v5300_v23  ;;  %v3724_v23 = vshrl.u32 %v5403_v3, 16  ;;  %v7786_v3 = vrot.slane %v3682_v44, 4  ;;  %v3715_v44 = vrot.slane %v3713_v33, 4  ;;  %v3761_v33 = vshrl.u32 %v7792_v17, 16 }
 0x100   : > { %v7784_v16 = vpop.f32.mrf.mxu0  ;;  %v3740_v13 = vor.u32 %v3739_v39, %v7803_v10  ;;  %v4399_v39 = vrot.slane %v7755_v7, 5  ;;  %v9095_v7 = vcombine.low %v7507_v43, %v7524_v2  ;;  %v9097_v43 = vcombine.low %v7528_v59, %v7538_v50  ;;  %v6116_v2 = vld [vmem:[%s6298_s9 + $0x9c] sm:$0xff]  }
 0x101   : > { %9088 = vst [vmem:[#allocation11_spill] sm:$0xff] %v7784_v16  ;;  %v3726_v60 = vrot.slane %v3724_v23, 4  ;;  %v6114_v23 = vld [vmem:[%s6298_s9 + $0x84] sm:$0xff]   ;;  %v7860_v16 = vld [vmem:[%s6298_s9 + $0x5c] sm:$0x1]  ;;  %v4406_v59 = vrot.slane %v7792_v17, 5 }
 0x102   : > { %v7821_v28 = vpop.f32.mrf.mxu0 }
 0x103   : > { %5916 = vmatmul.mubr.msk.bf16.gmra.mxu0 %vm702_vm3, %v6112_v35  ;;  %v7800_v35 = vrot.slane %v3709_v24, 5  ;;  %v3757_v24 = vshll.u32 %v7792_v17, 16  ;;  %9092 = vst [vmem:[#allocation15_spill] sm:$0xff] %v7821_v28  ;;  %v3753_v28 = vrot.slane %v3751_v19, 5 }
 0x104   : > { %5919 = vmatprep.mubr.msk.bf16.mxu0 %vm702_vm3, %v6113_v8  ;;  %v7809_v4 = vpop.f32.mrf.mxu1  ;;  %v7812_v8 = vld [vmem:[%s6298_s9 + $0x50] sm:$0x1]  ;;  %v7853_v49 = vpop.f32.mrf.mxu0 }
 0x105   : > { %9090 = vst [vmem:[#allocation10_spill] sm:$0xff] %v7809_v4  ;;  %v3716_v34 = vor.u32 %v3715_v44, %v7800_v35  ;;  %v7843_v4 = vrot.slane %v3706_v18, 4  ;;  %v7850_v11 = vrot.slane %v3757_v24, 5  ;;  %v3763_v44 = vrot.slane %v3761_v33, 4  ;;  %9094 = vst [vmem:[#allocation5_spill] sm:$0xff] %v7853_v49 }
 0x106   : > { %5882 = vmatmul.mubr.msk.bf16.gmra.mxu1 %vm702_vm3, %v9089_v6  ;;  %v7829_v6 = vsel %vm6628_vm7, %v5490_v52, %v4385_v36  ;;  %v3730_v36 = vor.u32 %v3729_v45, %v3726_v60  ;;  %v3743_v52 = vshll.u32 %v7812_v8, 16  ;;  %v7848_v63 = vpop.f32.mrf.mxu1  ;;  %v4394_v18 = vrot.slane %v4392_v25, 4  ;;  %v5476_v24 = vld [vmem:[%s6298_s9 + $0x48] sm:$0xe] }
 0x107   : > { %5885 = vmatprep.mubr.msk.bf16.mxu1 %vm702_vm3, %v9091_v21  ;;  %v3719_v21 = vshll.u32 %v7798_v58, 16  ;;  %9093 = vst [vmem:[#allocation13_spill] sm:$0xff] %v7848_v63  ;;  %v4395_v60 = vrot.slane %v7798_v58, 5  ;;  %v3717_v51 = vrot.slane %v3716_v34, 4  ;;  %v3772_v33 = vshrl.u32 %v5409_v41, 16 }
 0x108   : > { %v7866_v63 = vsel %vm6628_vm7, %v5491_v1, %v4392_v25  ;;  %v3731_v45 = vrot.slane %v3730_v36, 4  ;;  %v3741_v49 = vrot.slane %v3740_v13, 4  ;;  %v3745_v58 = vrot.slane %v3743_v52, 5  ;;  %v7881_v36 = vld [vmem:[%s6298_s9 + $0x64] sm:$0xf]  ;;  %v7888_v13 = vpop.f32.mrf.mxu0 }
 0x109   : > { %v3721_v19 = vrot.slane %v3719_v21, 5  ;;  %v3712_v34 = vsel %vm6342_vm4, %v7843_v4, %v7800_v35  ;;  %v3754_v21 = vor.u32 %v3753_v28, %v3750_v37  ;;  %v3764_v1 = vor.u32 %v3763_v44, %v7850_v11  ;;  %9098 = vst [vmem:[#allocation17_spill] sm:$0xff] %v7888_v13  ;;  %v5477_v28 = vld [vmem:[%s6298_s9 + $0x54] sm:$0xe]  ;;  %v6120_v13 = vld [vmem:[%s6298_s9 + $0xcc] sm:$0xff]  }
 0x10a   : > { %v3767_v25 = vshll.u32 %v7860_v16, 16  ;;  %v7892_v52 = vsel %vm6628_vm7, %v4394_v18, %v4395_v60  ;;  %v5492_v35 = vrot.slane %v5476_v24, 9  ;;  %v4401_v37 = vrot.slane %v4399_v39, 4 }
 0x10b   : > { %5920 = vmatmul.mubr.msk.bf16.gmra.mxu0 %vm702_vm3, %v6114_v23  ;;  %v3775_v23 = vshll.u32 %v5409_v41, 16  ;;  %v4402_v4 = vrot.slane %v7812_v8, 5  ;;  %v6117_v41 = vld [vmem:[%s6298_s9 + $0xa8] sm:$0xff]   ;;  %v3722_v44 = vsel %vm6342_vm4, %v3717_v51, %v3721_v19  ;;  %v3774_v50 = vrot.slane %v3772_v33, 4 }
 0x10c   : > { %5923 = vmatprep.mubr.msk.bf16.mxu0 %vm702_vm3, %v6115_v14  ;;  %v7872_v14 = vpop.f32.mrf.mxu1  ;;  %v3746_v18 = vsel %vm6342_vm4, %v3741_v49, %v3745_v58  ;;  %v3781_v60 = vshll.u32 %v7881_v36, 16  ;;  %v3785_v8 = vshrl.u32 %v7881_v36, 16  ;;  %v3765_v51 = vrot.slane %v3764_v1, 4  ;;  %v7910_v33 = vld [vmem:[%s6298_s9 + $0x68] sm:$0x1] }
 0x10d   : > { %9096 = vst [vmem:[#allocation16_spill] sm:$0xff] %v7872_v14  ;;  %v3755_v14 = vrot.slane %v3754_v21, 4  ;;  %v3769_v17 = vrot.slane %v3767_v25, 5  ;;  %v5493_v19 = vrot.slane %v5477_v28, 9  ;;  %v9101_v49 = vsel %vm6342_vm4, %v7795_v26, %v7788_v62  ;;  %v5412_v25 = vld [vmem:[%s6298_s9 + $0x6c] sm:$0xf] }
 0x10e   : > { %5886 = vmatmul.mubr.msk.bf16.gmra.mxu1 %vm702_vm3, %v9095_v7  ;;  %v3777_v7 = vrot.slane %v3775_v23, 5  ;;  %v7907_v24 = vpop.f32.mrf.mxu1  ;;  %v7931_v21 = vsel %vm6628_vm7, %v5492_v35, %v4399_v39  ;;  %v7935_v1 = vsel %vm6628_vm7, %v4401_v37, %v4402_v4  ;;  %v7938_v62 = vcombine.low %v3712_v34, %v3722_v44  ;;  %v5478_v4 = vld [vmem:[%s6298_s9 + $0x60] sm:$0xe]  ;;  %v5418_v44 = vld [vmem:[%s6298_s9 + $0x84] sm:$0xf] }
 0x10f   : > { %5889 = vmatprep.mubr.msk.bf16.mxu1 %vm702_vm3, %v9097_v43  ;;  %v3736_v43 = vsel %vm6342_vm4, %v3731_v45, %v7803_v10  ;;  %9099 = vst [vmem:[#allocation18_spill] sm:$0xff] %v7907_v24  ;;  %v9102_v45 = vsel %vm6342_vm4, %v7786_v3, %v7722_v46  ;;  %v4408_v46 = vrot.slane %v4406_v59, 4  ;;  %v4409_v3 = vrot.slane %v7860_v16, 5 }
 0x110   : > { %v7925_v23 = vcombine.low %v9102_v45, %v9101_v49  ;;  %9103 = vst [vmem:[#allocation14_spill] sm:$0xff] %v7938_v62  ;;  %v3778_v26 = vor.u32 %v3777_v7, %v3774_v50  ;;  %v7945_v28 = vcombine.low %v3736_v43, %v3746_v18  ;;  %v7947_v39 = vrot.slane %v3781_v60, 5 }
 0x111   : > { %v7913_v10 = vpop.f32.mrf.mxu0  ;;  %v7949_v35 = vrot.slane %v3785_v8, 4  ;;  %v3791_v37 = vshll.u32 %v7910_v33, 16  ;;  %v9105_v34 = vcombine.low %v7546_v54, %v7561_v56  ;;  %v3760_v50 = vsel %vm6342_vm4, %v3755_v14, %v7850_v11  ;;  %v5415_v54 = vld [vmem:[%s6298_s9 + $0x78] sm:$0xf] }
 0x112   : > { %9100 = vst [vmem:[#allocation12_spill] sm:$0xff] %v7913_v10  ;;  %9104 = vst [vmem:[#allocation19_spill] sm:$0xff] %v7945_v28  ;;  %v3770_v7 = vsel %vm6342_vm4, %v3765_v51, %v3769_v17  ;;  %v7969_v43 = vsel %vm6628_vm7, %v5493_v19, %v4406_v59  ;;  %v9107_v56 = vcombine.low %v7553_v29, %v7574_v42  ;;  %v3796_v60 = vshrl.u32 %v5412_v25, 16  ;;  %v7981_v51 = vld [vmem:[%s6298_s9 + $0x7c] sm:$0xf]  ;;  %v6119_v59 = vld [vmem:[%s6298_s9 + $0xc0] sm:$0xff]  }
 0x113   : > { %5924 = vmatmul.mubr.msk.bf16.gmra.mxu0 %vm702_vm3, %v6116_v2  ;;  %v7943_v2 = vld [vmem:[%s6298_s9 + $0x70] sm:$0xf]  ;;  %v7976_v18 = vpop.f32.mrf.mxu0  ;;  %v3799_v8 = vshll.u32 %v5412_v25, 16  ;;  %v7986_v17 = vsel %vm6628_vm7, %v4408_v46, %v4409_v3  ;;  %v7988_v29 = vrot.slane %v3778_v26, 4  ;;  %v5494_v42 = vrot.slane %v5478_v4, 9 }
 0x114   : > { %5927 = vmatprep.mubr.msk.bf16.mxu0 %vm702_vm3, %v6117_v41  ;;  %v6118_v41 = vld [vmem:[%s6298_s9 + $0xb4] sm:$0xff]   ;;  %9108 = vst [vmem:[#allocation21_spill] sm:$0xff] %v7976_v18  ;;  %v3805_v11 = vshll.u32 %v7943_v2, 16  ;;  %v3809_v14 = vshrl.u32 %v7943_v2, 16  ;;  %v4413_v19 = vrot.slane %v7881_v36, 5  ;;  %v7991_v49 = vcombine.low %v3760_v50, %v3770_v7 }
 0x115   : > { %v3788_v45 = vor.u32 %v7949_v35, %v7947_v39  ;;  %v7995_v25 = vrot.slane %v3791_v37, 5  ;;  %v3820_v46 = vshrl.u32 %v5415_v54, 16  ;;  %v3823_v3 = vshll.u32 %v5415_v54, 16  ;;  %v8007_v4 = vld [vmem:[%s6298_s9 + $0x88] sm:$0xf]  ;;  %v8010_v35 = vpop.f32.mrf.mxu0 }
 0x116   : > { %5890 = vmatmul.mubr.msk.bf16.gmra.mxu1 %vm702_vm3, %v9105_v34  ;;  %v7957_v16 = vpop.f32.mrf.mxu1  ;;  %9109 = vst [vmem:[#allocation22_spill] sm:$0xff] %v7991_v49  ;;  %v4416_v34 = vrot.slane %v7910_v33, 5  ;;  %v3829_v36 = vshll.u32 %v7981_v51, 16  ;;  %v3833_v26 = vshrl.u32 %v7981_v51, 16  ;;  %9111 = vst [vmem:[#allocation24_spill] sm:$0xff] %v8010_v35  ;;  %v3798_v33 = vrot.slane %v3796_v60, 4 }
 0x117   : > { %9106 = vst [vmem:[#allocation20_spill] sm:$0xff] %v7957_v16  ;;  %5893 = vmatprep.mubr.msk.bf16.mxu1 %vm702_vm3, %v9107_v56  ;;  %v7999_v56 = vld [vmem:[%s6298_s9 + $0x74] sm:$0x1]  ;;  %v3801_v37 = vrot.slane %v3799_v8, 5  ;;  %v8012_v50 = vrot.slane %v3805_v11, 5  ;;  %v3811_v7 = vrot.slane %v3809_v14, 4  ;;  %v9112_v54 = vcombine.low %v7565_v30, %v7581_v55  ;;  %v8040_v49 = vpop.f32.mrf.mxu0 }
 0x118   : > { %v8002_v58 = vpop.f32.mrf.mxu1  ;;  %v4415_v16 = vrot.slane %v4413_v19, 4  ;;  %v8025_v60 = vld [vmem:[%s6298_s9 + $0x80] sm:$0x1]  ;;  %v8028_v8 = vld [vmem:[%s6298_s9 + $0x6c] sm:$0xe]  ;;  %v3844_v11 = vshrl.u32 %v5418_v44, 16 }
 0x119   : > { %9110 = vst [vmem:[#allocation23_spill] sm:$0xff] %v8002_v58  ;;  %v8021_v58 = vsel %vm6628_vm7, %v5494_v42, %v4413_v19  ;;  %v3847_v14 = vshll.u32 %v5418_v44, 16  ;;  %v3857_v24 = vshrl.u32 %v8007_v4, 16  ;;  %v3822_v19 = vrot.slane %v3820_v46, 4  ;;  %9114 = vst [vmem:[#allocation26_spill] sm:$0xff] %v8040_v49 }
 0x11a   : > { %v8036_v42 = vpop.f32.mrf.mxu1  ;;  %v3825_v35 = vrot.slane %v3823_v3, 5  ;;  %v8038_v18 = vrot.slane %v3829_v36, 5  ;;  %v3835_v10 = vrot.slane %v3833_v26, 4  ;;  %v9115_v44 = vcombine.low %v7585_v15, %v7613_v32  ;;  %v8059_v32 = vld [vmem:[%s6298_s9 + $0x8c] sm:$0x1] }
 0x11b   : > { %5928 = vmatmul.mubr.msk.bf16.gmra.mxu0 %vm702_vm3, %v6118_v41  ;;  %v3815_v41 = vshll.u32 %v7999_v56, 16  ;;  %9113 = vst [vmem:[#allocation25_spill] sm:$0xff] %v8036_v42  ;;  %v3802_v30 = vor.u32 %v3801_v37, %v3798_v33  ;;  %v3812_v55 = vor.u32 %v3811_v7, %v8012_v50  ;;  %v3839_v46 = vshll.u32 %v8025_v60, 16  ;;  %v5480_v33 = vld [vmem:[%s6298_s9 + $0x78] sm:$0xe] }
 0x11c   : > { %5931 = vmatprep.mubr.msk.bf16.mxu0 %vm702_vm3, %v6119_v59  ;;  %v3853_v59 = vshll.u32 %v8007_v4, 16  ;;  %v8050_v3 = vrot.slane %v3788_v45, 4  ;;  %v8054_v36 = vsel %vm6628_vm7, %v4415_v16, %v4416_v34  ;;  %v5495_v26 = vrot.slane %v8028_v8, 9  ;;  %v8064_v42 = vpop.f32.mrf.mxu1  ;;  %v5421_v8 = vld [vmem:[%s6298_s9 + $0x90] sm:$0xf] }
 0x11d   : > { %v4427_v15 = vrot.slane %v7981_v51, 5  ;;  %v3846_v37 = vrot.slane %v3844_v11, 4  ;;  %v3849_v7 = vrot.slane %v3847_v14, 5  ;;  %9116 = vst [vmem:[#allocation27_spill] sm:$0xff] %v8064_v42  ;;  %v3817_v45 = vrot.slane %v3815_v41, 5 }
 0x11e   : > { %5894 = vmatmul.mubr.msk.bf16.gmra.mxu1 %vm702_vm3, %v9112_v54  ;;  %v4420_v54 = vrot.slane %v7943_v2, 5  ;;  %v8062_v2 = vrot.slane %v3853_v59, 5  ;;  %v4423_v49 = vrot.slane %v7999_v56, 5  ;;  %v3826_v16 = vor.u32 %v3825_v35, %v3822_v19  ;;  %v8073_v59 = vld [vmem:[%s6298_s9 + $0x94] sm:$0xf] }
 0x11f   : > { %5897 = vmatprep.mubr.msk.bf16.mxu1 %vm702_vm3, %v9115_v44  ;;  %v3859_v44 = vrot.slane %v3857_v24, 4  ;;  %v3836_v34 = vor.u32 %v3835_v10, %v8038_v18  ;;  %v3803_v51 = vrot.slane %v3802_v30, 4  ;;  %v3813_v11 = vrot.slane %v3812_v55, 4 }
 0x120   : > { %v4422_v62 = vrot.slane %v4420_v54, 4  ;;  %v3841_v14 = vrot.slane %v3839_v46, 5  ;;  %v9117_v24 = vcombine.low %v7706_v61, %v7710_v40  ;;  %v5496_v56 = vrot.slane %v5480_v33, 9 }
 0x121   : > { %v4429_v35 = vrot.slane %v4427_v15, 4  ;;  %v4430_v10 = vrot.slane %v8025_v60, 5  ;;  %v3863_v41 = vshll.u32 %v8059_v32, 16  ;;  %v3860_v30 = vor.u32 %v3859_v44, %v8062_v2 }
 0x122   : > { %v3868_v55 = vshrl.u32 %v5421_v8, 16  ;;  %v3871_v46 = vshll.u32 %v5421_v8, 16  ;;  %v9119_v61 = vcombine.low %v7625_v9, %v7630_v47  ;;  %v3827_v40 = vrot.slane %v3826_v16, 4 }
 0x123   : > { %v8069_v28 = vpop.f32.mrf.mxu0  ;;  %5932 = vmatmul.mubr.msk.bf16.gmra.mxu0 %vm702_vm3, %v6120_v13  ;;  %v3850_v13 = vor.u32 %v3849_v7, %v3846_v37  ;;  %v3837_v33 = vrot.slane %v3836_v34, 4  ;;  %v3877_v60 = vshll.u32 %v8073_v59, 16  ;;  %v3794_v37 = vsel %vm6342_vm4, %v8050_v3, %v7995_v25 }
 0x124   : > { %5971 = vmatprep.mubr.msk.bf16.mxu0 %vm702_vm3, %v9117_v24  ;;  %v3881_v24 = vshrl.u32 %v8073_v59, 16  ;;  %v3808_v9 = vsel %vm6342_vm4, %v3803_v51, %v8012_v50  ;;  %v8105_v47 = vsel %vm6628_vm7, %v5495_v26, %v4420_v54  ;;  %v8109_v7 = vsel %vm6628_vm7, %v4422_v62, %v4423_v49  ;;  %v5481_v54 = vld [vmem:[%s6298_s9 + $0x84] sm:$0xe]  ;;  %v9158_v31 = vld [vmem:[#allocation27_spill] sm:$0xff] }
 0x125   : > { %v8081_v19 = vpop.f32.mrf.mxu0  ;;  %v8117_v25 = vsel %vm6628_vm7, %v5496_v56, %v4427_v15  ;;  %v8121_v50 = vsel %vm6628_vm7, %v4429_v35, %v4430_v10  ;;  %v3865_v3 = vrot.slane %v3863_v41, 5  ;;  %v3851_v62 = vrot.slane %v3850_v13, 4  ;;  %v8145_v13 = vld [vmem:[%s6298_s9 + $0x98] sm:$0x1] }
 0x126   : > { %9118 = vst [vmem:[#allocation28_spill] sm:$0xff] %v8081_v19  ;;  %v8084_v42 = vpop.f32.mrf.mxu1  ;;  %5898 = vmatmul.mubr.msk.bf16.gmra.mxu1 %vm702_vm3, %v9119_v61  ;;  %v3861_v49 = vrot.slane %v3860_v30, 4  ;;  %v3870_v16 = vrot.slane %v3868_v55, 4  ;;  %v3873_v34 = vrot.slane %v3871_v46, 5  ;;  %v3832_v15 = vsel %vm6342_vm4, %v3827_v40, %v8038_v18  ;;  %v5424_v30 = vld [vmem:[%s6298_s9 + $0x9c] sm:$0xf] }
 0x127   : > { %v8092_v19 = vpop.f32.mrf.mxu0  ;;  %5937 = vmatprep.mubr.msk.bf16.mxu1 %vm702_vm3, %v7776_v27  ;;  %v3818_v27 = vsel %vm6342_vm4, %v3813_v11, %v3817_v45  ;;  %v3842_v45 = vsel %vm6342_vm4, %v3837_v33, %v3841_v14  ;;  %v8133_v51 = vrot.slane %v3877_v60, 5  ;;  %v3883_v11 = vrot.slane %v3881_v24, 4  ;;  %v8176_v24 = vld [vmem:[%s6298_s9 + $0xa0] sm:$0xf] }
 0x128   : > { %v8111_v44 = vpop.f32.mrf.mxu1  ;;  %v9120_v35 = vcombine.low %v7746_v48, %v7750_v38  ;;  %v5510_v10 = vcombine.low %v7969_v43, %v7986_v17  ;;  %v5511_v41 = vcombine.low %v8021_v58, %v8054_v36  ;;  %v5497_v18 = vrot.slane %v5481_v54, 9 }
 0x129   : > { %v8124_v26 = vpop.f32.mrf.mxu0  ;;  %v4434_v14 = vrot.slane %v8007_v4, 5  ;;  %v9121_v48 = vcombine.low %v7829_v6, %v7833_v22  ;;  %v9122_v38 = vsel %vm6342_vm4, %v7988_v29, %v7947_v39  ;;  %v8161_v61 = vcombine.low %v3808_v9, %v3818_v27  ;;  %v5482_v29 = vld [vmem:[%s6298_s9 + $0x90] sm:$0xe]  ;;  %v9129_v4 = vld [vmem:[#allocation5_spill] sm:$0xff] }
 0x12a   : > { %v8126_v8 = vpop.f32.mrf.mxu1  ;;  %v8159_v46 = vcombine.low %v9122_v38, %v3794_v37  ;;  %v8167_v60 = vcombine.low %v3832_v15, %v3842_v45  ;;  %v3856_v6 = vsel %vm6342_vm4, %v3851_v62, %v8062_v2  ;;  %v3866_v22 = vsel %vm6342_vm4, %v3861_v49, %v3865_v3 }
 0x12b   : > { %v5769_v56 = vpop.f32.mrf.mxu0  ;;  %5972 = vmatmul.mubr.msk.bf16.vlgmr.msra.gmra.mxu0 %vm702_vm3, %v9120_v35  ;;  %v3874_v39 = vor.u32 %v3873_v34, %v3870_v16  ;;  %v3884_v9 = vor.u32 %v3883_v11, %v8133_v51  ;;  %v3887_v27 = vshll.u32 %v8145_v13, 16  ;;  %v3892_v54 = vshrl.u32 %v5424_v30, 16 }
 0x12c   : > { %v8148_v55 = vpop.f32.mrf.mxu1  ;;  %5975 = vmatprep.mubr.msk.bf16.mxu0 %vm702_vm3, %v9121_v48  ;;  %v3895_v15 = vshll.u32 %v5424_v30, 16  ;;  %v8187_v3 = vsel %vm6628_vm7, %v5497_v18, %v4434_v14  ;;  %v4436_v62 = vrot.slane %v4434_v14, 4  ;;  %v4437_v49 = vrot.slane %v8059_v32, 5 }
 0x12d   : > { %v1506_v33 = vpop.f32.mrf.mxu0  ;;  %v5498_v16 = vrot.slane %v5482_v29, 9  ;;  %v4441_v34 = vrot.slane %v8073_v59, 5  ;;  %v3901_v11 = vshll.u32 %v8176_v24, 16  ;;  %v3905_v35 = vshrl.u32 %v8176_v24, 16 }
 0x12e   : > { %v5735_v37 = vpop.f32.mrf.mxu1  ;;  %5938 = vmatmul.mubr.msk.bf16.vlgmr.msra.gmra.mxu1 %vm702_vm3, %v7778_v57  ;;  %v8196_v48 = vcombine.low %v3856_v6, %v3866_v22  ;;  %v8198_v18 = vrot.slane %v3874_v39, 4  ;;  %v3885_v32 = vrot.slane %v3884_v9, 4  ;;  %v3889_v38 = vrot.slane %v3887_v27, 5  ;;  %v5427_v22 = vld [vmem:[%s6298_s9 + $0xa8] sm:$0xf] }
 0x12f   : > { %v1090_v45 = vadd.f32 %v5735_v37, %v7674_v5  ;;  %v5770_v2 = vpop.f32.mrf.mxu0  ;;  %5941 = vmatprep.mubr.msk.bf16.mxu1 %vm702_vm3, %v7925_v23  ;;  %v3894_v29 = vrot.slane %v3892_v54, 4  ;;  %v3897_v59 = vrot.slane %v3895_v15, 5  ;;  %v4444_v6 = vrot.slane %v8145_v13, 5  ;;  %v8224_v27 = vld [vmem:[%s6298_s9 + $0xac] sm:$0xf] }
 0x130   : > { %v1081_v57 = vpop.f32.mrf.mxu1  ;;  %v3907_v9 = vrot.slane %v3905_v35, 4  ;;  %v9126_v35 = vld [vmem:[#allocation11_spill] sm:$0xff] }
 0x131   : > { %v8193_v5 = vadd.f32 %v5769_v56, %v1090_v45  ;;  %v1082_v23 = vadd.f32 %v1081_v57, %v7698_v20  ;;  %v1509_v30 = vpop.f32.mrf.mxu0  ;;  %v9123_v45 = vcombine.low %v7866_v63, %v7892_v52  ;;  %v8209_v20 = vsel %vm6628_vm7, %v4436_v62, %v4437_v49  ;;  %v5483_v62 = vld [vmem:[%s6298_s9 + $0x9c] sm:$0xe] }
 0x132   : > { %v5736_v14 = vpop.f32.mrf.mxu1  ;;  %v4443_v63 = vrot.slane %v4441_v34, 4  ;;  %v8221_v52 = vrot.slane %v3901_v11, 5  ;;  %v4448_v49 = vrot.slane %v8176_v24, 5  ;;  %v3925_v24 = vshll.u32 %v8224_v27, 16 }
 0x133   : > { %v8200_v37 = vadd.f32 %v1506_v33, %v1082_v23  ;;  %v1093_v40 = vadd.f32 %v5736_v14, %v7717_v53  ;;  %v5773_v56 = vpop.f32.mrf.mxu0  ;;  %5976 = vmatmul.mubr.msk.bf16.gmra.mxu0 %vm702_vm3, %v9123_v45  ;;  %v9124_v33 = vcombine.low %v7931_v21, %v7935_v1  ;;  %v8219_v53 = vsel %vm6628_vm7, %v5498_v16, %v4441_v34  ;;  %v5426_v1 = vld [vmem:[%s6298_s9 + $0xa4] sm:$0x1]  ;;  %v9125_v16 = vld [vmem:[#allocation14_spill] sm:$0xff] }
 0x134   : > { %v1084_v39 = vpop.f32.mrf.mxu1  ;;  %v3880_v21 = vsel %vm6342_vm4, %v8198_v18, %v8133_v51  ;;  %v3916_v34 = vshrl.u32 %v5427_v22, 16  ;;  %v9127_v51 = vld [vmem:[#allocation19_spill] sm:$0xff]  ;;  %v3929_v18 = vshrl.u32 %v8224_v27, 16 }
 0x135   : > { %5979 = vmatprep.mubr.msk.bf16.mxu0 %vm702_vm3, %v9124_v33  ;;  %v8226_v54 = vadd.f32 %v5770_v2, %v1093_v40  ;;  %v1085_v13 = vadd.f32 %v1084_v39, %v7762_v12  ;;  %v1522_v15 = vpop.f32.mrf.mxu0  ;;  %v3890_v40 = vsel %vm6342_vm4, %v3885_v32, %v3889_v38  ;;  %v3898_v2 = vor.u32 %v3897_v59, %v3894_v29  ;;  %v9128_v59 = vld [vmem:[#allocation15_spill] sm:$0xff] }
 0x136   : > { %v5739_v57 = vpop.f32.mrf.mxu1  ;;  %5942 = vmatmul.mubr.msk.bf16.gmra.mxu1 %vm702_vm3, %v9125_v16  ;;  %v3919_v12 = vshll.u32 %v5427_v22, 16  ;;  %v8249_v39 = vsel %vm6628_vm7, %v4443_v63, %v4444_v6  ;;  %v3908_v32 = vor.u32 %v3907_v9, %v8221_v52  ;;  %v3911_v38 = vshll.u32 %v5426_v1, 16 }
 0x137   : > { %v8240_v11 = vadd.f32 %v1509_v30, %v1085_v13  ;;  %v1106_v23 = vadd.f32 %v5739_v57, %v9126_v35  ;;  %v5774_v14 = vpop.f32.mrf.mxu0  ;;  %5945 = vmatprep.mubr.msk.bf16.mxu1 %vm702_vm3, %v9127_v51  ;;  %v5499_v30 = vrot.slane %v5483_v62, 9  ;;  %v4450_v13 = vrot.slane %v4448_v49, 4 }
 0x138   : > { %v1097_v45 = vpop.f32.mrf.mxu1  ;;  %v4451_v57 = vrot.slane %v5426_v1, 5  ;;  %v8257_v51 = vrot.slane %v3898_v2, 4  ;;  %v3918_v6 = vrot.slane %v3916_v34, 4  ;;  %v3921_v63 = vrot.slane %v3919_v12, 5  ;;  %v8267_v1 = vld [vmem:[%s6298_s9 + $0xb0] sm:$0x1] }
 0x139   : > { %v8252_v29 = vadd.f32 %v5773_v56, %v1106_v23  ;;  %v1098_v22 = vadd.f32 %v1097_v45, %v9128_v59  ;;  %v1525_v33 = vpop.f32.mrf.mxu0  ;;  %v8269_v23 = vrot.slane %v3925_v24, 5  ;;  %v3931_v2 = vrot.slane %v3929_v18, 4  ;;  %v9130_v12 = vld [vmem:[#allocation17_spill] sm:$0xff] }
 0x13a   : > { %v5740_v16 = vpop.f32.mrf.mxu1  ;;  %v8279_v43 = vrot.slane %v3908_v32, 4  ;;  %v8281_v17 = vrot.slane %v3911_v38, 5  ;;  %v8289_v58 = vsel %vm6628_vm7, %v5499_v30, %v4448_v49  ;;  %v8293_v36 = vsel %vm6628_vm7, %v4450_v13, %v4451_v57  ;;  %v8305_v30 = vld [vmem:[%s6298_s9 + $0xb8] sm:$0xf] }
 0x13b   : > { %v8259_v9 = vadd.f32 %v1522_v15, %v1098_v22  ;;  %v1109_v62 = vadd.f32 %v5740_v16, %v9129_v4  ;;  %v5777_v56 = vpop.f32.mrf.mxu0  ;;  %5980 = vmatmul.mubr.msk.bf16.gmra.mxu0 %vm702_vm3, %v5510_v10  ;;  %v8275_v15 = vcombine.low %v3880_v21, %v3890_v40  ;;  %v5484_v10 = vld [vmem:[%s6298_s9 + $0xa8] sm:$0xe]  ;;  %v3922_v32 = vor.u32 %v3921_v63, %v3918_v6  ;;  %v9132_v22 = vld [vmem:[#allocation12_spill] sm:$0xff] }
 0x13c   : > { %v1100_v45 = vpop.f32.mrf.mxu1  ;;  %5983 = vmatprep.mubr.msk.bf16.mxu0 %vm702_vm3, %v5511_v41  ;;  %v5430_v41 = vld [vmem:[%s6298_s9 + $0xb4] sm:$0xf]  ;;  %v9131_v40 = vld [vmem:[#allocation22_spill] sm:$0xff]  ;;  %v3935_v38 = vshll.u32 %v8267_v1, 16  ;;  %v4455_v49 = vrot.slane %v8224_v27, 5  ;;  %v3932_v16 = vor.u32 %v3931_v2, %v8269_v23  ;;  %v3914_v27 = vsel %vm6342_vm4, %v8279_v43, %v8281_v17 }
 0x13d   : > { %v8284_v34 = vadd.f32 %v5774_v14, %v1109_v62  ;;  %v1101_v24 = vadd.f32 %v1100_v45, %v9130_v12  ;;  %v1538_v18 = vpop.f32.mrf.mxu0  ;;  %v5500_v62 = vrot.slane %v5484_v10, 9  ;;  %v3940_v6 = vshrl.u32 %v5430_v41, 16 }
 0x13e   : > { %v5743_v21 = vpop.f32.mrf.mxu1  ;;  %5946 = vmatmul.mubr.msk.bf16.gmra.mxu1 %vm702_vm3, %v9131_v40  ;;  %v3943_v63 = vshll.u32 %v5430_v41, 16  ;;  %v3949_v2 = vshll.u32 %v8305_v30, 16  ;;  %v3953_v10 = vshrl.u32 %v8305_v30, 16  ;;  %v5433_v40 = vld [vmem:[%s6298_s9 + $0xc0] sm:$0xf]  ;;  %v3923_v4 = vrot.slane %v3922_v32, 4 }
 0x13f   : > { %v8307_v59 = vadd.f32 %v1525_v33, %v1101_v24  ;;  %v1122_v13 = vadd.f32 %v5743_v21, %v9132_v22  ;;  %v5778_v57 = vpop.f32.mrf.mxu0  ;;  %5949 = vmatprep.mubr.msk.bf16.mxu1 %vm702_vm3, %v8159_v46  ;;  %v9134_v24 = vld [vmem:[#allocation21_spill] sm:$0xff]  ;;  %v3937_v43 = vrot.slane %v3935_v38, 5  ;;  %v4457_v17 = vrot.slane %v4455_v49, 4 }
 0x140   : > { %v1113_v45 = vpop.f32.mrf.mxu1  ;;  %v4458_v33 = vrot.slane %v8267_v1, 5  ;;  %v8335_v14 = vsel %vm6628_vm7, %v5500_v62, %v4455_v49  ;;  %v8338_v32 = vld [vmem:[%s6298_s9 + $0xc4] sm:$0xf]  ;;  %v9138_v1 = vcombine.low %v8117_v25, %v8121_v50  ;;  %v8350_v62 = vrot.slane %v3949_v2, 5 }
 0x141   : > { %v8319_v12 = vadd.f32 %v5777_v56, %v1122_v13  ;;  %v1114_v21 = vadd.f32 %v1113_v45, %v9134_v24  ;;  %v1541_v46 = vpop.f32.mrf.mxu0  ;;  %v9136_v56 = vld [vmem:[#allocation24_spill] sm:$0xff]  ;;  %v9137_v45 = vcombine.low %v8105_v47, %v8109_v7  ;;  %v3933_v24 = vrot.slane %v3932_v16, 4  ;;  %v9139_v16 = vld [vmem:[#allocation26_spill] sm:$0xff] }
 0x142   : > { %v5744_v22 = vpop.f32.mrf.mxu1  ;;  %v3964_v47 = vshrl.u32 %v5433_v40, 16  ;;  %v3967_v7 = vshll.u32 %v5433_v40, 16  ;;  %v3928_v25 = vsel %vm6342_vm4, %v3923_v4, %v8269_v23  ;;  %v8359_v50 = vsel %vm6628_vm7, %v4457_v17, %v4458_v33  ;;  %v5485_v40 = vld [vmem:[%s6298_s9 + $0xb4] sm:$0xe] }
 0x143   : > { %9133 = vst [vmem:[#allocation14_spill] sm:$0xff] %v8319_v12  ;;  %v8326_v35 = vadd.f32 %v1538_v18, %v1114_v21  ;;  %v1125_v41 = vadd.f32 %v5744_v22, %v9136_v56  ;;  %v5781_v13 = vpop.f32.mrf.mxu0  ;;  %5984 = vmatmul.mubr.msk.bf16.gmra.mxu0 %vm702_vm3, %v9137_v45  ;;  %v8345_v18 = vld [vmem:[%s6298_s9 + $0xbc] sm:$0x1]  ;;  %v3942_v21 = vrot.slane %v3940_v6, 4  ;;  %v3945_v22 = vrot.slane %v3943_v63, 5 }
 0x144   : > { %v1116_v38 = vpop.f32.mrf.mxu1  ;;  %5987 = vmatprep.mubr.msk.bf16.mxu0 %vm702_vm3, %v9138_v1  ;;  %v3977_v6 = vshrl.u32 %v8338_v32, 16  ;;  %v3959_v23 = vshll.u32 %v8345_v18, 16  ;;  %v4462_v17 = vrot.slane %v8305_v30, 5  ;;  %v9140_v1 = vld [vmem:[#allocation28_spill] sm:$0xff] }
 0x145   : > { %9135 = vst [vmem:[#allocation11_spill] sm:$0xff] %v8326_v35  ;;  %v8347_v56 = vadd.f32 %v5778_v57, %v1125_v41  ;;  %v1117_v45 = vadd.f32 %v1116_v38, %v9139_v16  ;;  %v1554_v49 = vpop.f32.mrf.mxu0  ;;  %v3955_v35 = vrot.slane %v3953_v10, 4  ;;  %v3973_v57 = vshll.u32 %v8338_v32, 16 }
 0x146   : > { %v5747_v12 = vpop.f32.mrf.mxu1  ;;  %5950 = vmatmul.mubr.msk.bf16.gmra.mxu1 %vm702_vm3, %v8161_v61  ;;  %v3938_v61 = vsel %vm6342_vm4, %v3933_v24, %v3937_v43  ;;  %v3946_v33 = vor.u32 %v3945_v22, %v3942_v21  ;;  %v3966_v41 = vrot.slane %v3964_v47, 4  ;;  %v3969_v38 = vrot.slane %v3967_v7, 5 }
 0x147   : > { %v8363_v63 = vadd.f32 %v1541_v46, %v1117_v45  ;;  %v1138_v2 = vadd.f32 %v5747_v12, %v8069_v28  ;;  %v5782_v10 = vpop.f32.mrf.mxu0  ;;  %5953 = vmatprep.mubr.msk.bf16.mxu1 %vm702_vm3, %v8167_v60  ;;  %v9141_v60 = vsel %vm6342_vm4, %v8257_v51, %v8221_v52  ;;  %v3956_v24 = vor.u32 %v3955_v35, %v8350_v62 }
 0x148   : > { %v1129_v4 = vpop.f32.mrf.mxu1  ;;  %v8381_v43 = vcombine.low %v9141_v60, %v3914_v27  ;;  %v8384_v30 = vcombine.low %v3928_v25, %v3938_v61  ;;  %v8388_v22 = vrot.slane %v3973_v57, 5  ;;  %v3979_v47 = vrot.slane %v3977_v6, 4  ;;  %v5435_v27 = vld [vmem:[%s6298_s9 + $0xc8] sm:$0x1] }
 0x149   : > { %v8373_v46 = vadd.f32 %v5781_v13, %v1138_v2  ;;  %v1130_v28 = vadd.f32 %v1129_v4, %v9140_v1  ;;  %v1557_v12 = vpop.f32.mrf.mxu0  ;;  %v5517_v13 = vcombine.low %v8335_v14, %v8359_v50  ;;  %v9142_v52 = vcombine.low %v8187_v3, %v8209_v20  ;;  %v5436_v14 = vld [vmem:[%s6298_s9 + $0xcc] sm:$0xf]  ;;  %v8409_v20 = vld [vmem:[%s6298_s9 + $0xd0] sm:$0xf]  ;;  %v5486_v4 = vld [vmem:[%s6298_s9 + $0xc0] sm:$0xe] }
 0x14a   : > { %v5748_v21 = vpop.f32.mrf.mxu1  ;;  %v8397_v35 = vrot.slane %v3959_v23, 5  ;;  %v5501_v51 = vrot.slane %v5485_v40, 9  ;;  %v9143_v50 = vcombine.low %v8219_v53, %v8249_v39  ;;  %v4465_v57 = vrot.slane %v8345_v18, 5 }
 0x14b   : > { %v8390_v7 = vadd.f32 %v1554_v49, %v1130_v28  ;;  %v1141_v16 = vadd.f32 %v5748_v21, %v8092_v19  ;;  %v5785_v45 = vpop.f32.mrf.mxu0  ;;  %5988 = vmatmul.mubr.msk.bf16.gmra.mxu0 %vm702_vm3, %v9142_v52  ;;  %v8405_v49 = vrot.slane %v3946_v33, 4  ;;  %v4464_v19 = vrot.slane %v4462_v17, 4 }
 0x14c   : > { %v1132_v25 = vpop.f32.mrf.mxu1  ;;  %5991 = vmatprep.mubr.msk.bf16.mxu0 %vm702_vm3, %v9143_v50  ;;  %v3970_v3 = vor.u32 %v3969_v38, %v3966_v41  ;;  %v8414_v23 = vrot.slane %v3956_v24, 4  ;;  %v4469_v53 = vrot.slane %v8338_v32, 5  ;;  %v3980_v33 = vor.u32 %v3979_v47, %v8388_v22 }
 0x14d   : > { %v8411_v6 = vadd.f32 %v5782_v10, %v1141_v16  ;;  %v1133_v2 = vadd.f32 %v1132_v25, %v8124_v26  ;;  %v1570_v61 = vpop.f32.mrf.mxu0  ;;  %v3983_v18 = vshll.u32 %v5435_v27, 16  ;;  %v3988_v40 = vshrl.u32 %v5436_v14, 16  ;;  %v9146_v10 = vld [vmem:[#allocation7_spill] sm:$0xff]  ;;  %v9147_v16 = vld [vmem:[#allocation6_spill] sm:$0xff] }
 0x14e   : > { %v5751_v39 = vpop.f32.mrf.mxu1  ;;  %5954 = vmatmul.mubr.msk.bf16.gmra.mxu1 %vm702_vm3, %v8196_v48  ;;  %v3991_v41 = vshll.u32 %v5436_v14, 16  ;;  %v3997_v28 = vshll.u32 %v8409_v20, 16  ;;  %v4001_v32 = vshrl.u32 %v8409_v20, 16  ;;  %v4463_v48 = vsel %vm6628_vm7, %v5501_v51, %v4462_v17  ;;  %v9148_v17 = vld [vmem:[#allocation9_spill] sm:$0xff] }
 0x14f   : > { %9144 = vst [vmem:[#allocation19_spill] sm:$0xff] %v8411_v6  ;;  %v8421_v38 = vadd.f32 %v1557_v12, %v1133_v2  ;;  %v1154_v1 = vadd.f32 %v5751_v39, %v9146_v10  ;;  %v5786_v26 = vpop.f32.mrf.mxu0  ;;  %5957 = vmatprep.mubr.msk.bf16.mxu1 %vm702_vm3, %v8275_v15  ;;  %v4466_v24 = vsel %vm6628_vm7, %v4464_v19, %v4465_v57  ;;  %v3971_v21 = vrot.slane %v3970_v3, 4 }
 0x150   : > { %v1145_v60 = vpop.f32.mrf.mxu1  ;;  %v5502_v12 = vrot.slane %v5486_v4, 9  ;;  %v4471_v25 = vrot.slane %v4469_v53, 4  ;;  %v4472_v15 = vrot.slane %v5435_v27, 5  ;;  %v3981_v2 = vrot.slane %v3980_v33, 4  ;;  %v5438_v33 = vld [vmem:[%s6298_s9 + $0xd4] sm:$0x1] }
 0x151   : > { %9145 = vst [vmem:[#allocation15_spill] sm:$0xff] %v8421_v38  ;;  %v8432_v47 = vadd.f32 %v5785_v45, %v1154_v1  ;;  %v1146_v52 = vadd.f32 %v1145_v60, %v9147_v16  ;;  %v1573_v14 = vpop.f32.mrf.mxu0  ;;  %v3985_v39 = vrot.slane %v3983_v18, 5  ;;  %v3990_v10 = vrot.slane %v3988_v40, 4  ;;  %v9150_v18 = vld [vmem:[#allocation8_spill] sm:$0xff] }
 0x152   : > { %v5752_v50 = vpop.f32.mrf.mxu1  ;;  %v3993_v38 = vrot.slane %v3991_v41, 5  ;;  %v9149_v45 = vcombine.low %v8289_v58, %v8293_v36  ;;  %v8442_v57 = vrot.slane %v3997_v28, 5  ;;  %v4003_v27 = vrot.slane %v4001_v32, 4 }
 0x153   : > { %v8435_v6 = vadd.f32 %v1570_v61, %v1146_v52  ;;  %v1157_v51 = vadd.f32 %v5752_v50, %v9148_v17  ;;  %v5789_v19 = vpop.f32.mrf.mxu0  ;;  %v3952_v61 = vsel %vm6342_vm4, %v8405_v49, %v8350_v62  ;;  %v3962_v4 = vsel %vm6342_vm4, %v8414_v23, %v8397_v35  ;;  %v5487_v62 = vld [vmem:[%s6298_s9 + $0xcc] sm:$0xe]  ;;  %s8773_s9 = scalar_lea.vmem [#allocation2], %s4999_s8 }
 0x154   : > { %5992 = vmatmul.mubr.msk.bf16.gmra.mxu0 %vm702_vm3, %v9149_v45  ;;  %v1148_v3 = vpop.f32.mrf.mxu1  ;;  %v4476_v58 = vrot.slane %v8409_v20, 5  ;;  %v4473_v1 = vsel %vm6628_vm7, %v4471_v25, %v4472_v15  ;;  %v5518_v35 = vcombine.low %v4463_v48, %v4466_v24  ;;  %v3976_v20 = vsel %vm6342_vm4, %v3971_v21, %v8388_v22  ;;  %v9152_v25 = vld [vmem:[#allocation13_spill] sm:$0xff]  ;;  %s4893_s11 = sshll.u32 %s8773_s9, 4  ;;  %s8916_s11 = int_to_ptr.vmem [resolvable:$true] %s4893_s11 }
 0x155   : > { %5995 = vmatprep.mubr.msk.bf16.mxu0 %vm702_vm3, %v5517_v13  ;;  %v8455_v36 = vadd.f32 %v5786_v26, %v1157_v51  ;;  %v1149_v40 = vadd.f32 %v1148_v3, %v9150_v18  ;;  %v1586_v41 = vpop.f32.mrf.mxu0  ;;  %v4470_v13 = vsel %vm6628_vm7, %v5502_v12, %v4469_v53  ;;  %v3986_v23 = vsel %vm6342_vm4, %v3981_v2, %v3985_v39  ;;  %v9151_v53 = vld [vmem:[#allocation10_spill] sm:$0xff]  ;;  %s6123_s23 = scalar_lea.vmem %s8916_s11, 4096  ;;  %p6130_p1 = scmp.lt.s32.totalorder %s8916_s11, %s6128_s27 }
 0x156   : > { %v5755_v49 = vpop.f32.mrf.mxu1  ;;  %5958 = vmatmul.mubr.msk.bf16.gmra.mxu1 %vm702_vm3, %v8381_v43  ;;  %v3994_v26 = vor.u32 %v3993_v38, %v3990_v10  ;;  %v4004_v12 = vor.u32 %v4003_v27, %v8442_v57  ;;  %v4007_v43 = vshll.u32 %v5438_v33, 16  ;;  %v5519_v24 = vcombine.low %v4470_v13, %v4473_v1  ;;  %p6124_p12 = scmp.ne.s32.totalorder %s8916_s11, %s6123_s23  ;;  %p6131_p2 = scmp.lt.s32.totalorder %s6129_s28, %s6123_s23 }
 0x157   : > { %v8470_v28 = vadd.f32 %v1573_v14, %v1149_v40  ;;  %v1170_v32 = vadd.f32 %v5755_v49, %v9151_v53  ;;  %v5790_v60 = vpop.f32.mrf.mxu0  ;;  %5961 = vmatprep.mubr.msk.bf16.mxu1 %vm702_vm3, %v8384_v30  ;;  %v5503_v16 = vrot.slane %v5487_v62, 9  ;;  %v4478_v52 = vrot.slane %v4476_v58, 4  ;;  %v9153_v30 = vld [vmem:[#allocation16_spill] sm:$0xff] }
 0x158   : > { %v1161_v48 = vpop.f32.mrf.mxu1  ;;  %v4479_v22 = vrot.slane %v5438_v33, 5  ;;  %v5453_v50 = vcombine.low %v3952_v61, %v3962_v4  ;;  %v5454_v2 = vcombine.low %v3976_v20, %v3986_v23  ;;  %v3995_v39 = vrot.slane %v3994_v26, 4  ;;  %v9154_v33 = vld [vmem:[#allocation18_spill] sm:$0xff]  ;;  %v9155_v62 = vld [vmem:[#allocation20_spill] sm:$0xff]  ;;  %v9156_v26 = vld [vmem:[#allocation23_spill] sm:$0xff]  ;;  %p6125_p13 = pnand %p6124_p12, %p6264_p4  ;;  %p6132_p3 = por %p6131_p2, %p6130_p1 }
 0x159   : > { %v8476_v21 = vadd.f32 %v5789_v19, %v1170_v32  ;;  %v1162_v38 = vadd.f32 %v1161_v48, %v9152_v25  ;;  %v1589_v14 = vpop.f32.mrf.mxu0  ;;  %v4005_v45 = vrot.slane %v4004_v12, 4  ;;  %v4009_v27 = vrot.slane %v4007_v43, 5  ;;  %v9157_v43 = vld [vmem:[#allocation25_spill] sm:$0xff] }
 0x15a   : > { %v5756_v15 = vpop.f32.mrf.mxu1  ;;  %v4477_v19 = vsel %vm6628_vm7, %v5503_v16, %v4476_v58  ;;  %v4480_v61 = vsel %vm6628_vm7, %v4478_v52, %v4479_v22  ;;  %v4000_v13 = vsel %vm6342_vm4, %v3995_v39, %v8442_v57  ;;  %p6126_p0 = pneg %p6125_p13 }
 0x15b   : > { %v8479_v10 = vadd.f32 %v1586_v41, %v1162_v38  ;;  %v1173_v17 = vadd.f32 %v5756_v15, %v9153_v30  ;;  %v5793_v51 = vpop.f32.mrf.mxu0  ;;  %v4010_v0 = vsel %vm6342_vm4, %v4005_v45, %v4009_v27 }
 0x15c   : > { %5996 = vmatmul.mubr.msk.bf16.gmra.mxu0 %vm702_vm3, %v5518_v35  ;;  %v1164_v3 = vpop.f32.mrf.mxu1  ;;  %v5520_v35 = vcombine.low %v4477_v19, %v4480_v61  ;;  %v5455_v12 = vcombine.low %v4000_v13, %v4010_v0  ;;  %p6133_p5 = pnand %p6132_p3, %p6126_p0 }
 0x15d   : > { %5999 = vmatprep.mubr.msk.bf16.mxu0 %vm702_vm3, %v5519_v24  ;;  %v8488_v4 = vadd.f32 %v5790_v60, %v1173_v17  ;;  %v1165_v18 = vadd.f32 %v1164_v3, %v9154_v33  ;;  %v1602_v40 = vpop.f32.mrf.mxu0 }
 0x15e   : > { %v5759_v41 = vpop.f32.mrf.mxu1  ;;  %5962 = vmatmul.mubr.msk.bf16.gmra.mxu1 %vm702_vm3, %v5453_v50 }
 0x15f   : > { %v8495_v1 = vadd.f32 %v1589_v14, %v1165_v18  ;;  %v1186_v49 = vadd.f32 %v5759_v41, %v9155_v62  ;;  %v5794_v58 = vpop.f32.mrf.mxu0  ;;  %5965 = vmatprep.mubr.msk.bf16.mxu1 %vm702_vm3, %v5454_v2 }
 0x160   : > { %v1177_v20 = vpop.f32.mrf.mxu1 }
 0x161   : > { %v8501_v23 = vadd.f32 %v5793_v51, %v1186_v49  ;;  %v1178_v53 = vadd.f32 %v1177_v20, %v9156_v26  ;;  %v1605_v32 = vpop.f32.mrf.mxu0 }
 0x162   : > { %v5760_v60 = vpop.f32.mrf.mxu1 }
 0x163   : > { %v8504_v57 = vadd.f32 %v1602_v40, %v1178_v53  ;;  %v1189_v48 = vadd.f32 %v5760_v60, %v9157_v43  ;;  %v5797_v24 = vpop.f32.mrf.mxu0 }
 0x164   : > { %6000 = vmatmul.mubr.msk.bf16.gmra.mxu0 %vm702_vm3, %v5520_v35  ;;  %v1180_v16 = vpop.f32.mrf.mxu1 }
 0x165   : > { %v8508_v52 = vadd.f32 %v5794_v58, %v1189_v48  ;;  %v1181_v22 = vadd.f32 %v1180_v16, %v9158_v31  ;;  %v1618_v25 = vpop.f32.mrf.mxu0 }
 0x166   : > { %v5763_v38 = vpop.f32.mrf.mxu1  ;;  %5966 = vmatmul.mubr.msk.bf16.gmra.mxu1 %vm702_vm3, %v5455_v12 }
 0x167   : > { %v8512_v14 = vadd.f32 %v1605_v32, %v1181_v22  ;;  %v1202_v15 = vadd.f32 %v5763_v38, %v8084_v42  ;;  %v5798_v50 = vpop.f32.mrf.mxu0 }
 0x168   : > { %v1193_v2 = vpop.f32.mrf.mxu1 }
 0x169   : > { %v8515_v39 = vadd.f32 %v5797_v24, %v1202_v15  ;;  %v1194_v30 = vadd.f32 %v1193_v2, %v8111_v44  ;;  %v1621_v17 = vpop.f32.mrf.mxu0 }
 0x16a   : > { %v5764_v51 = vpop.f32.mrf.mxu1 }
 0x16b   : > { %v8518_v45 = vadd.f32 %v1618_v25, %v1194_v30  ;;  %v1205_v27 = vadd.f32 %v5764_v51, %v8126_v8  ;;  %v5837_v3 = vpop.f32.mrf.mxu0  ;;  %v9159_v30 = vld [vmem:[#allocation14_spill] sm:$0xff] }
 0x16c   : > { %v1196_v19 = vpop.f32.mrf.mxu1 }
 0x16d   : > { %v8521_v61 = vadd.f32 %v5798_v50, %v1205_v27  ;;  %v1197_v33 = vadd.f32 %v1196_v19, %v8148_v55  ;;  %v2591_v18 = vpop.f32.mrf.mxu0 }
 0x16e   : > { %v5803_v42 = vpop.f32.mrf.mxu1 }
 0x16f   : > { %v8524_v40 = vadd.f32 %v1621_v17, %v1197_v33  ;;  %v1994_v41 = vadd.f32 %v5803_v42, %v8193_v5  ;;  %v5838_v13 = vpop.f32.mrf.mxu0 }
 0x170   : > { %v1865_v44 = vpop.f32.mrf.mxu1 }
 0x171   : > { %v8527_v62 = vadd.f32 %v5837_v3, %v1994_v41  ;;  %v1992_v49 = vadd.f32 %v1865_v44, %v8200_v37  ;;  %v2594_v58 = vpop.f32.mrf.mxu0  ;;  %v9160_v3 = vld [vmem:[#allocation11_spill] sm:$0xff] }
 0x172   : > { %v5804_v8 = vpop.f32.mrf.mxu1 }
 0x173   : > { %v8530_v0 = vadd.f32 %v2591_v18, %v1992_v49  ;;  %v1995_v35 = vadd.f32 %v5804_v8, %v8226_v54  ;;  %v5841_v20 = vpop.f32.mrf.mxu0 }
 0x174   : > { %v1868_v55 = vpop.f32.mrf.mxu1 }
 0x175   : > { %v8533_v26 = vadd.f32 %v5838_v13, %v1995_v35  ;;  %v1993_v53 = vadd.f32 %v1868_v55, %v8240_v11  ;;  %v2607_v32 = vpop.f32.mrf.mxu0 }
 0x176   : > { %v5807_v5 = vpop.f32.mrf.mxu1 }
 0x177   : > { %v8536_v60 = vadd.f32 %v2594_v58, %v1993_v53  ;;  %v1998_v12 = vadd.f32 %v5807_v5, %v8252_v29  ;;  %v5842_v43 = vpop.f32.mrf.mxu0 }
 0x178   : > { %v1881_v37 = vpop.f32.mrf.mxu1 }
 0x179   : > { %v8539_v48 = vadd.f32 %v5841_v20, %v1998_v12  ;;  %v1996_v24 = vadd.f32 %v1881_v37, %v8259_v9  ;;  %v2610_v16 = vpop.f32.mrf.mxu0 }
 0x17a   : > { %v5808_v54 = vpop.f32.mrf.mxu1 }
 0x17b   : > { %v8542_v31 = vadd.f32 %v2607_v32, %v1996_v24  ;;  %v1999_v22 = vadd.f32 %v5808_v54, %v8284_v34  ;;  %v5845_v25 = vpop.f32.mrf.mxu0  ;;  %v9162_v54 = vld [vmem:[#allocation15_spill] sm:$0xff] }
 0x17c   : > { %v1884_v11 = vpop.f32.mrf.mxu1 }
 0x17d   : > { %v8545_v38 = vadd.f32 %v5842_v43, %v1999_v22  ;;  %v1997_v15 = vadd.f32 %v1884_v11, %v8307_v59  ;;  %v2623_v50 = vpop.f32.mrf.mxu0  ;;  %v9161_v43 = vld [vmem:[#allocation19_spill] sm:$0xff] }
 0x17e   : > { %v5811_v29 = vpop.f32.mrf.mxu1 }
 0x17f   : > { %v8548_v2 = vadd.f32 %v2610_v16, %v1997_v15  ;;  %v2002_v17 = vadd.f32 %v5811_v29, %v9159_v30  ;;  %v5846_v51 = vpop.f32.mrf.mxu0 }
 0x180   : > { %v1897_v9 = vpop.f32.mrf.mxu1 }
 0x181   : > { %v8551_v27 = vadd.f32 %v5845_v25, %v2002_v17  ;;  %v2000_v19 = vadd.f32 %v1897_v9, %v9160_v3  ;;  %v2626_v33 = vpop.f32.mrf.mxu0 }
 0x182   : > { %v5812_v34 = vpop.f32.mrf.mxu1 }
 0x183   : > { %v8554_v18 = vadd.f32 %v2623_v50, %v2000_v19  ;;  %v2003_v42 = vadd.f32 %v5812_v34, %v8347_v56  ;;  %v5849_v41 = vpop.f32.mrf.mxu0 }
 0x184   : > { %v1900_v59 = vpop.f32.mrf.mxu1 }
 0x185   : > { %v8557_v13 = vadd.f32 %v5846_v51, %v2003_v42  ;;  %v2001_v44 = vadd.f32 %v1900_v59, %v8363_v63  ;;  %v2639_v49 = vpop.f32.mrf.mxu0 }
 0x186   : > { %v5815_v58 = vpop.f32.mrf.mxu1 }
 0x187   : > { %v8560_v8 = vadd.f32 %v2626_v33, %v2001_v44  ;;  %v2006_v35 = vadd.f32 %v5815_v58, %v8373_v46  ;;  %v5850_v20 = vpop.f32.mrf.mxu0 }
 0x188   : > { %v1913_v55 = vpop.f32.mrf.mxu1 }
 0x189   : > { %v8563_v53 = vadd.f32 %v5849_v41, %v2006_v35  ;;  %v2004_v32 = vadd.f32 %v1913_v55, %v8390_v7  ;;  %v2642_v5 = vpop.f32.mrf.mxu0 }
 0x18a   : > { %v5816_v56 = vpop.f32.mrf.mxu1 }
 0x18b   : > { %v8566_v12 = vadd.f32 %v2639_v49, %v2004_v32  ;;  %v2007_v37 = vadd.f32 %v5816_v56, %v9161_v43  ;;  %v5853_v24 = vpop.f32.mrf.mxu0 }
 0x18c   : > { %v1916_v63 = vpop.f32.mrf.mxu1 }
 0x18d   : > { %v8569_v16 = vadd.f32 %v5850_v20, %v2007_v37  ;;  %v2005_v22 = vadd.f32 %v1916_v63, %v9162_v54  ;;  %v2655_v25 = vpop.f32.mrf.mxu0 }
 0x18e   : > { %v5819_v46 = vpop.f32.mrf.mxu1 }
 0x18f   : > { %v8572_v11 = vadd.f32 %v2642_v5, %v2005_v22  ;;  %v2010_v15 = vadd.f32 %v5819_v46, %v8432_v47  ;;  %v5854_v50 = vpop.f32.mrf.mxu0 }
 0x190   : > { %v1929_v7 = vpop.f32.mrf.mxu1 }
 0x191   : > { %v8575_v29 = vadd.f32 %v5853_v24, %v2010_v15  ;;  %v2008_v30 = vadd.f32 %v1929_v7, %v8435_v6  ;;  %v2658_v17 = vpop.f32.mrf.mxu0 }
 0x192   : > { %v5820_v51 = vpop.f32.mrf.mxu1 }
 0x193   : > { %v8578_v9 = vadd.f32 %v2655_v25, %v2008_v30  ;;  %v2011_v3 = vadd.f32 %v5820_v51, %v8455_v36  ;;  %v5857_v19 = vpop.f32.mrf.mxu0 }
 0x194   : > { %v1932_v33 = vpop.f32.mrf.mxu1 }
 0x195   : > { %v8581_v34 = vadd.f32 %v5854_v50, %v2011_v3  ;;  %v2009_v42 = vadd.f32 %v1932_v33, %v8470_v28  ;;  %v2671_v41 = vpop.f32.mrf.mxu0 }
 0x196   : > { %v5823_v47 = vpop.f32.mrf.mxu1 }
 0x197   : > { %9163 = vst [vmem:[#allocation5_spill] sm:$0xff] %v8581_v34  ;;  %v8584_v59 = vadd.f32 %v2658_v17, %v2009_v42  ;;  %v2014_v44 = vadd.f32 %v5823_v47, %v8476_v21  ;;  %v5858_v49 = vpop.f32.mrf.mxu0 }
 0x198   : > { %v1945_v6 = vpop.f32.mrf.mxu1 }
 0x199   : > { %9164 = vst [vmem:[#allocation17_spill] sm:$0xff] %v8584_v59  ;;  %v8587_v58 = vadd.f32 %v5857_v19, %v2014_v44  ;;  %v2012_v35 = vadd.f32 %v1945_v6, %v8479_v10  ;;  %v2674_v20 = vpop.f32.mrf.mxu0 }
 0x19a   : > { %v5824_v36 = vpop.f32.mrf.mxu1 }
 0x19b   : > { %9165 = vst [vmem:[#allocation22_spill] sm:$0xff] %v8587_v58  ;;  %v8590_v55 = vadd.f32 %v2671_v41, %v2012_v35  ;;  %v2015_v32 = vadd.f32 %v5824_v36, %v8488_v4  ;;  %v5861_v5 = vpop.f32.mrf.mxu0 }
 0x19c   : > { %v1948_v28 = vpop.f32.mrf.mxu1 }
 0x19d   : > { %9166 = vst [vmem:[#allocation12_spill] sm:$0xff] %v8590_v55  ;;  %v8593_v56 = vadd.f32 %v5858_v49, %v2015_v32  ;;  %v2013_v43 = vadd.f32 %v1948_v28, %v8495_v1  ;;  %v2687_v37 = vpop.f32.mrf.mxu0 }
 0x19e   : > { %v5827_v21 = vpop.f32.mrf.mxu1 }
 0x19f   : > { %9167 = vst [vmem:[#allocation21_spill] sm:$0xff] %v8593_v56  ;;  %v8596_v24 = vadd.f32 %v2674_v20, %v2013_v43  ;;  %v2018_v63 = vadd.f32 %v5827_v21, %v8501_v23  ;;  %v5862_v54 = vpop.f32.mrf.mxu0 }
 0x1a0   : > { %v1961_v10 = vpop.f32.mrf.mxu1 }
 0x1a1   : > { %9168 = vst [vmem:[#allocation24_spill] sm:$0xff] %v8596_v24  ;;  %v8599_v22 = vadd.f32 %v5861_v5, %v2018_v63  ;;  %v2016_v25 = vadd.f32 %v1961_v10, %v8504_v57  ;;  %v2690_v46 = vpop.f32.mrf.mxu0 }
 0x1a2   : > { %v5828_v4 = vpop.f32.mrf.mxu1 }
 0x1a3   : > { %9169 = vst [vmem:[#allocation26_spill] sm:$0xff] %v8599_v22  ;;  %v8602_v15 = vadd.f32 %v2687_v37, %v2016_v25  ;;  %v2019_v50 = vadd.f32 %v5828_v4, %v8508_v52  ;;  %v5865_v7 = vpop.f32.mrf.mxu0 }
 0x1a4   : > { %v1964_v1 = vpop.f32.mrf.mxu1 }
 0x1a5   : > { %9170 = vst [vmem:[#allocation28_spill] sm:$0xff] %v8602_v15  ;;  %v8605_v30 = vadd.f32 %v5862_v54, %v2019_v50  ;;  %v2017_v17 = vadd.f32 %v1964_v1, %v8512_v14  ;;  %v2703_v51 = vpop.f32.mrf.mxu0 }
 0x1a6   : > { %v5831_v23 = vpop.f32.mrf.mxu1 }
 0x1a7   : > { %9171 = vst [vmem:[#allocation7_spill] sm:$0xff] %v8605_v30  ;;  %v8608_v3 = vadd.f32 %v2690_v46, %v2017_v17  ;;  %v2022_v19 = vadd.f32 %v5831_v23, %v8515_v39  ;;  %v5866_v33 = vpop.f32.mrf.mxu0 }
 0x1a8   : > { %v1977_v57 = vpop.f32.mrf.mxu1 }
 0x1a9   : > { %9172 = vst [vmem:[#allocation6_spill] sm:$0xff] %v8608_v3  ;;  %v8611_v42 = vadd.f32 %v5865_v7, %v2022_v19  ;;  %v2020_v41 = vadd.f32 %v1977_v57, %v8518_v45  ;;  %v2706_v47 = vpop.f32.mrf.mxu0 }
 0x1aa   : > { %v5832_v52 = vpop.f32.mrf.mxu1 }
 0x1ab   : > { %9173 = vst [vmem:[#allocation9_spill] sm:$0xff] %v8611_v42  ;;  %v8614_v44 = vadd.f32 %v2703_v51, %v2020_v41  ;;  %v2023_v49 = vadd.f32 %v5832_v52, %v8521_v61  ;;  %v8617_v6 = vpop.f32.mrf.mxu0 }
 0x1ac   : > { %v1980_v14 = vpop.f32.mrf.mxu1 }
 0x1ad   : > { %9174 = vst [vmem:[#allocation8_spill] sm:$0xff] %v8614_v44  ;;  %v8619_v35 = vadd.f32 %v5866_v33, %v2023_v49  ;;  %v2021_v20 = vadd.f32 %v1980_v14, %v8524_v40  ;;  %v8622_v39 = vpop.f32.mrf.mxu0 }
 0x1ae   : > { %v5871_v36 = vpop.f32.mrf.mxu1 }
 0x1af   : > { %9175 = vst [vmem:[#allocation10_spill] sm:$0xff] %v8619_v35  ;;  %v8624_v32 = vadd.f32 %v2706_v47, %v2021_v20  ;;  %v8626_v5 = vpop.f32.mrf.mxu0 }
 0x1b0   : > { %v3061_v45 = vpop.f32.mrf.mxu1 }
 0x1b1   : > { %9176 = vst [vmem:[#allocation13_spill] sm:$0xff] %v8624_v32  ;;  %v8628_v28 = vpop.f32.mrf.mxu0 }
 0x1b2   : > { %v5872_v43 = vpop.f32.mrf.mxu1 }
 0x1b3   : > { %v8630_v37 = vpop.f32.mrf.mxu0 }
 0x1b4   : > { %v8632_v61 = vpop.f32.mrf.mxu1 }
 0x1b5   : > { %v8634_v21 = vpop.f32.mrf.mxu0 }
 0x1b6   : > { %v8636_v63 = vpop.f32.mrf.mxu1 }
 0x1b7   : > { %v8638_v40 = vpop.f32.mrf.mxu0 }
 0x1b8   : > { %v8640_v54 = vpop.f32.mrf.mxu1 }
 0x1b9   : > { %v8642_v10 = vpop.f32.mrf.mxu0 }
 0x1ba   : > { %v8644_v25 = vpop.f32.mrf.mxu1 }
 0x1bb   : > { %v8646_v46 = vpop.f32.mrf.mxu0 }
 0x1bc   : > { %v8648_v4 = vpop.f32.mrf.mxu1 }
 0x1bd   : > { %v8650_v50 = vpop.f32.mrf.mxu0 }
 0x1be   : > { %v8652_v7 = vpop.f32.mrf.mxu1 }
 0x1bf   : > { %v8654_v1 = vpop.f32.mrf.mxu0 }
 0x1c0   : > { %v8656_v17 = vpop.f32.mrf.mxu1 }
 0x1c1   : > { %v8658_v51 = vpop.f32.mrf.mxu0 }
 0x1c2   : > { %v8660_v23 = vpop.f32.mrf.mxu1 }
 0x1c3   : > { %v8662_v19 = vpop.f32.mrf.mxu0 }
 0x1c4   : > { %v8664_v33 = vpop.f32.mrf.mxu1 }
 0x1c5   : > { %v8666_v57 = vpop.f32.mrf.mxu0 }
 0x1c6   : > { %v8668_v41 = vpop.f32.mrf.mxu1 }
 0x1c7   : > { %v8670_v47 = vpop.f32.mrf.mxu0 }
 0x1c8   : > { %v8672_v52 = vpop.f32.mrf.mxu1 }
 0x1c9   : > { %v8674_v49 = vpop.f32.mrf.mxu0 }
 0x1ca   : > { %v8676_v14 = vpop.f32.mrf.mxu1 }
 0x1cb   : > { %v8678_v20 = vpop.f32.mrf.mxu0 }
 0x1cc   : > { %v8680_v32 = vpop.f32.mrf.mxu1 }
 0x1cd   : > { %v8682_v35 = vpop.f32.mrf.mxu0 }
 0x1ce   : > { %9177 = vst [vmem:[#allocation16_spill] sm:$0xff] %v8682_v35  ;;  %v8684_v44 = vpop.f32.mrf.mxu1 }
 0x1cf   : > { %v8686_v42 = vpop.f32.mrf.mxu0 }
 0x1d0   : > { %9178 = vst [vmem:[#allocation18_spill] sm:$0xff] %v8686_v42  ;;  %v8688_v3 = vpop.f32.mrf.mxu1 }
 0x1d1   : > { %v8690_v30 = vpop.f32.mrf.mxu0 }
 0x1d2   : > { %9179 = vst [vmem:[#allocation20_spill] sm:$0xff] %v8690_v30  ;;  %v8692_v15 = vpop.f32.mrf.mxu1 }
 0x1d3   : > { %9180 = vst [vmem:[#allocation23_spill] sm:$0xff] %v8692_v15  ;;  %v8694_v22 = vpop.f32.mrf.mxu0 }
 0x1d4   : > { %9181 = vst [vmem:[#allocation25_spill] sm:$0xff] %v8694_v22  ;;  %v8696_v24 = vpop.f32.mrf.mxu1 }
 0x1d5   : > { %9182 = vst [vmem:[#allocation27_spill] sm:$0xff] %v8696_v24  ;;  %v8698_v56 = vpop.f32.mrf.mxu0 }
 0x1d6   : > { %9183 = vst [vmem:[#allocation14_spill] sm:$0xff] %v8698_v56  ;;  %v8700_v55 = vpop.f32.mrf.mxu1 }
 0x1d7   : > { %9184 = vst [vmem:[#allocation11_spill] sm:$0xff] %v8700_v55  ;;  %v8702_v58 = vpop.f32.mrf.mxu0 }
 0x1d8   : > { %9185 = vst [vmem:[#allocation19_spill] sm:$0xff] %v8702_v58  ;;  %v8704_v59 = vpop.f32.mrf.mxu1 }
 0x1d9   : > { %9186 = vst [vmem:[#allocation15_spill] sm:$0xff] %v8704_v59  ;;  %v8706_v35 = vpop.f32.mrf.mxu0 }
 0x1da   : > { %9187 = vst [vmem:[#allocation29_spill] sm:$0xff] %v8706_v35  ;;  %v8708_v42 = vpop.f32.mrf.mxu1 }
 0x1db   : > { %9188 = vst [vmem:[#allocation30_spill] sm:$0xff] %v8708_v42  ;;  %v8710_v34 = vpop.f32.mrf.mxu0 }
 0x1dc   : > { %9189 = vst [vmem:[#allocation31_spill] sm:$0xff] %v8710_v34  ;;  %v8712_v30 = vpop.f32.mrf.mxu1 }
 0x1dd   : > { %9190 = vst [vmem:[#allocation32_spill] sm:$0xff] %v8712_v30  ;;  %v8714_v15 = vpop.f32.mrf.mxu0 }
 0x1de   : > { %9191 = vst [vmem:[#allocation33_spill] sm:$0xff] %v8714_v15  ;;  %v8716_v22 = vpop.f32.mrf.mxu1 }
 0x1df   : > { %9192 = vst [vmem:[#allocation34_spill] sm:$0xff] %v8716_v22  ;;  %v8718_v24 = vpop.f32.mrf.mxu0 }
 0x1e0   : > { %9193 = vst [vmem:[#allocation35_spill] sm:$0xff] %v8718_v24  ;;  %v8720_v56 = vpop.f32.mrf.mxu1  ;;  %v3190_v24 = vadd.f32 %v5871_v36, %v8527_v62  ;;  %v3189_v62 = vadd.f32 %v8632_v61, %v8536_v60  ;;  %v3192_v60 = vadd.f32 %v8640_v54, %v8542_v31 }
 0x1e1   : > { %9194 = vst [vmem:[#allocation36_spill] sm:$0xff] %v8720_v56  ;;  %v8722_v55 = vpop.f32.mrf.mxu0 }
 0x1e2   : > { %9195 = vst [vmem:[#allocation37_spill] sm:$0xff] %v8722_v55  ;;  %v8724_v58 = vpop.f32.mrf.mxu1  ;;  %v3551_v54 = vadd.f32 %v8634_v21, %v3192_v60  ;;  %v3198_v21 = vadd.f32 %v8652_v7, %v8551_v27 }
 0x1e3   : > { %9196 = vst [vmem:[#allocation38_spill] sm:$0xff] %v8724_v58  ;;  %v8726_v59 = vpop.f32.mrf.mxu0  ;;  %v3188_v58 = vadd.f32 %v3061_v45, %v8530_v0  ;;  %v3194_v0 = vadd.f32 %v8636_v63, %v8539_v48  ;;  %v8757_v45 = vld [vmem:[%s8969_s2] ss:$0 sm:$0xff] }
 0x1e4   : > { %9197 = vst [vmem:[#allocation39_spill] sm:$0xff] %v8726_v59  ;;  %v8728_v35 = vpop.f32.mrf.mxu1 }
 0x1e5   : > { %9198 = vst [vmem:[#allocation40_spill] sm:$0xff] %v8728_v35  ;;  %v8730_v34 = vpop.f32.mrf.mxu0 }
 0x1e6   : > { %9199 = vst [vmem:[#allocation41_spill] sm:$0xff] %v8730_v34  ;;  %v8732_v30 = vpop.f32.mrf.mxu1  ;;  %v3549_v34 = vadd.f32 %v8617_v6, %v3190_v24 }
 0x1e7   : > { %9200 = vst [vmem:[#allocation42_spill] sm:$0xff] %v8732_v30  ;;  %v8734_v15 = vpop.f32.mrf.mxu0  ;;  %v3191_v30 = vadd.f32 %v5872_v43, %v8533_v26 }
 0x1e8   : > { %9201 = vst [vmem:[#allocation43_spill] sm:$0xff] %v8734_v15  ;;  %v8736_v22 = vpop.f32.mrf.mxu1 }
 0x1e9   : > { %9202 = vst [vmem:[#allocation44_spill] sm:$0xff] %v8736_v22  ;;  %v8739_v56 = vpop.f32.mrf.mxu0  ;;  %v3547_v22 = vadd.f32 %v8622_v39, %v3188_v58  ;;  %v3550_v26 = vadd.f32 %v8626_v5, %v3191_v30  ;;  %v3195_v30 = vadd.f32 %v8644_v25, %v8545_v38 }
 0x1ea   : > { %9203 = vst [vmem:[#allocation45_spill] sm:$0xff] %v8739_v56  ;;  %v8741_v55 = vpop.f32.mrf.mxu1 }
 0x1eb   : > { %v5973_v59 = vpop.f32.mrf.mxu0 }
 0x1ec   : > { %v8744_v42 = vpop.f32.mrf.mxu1 }
 0x1ed   : > { %9204 = vst [vmem:[#allocation46_spill] sm:$0xff] %v8744_v42  ;;  %v4616_v35 = vpop.f32.mrf.mxu0  ;;  %v3553_v42 = vadd.f32 %v8630_v37, %v3194_v0  ;;  %v3554_v0 = vadd.f32 %v8638_v40, %v3195_v30 }
 0x1ee   : > { %v5939_v15 = vpop.f32.mrf.mxu1 }
 0x1ef   : > { %v4275_v36 = vadd.f32 %v5939_v15, %v3549_v34  ;;  %v5974_v56 = vpop.f32.mrf.mxu0  ;;  %v3548_v15 = vadd.f32 %v8628_v28, %v3189_v62  ;;  %v3193_v28 = vadd.f32 %v8648_v4, %v8548_v2 }
 0x1f0   : > { %v4146_v24 = vpop.f32.mrf.mxu1 }
 0x1f1   : > { %v4745_v6 = vadd.f32 %v5973_v59, %v4275_v36  ;;  %v4273_v58 = vadd.f32 %v4146_v24, %v3547_v22  ;;  %v4619_v39 = vpop.f32.mrf.mxu0 }
 0x1f2   : > { %v5940_v34 = vpop.f32.mrf.mxu1 }
 0x1f3   : > { %v4784_v48 = vadd.f32 %v8757_v45, %v4745_v6  ;;  %v4743_v43 = vadd.f32 %v4616_v35, %v4273_v58  ;;  %v4276_v61 = vadd.f32 %v5940_v34, %v3550_v26  ;;  %v5977_v63 = vpop.f32.mrf.mxu0  ;;  %v3552_v34 = vadd.f32 %v8642_v10, %v3193_v28 }
 0x1f4   : > { %v4149_v5 = vpop.f32.mrf.mxu1  ;;  %v3202_v28 = vadd.f32 %v8668_v41, %v8563_v53 }
 0x1f5   : > { %v4816_v59 = vmax.f32 %v4784_v48, 0.0  ;;  %v4782_v22 = vadd.f32 %v8757_v45, %v4743_v43  ;;  %v4746_v36 = vadd.f32 %v5974_v56, %v4276_v61  ;;  %v4274_v24 = vadd.f32 %v4149_v5, %v3548_v15  ;;  %v4632_v31 = vpop.f32.mrf.mxu0 }
 0x1f6   : > { %v5943_v35 = vpop.f32.mrf.mxu1  ;;  %v3557_v43 = vadd.f32 %v8646_v46, %v3198_v21  ;;  %v3199_v61 = vadd.f32 %v8660_v23, %v8557_v13 }
 0x1f7   : > { %4848 = vst [vmem:[%s8773_s9 + $0x10] sm:$0xff] %v4816_v59  ;;  %v4814_v37 = vmax.f32 %v4782_v22, 0.0  ;;  %v4785_v38 = vadd.f32 %v8757_v45, %v4746_v36  ;;  %v4744_v25 = vadd.f32 %v4619_v39, %v4274_v24  ;;  %v4279_v62 = vadd.f32 %v5943_v35, %v3553_v42  ;;  %v5978_v56 = vpop.f32.mrf.mxu0 }
 0x1f8   : > { %v4162_v26 = vpop.f32.mrf.mxu1  ;;  %v3196_v42 = vadd.f32 %v8656_v17, %v8554_v18  ;;  %v3197_v22 = vadd.f32 %v8664_v33, %v8560_v8 }
 0x1f9   : > { %4846 = vst [vmem:[%s8773_s9] sm:$0xff] %v4814_v37  ;;  %v4817_v2 = vmax.f32 %v4785_v38, 0.0  ;;  %v4783_v4 = vadd.f32 %v8757_v45, %v4744_v25  ;;  %v4749_v6 = vadd.f32 %v5977_v63, %v4279_v62  ;;  %v4277_v58 = vadd.f32 %v4162_v26, %v3551_v54  ;;  %v4635_v60 = vpop.f32.mrf.mxu0 }
 0x1fa   : > { %v5944_v39 = vpop.f32.mrf.mxu1  ;;  %v3555_v59 = vadd.f32 %v8650_v50, %v3196_v42  ;;  %v3558_v54 = vadd.f32 %v8654_v1, %v3199_v61  ;;  %v3556_v25 = vadd.f32 %v8658_v51, %v3197_v22  ;;  %v3200_v62 = vadd.f32 %v8672_v52, %v8566_v12 }
 0x1fb   : > { %4849 = vst [vmem:[%s8773_s9 + $0x18] sm:$0xff] %v4817_v2  ;;  %v4815_v40 = vmax.f32 %v4783_v4, 0.0  ;;  %v4788_v15 = vadd.f32 %v8757_v45, %v4749_v6  ;;  %v4747_v27 = vadd.f32 %v4632_v31, %v4277_v58  ;;  %v4280_v7 = vadd.f32 %v5944_v39, %v3554_v0  ;;  %v5981_v48 = vpop.f32.mrf.mxu0 }
 0x1fc   : > { %v4165_v63 = vpop.f32.mrf.mxu1  ;;  %v3561_v26 = vadd.f32 %v8662_v19, %v3202_v28  ;;  %v3203_v2 = vadd.f32 %v8676_v14, %v8569_v16 }
 0x1fd   : > { %4847 = vst [vmem:[%s8773_s9 + $0x8] sm:$0xff] %v4815_v40  ;;  %v4820_v10 = vmax.f32 %v4788_v15, 0.0  ;;  %v4786_v30 = vadd.f32 %v8757_v45, %v4747_v27  ;;  %v4750_v18 = vadd.f32 %v5978_v56, %v4280_v7  ;;  %v4278_v17 = vadd.f32 %v4165_v63, %v3552_v34  ;;  %v4648_v5 = vpop.f32.mrf.mxu0 }
 0x1fe   : > { %v5947_v36 = vpop.f32.mrf.mxu1  ;;  %v3201_v34 = vadd.f32 %v8680_v32, %v8572_v11  ;;  %v3562_v15 = vadd.f32 %v8670_v47, %v3203_v2  ;;  %v3206_v27 = vadd.f32 %v8684_v44, %v8575_v29  ;;  %v3204_v63 = vadd.f32 %v8688_v3, %v8578_v9 }
 0x1ff   : > { %4852 = vst [vmem:[%s8773_s9 + $0x30] sm:$0xff] %v4820_v10  ;;  %v4818_v46 = vmax.f32 %v4786_v30, 0.0  ;;  %v4789_v24 = vadd.f32 %v8757_v45, %v4750_v18  ;;  %v4748_v13 = vadd.f32 %v4635_v60, %v4278_v17  ;;  %v4283_v23 = vadd.f32 %v5947_v36, %v3557_v43  ;;  %v5982_v31 = vpop.f32.mrf.mxu0 }
 0x200   : > { %v4178_v35 = vpop.f32.mrf.mxu1  ;;  %v3559_v60 = vadd.f32 %v8666_v57, %v3200_v62  ;;  %v3560_v61 = vadd.f32 %v8674_v49, %v3201_v34  ;;  %v3565_v17 = vadd.f32 %v8678_v20, %v3206_v27  ;;  %v9211_v62 = vld [vmem:[#allocation22_spill] sm:$0xff] }
 0x201   : > { %4850 = vst [vmem:[%s8773_s9 + $0x20] sm:$0xff] %v4818_v46  ;;  %v4821_v50 = vmax.f32 %v4789_v24, 0.0  ;;  %v4787_v37 = vadd.f32 %v8757_v45, %v4748_v13  ;;  %v4753_v8 = vadd.f32 %v5981_v48, %v4283_v23  ;;  %v4281_v33 = vadd.f32 %v4178_v35, %v3555_v59  ;;  %v4651_v38 = vpop.f32.mrf.mxu0  ;;  %v9206_v59 = vld [vmem:[#allocation23_spill] sm:$0xff]  ;;  %v9207_v13 = vld [vmem:[#allocation16_spill] sm:$0xff] }
 0x202   : > { %v5948_v56 = vpop.f32.mrf.mxu1  ;;  %v3563_v23 = vadd.f32 %v9207_v13, %v3204_v63 }
 0x203   : > { %4853 = vst [vmem:[%s8773_s9 + $0x38] sm:$0xff] %v4821_v50  ;;  %v4819_v1 = vmax.f32 %v4787_v37, 0.0  ;;  %v4792_v0 = vadd.f32 %v8757_v45, %v4753_v8  ;;  %v4751_v53 = vadd.f32 %v4648_v5, %v4281_v33  ;;  %v4284_v41 = vadd.f32 %v5948_v56, %v3558_v54  ;;  %v5985_v21 = vpop.f32.mrf.mxu0  ;;  %v9205_v5 = vld [vmem:[#allocation5_spill] sm:$0xff]  ;;  %v9209_v54 = vld [vmem:[#allocation27_spill] sm:$0xff] }
 0x204   : > { %v4181_v4 = vpop.f32.mrf.mxu1  ;;  %v3207_v22 = vadd.f32 %v9206_v59, %v9205_v5  ;;  %v9212_v56 = vld [vmem:[#allocation11_spill] sm:$0xff] }
 0x205   : > { %4851 = vst [vmem:[%s8773_s9 + $0x28] sm:$0xff] %v4819_v1  ;;  %v4824_v51 = vmax.f32 %v4792_v0, 0.0  ;;  %v4790_v6 = vadd.f32 %v8757_v45, %v4751_v53  ;;  %v4754_v12 = vadd.f32 %v5982_v31, %v4284_v41  ;;  %v4282_v52 = vadd.f32 %v4181_v4, %v3556_v25  ;;  %v4664_v58 = vpop.f32.mrf.mxu0  ;;  %v9208_v31 = vld [vmem:[#allocation17_spill] sm:$0xff]  ;;  %v9213_v4 = vld [vmem:[#allocation20_spill] sm:$0xff] }
 0x206   : > { %v5951_v42 = vpop.f32.mrf.mxu1  ;;  %v3205_v28 = vadd.f32 %v9209_v54, %v9208_v31  ;;  %v3210_v1 = vadd.f32 %v9212_v56, %v9211_v62 }
 0x207   : > { %4856 = vst [vmem:[%s8773_s9 + $0x50] sm:$0xff] %v4824_v51  ;;  %v4822_v19 = vmax.f32 %v4790_v6, 0.0  ;;  %v4793_v39 = vadd.f32 %v8757_v45, %v4754_v12  ;;  %v4752_v16 = vadd.f32 %v4651_v38, %v4282_v52  ;;  %v4287_v14 = vadd.f32 %v5951_v42, %v3561_v26  ;;  %v5986_v40 = vpop.f32.mrf.mxu0  ;;  %v9210_v38 = vld [vmem:[#allocation18_spill] sm:$0xff]  ;;  %v9214_v6 = vld [vmem:[#allocation12_spill] sm:$0xff]  ;;  %v9215_v12 = vld [vmem:[#allocation15_spill] sm:$0xff] }
 0x208   : > { %v4194_v7 = vpop.f32.mrf.mxu1  ;;  %v3566_v25 = vadd.f32 %v9210_v38, %v3207_v22  ;;  %v3564_v51 = vadd.f32 %v9213_v4, %v3205_v28  ;;  %v3208_v52 = vadd.f32 %v9215_v12, %v9214_v6  ;;  %v9222_v22 = vld [vmem:[#allocation19_spill] sm:$0xff]  ;;  %v9225_v28 = vld [vmem:[#allocation29_spill] sm:$0xff] }
 0x209   : > { %4854 = vst [vmem:[%s8773_s9 + $0x40] sm:$0xff] %v4822_v19  ;;  %v4825_v57 = vmax.f32 %v4793_v39, 0.0  ;;  %v4791_v48 = vadd.f32 %v8757_v45, %v4752_v16  ;;  %v4757_v11 = vadd.f32 %v5985_v21, %v4287_v14  ;;  %v4285_v32 = vadd.f32 %v4194_v7, %v3559_v60  ;;  %v4667_v43 = vpop.f32.mrf.mxu0  ;;  %v9216_v16 = vld [vmem:[#allocation25_spill] sm:$0xff] }
 0x20a   : > { %v5952_v10 = vpop.f32.mrf.mxu1  ;;  %v3569_v14 = vadd.f32 %v9216_v16, %v3210_v1  ;;  %v9228_v1 = vld [vmem:[#allocation31_spill] sm:$0xff] }
 0x20b   : > { %4857 = vst [vmem:[%s8773_s9 + $0x58] sm:$0xff] %v4825_v57  ;;  %v4823_v47 = vmax.f32 %v4791_v48, 0.0  ;;  %v4796_v30 = vadd.f32 %v8757_v45, %v4757_v11  ;;  %v4755_v29 = vadd.f32 %v4664_v58, %v4285_v32  ;;  %v4288_v44 = vadd.f32 %v5952_v10, %v3562_v15  ;;  %v5989_v18 = vpop.f32.mrf.mxu0  ;;  %v9218_v15 = vld [vmem:[#allocation30_spill] sm:$0xff]  ;;  %v9220_v10 = vld [vmem:[#allocation24_spill] sm:$0xff] }
 0x20c   : > { %v4197_v36 = vpop.f32.mrf.mxu1 }
 0x20d   : > { %4855 = vst [vmem:[%s8773_s9 + $0x48] sm:$0xff] %v4823_v47  ;;  %v4828_v49 = vmax.f32 %v4796_v30, 0.0  ;;  %v4794_v46 = vadd.f32 %v8757_v45, %v4755_v29  ;;  %v4758_v9 = vadd.f32 %v5986_v40, %v4288_v44  ;;  %v4286_v3 = vadd.f32 %v4197_v36, %v3560_v61  ;;  %v4680_v24 = vpop.f32.mrf.mxu0  ;;  %v9217_v40 = vld [vmem:[#allocation21_spill] sm:$0xff]  ;;  %v9219_v61 = vld [vmem:[#allocation14_spill] sm:$0xff]  ;;  %v9221_v47 = vld [vmem:[#allocation32_spill] sm:$0xff] }
 0x20e   : > { %v5955_v35 = vpop.f32.mrf.mxu1  ;;  %v3211_v27 = vadd.f32 %v9218_v15, %v9217_v40  ;;  %v3567_v63 = vadd.f32 %v9219_v61, %v3208_v52  ;;  %v3209_v30 = vadd.f32 %v9221_v47, %v9220_v10  ;;  %v9231_v52 = vld [vmem:[#allocation33_spill] sm:$0xff] }
 0x20f   : > { %4860 = vst [vmem:[%s8773_s9 + $0x70] sm:$0xff] %v4828_v49  ;;  %v4826_v20 = vmax.f32 %v4794_v46, 0.0  ;;  %v4797_v50 = vadd.f32 %v8757_v45, %v4758_v9  ;;  %v4756_v37 = vadd.f32 %v4667_v43, %v4286_v3  ;;  %v4291_v8 = vadd.f32 %v5955_v35, %v3565_v17  ;;  %v5990_v33 = vpop.f32.mrf.mxu0  ;;  %v9223_v49 = vld [vmem:[#allocation26_spill] sm:$0xff] }
 0x210   : > { %v4210_v0 = vpop.f32.mrf.mxu1  ;;  %v3570_v36 = vadd.f32 %v9222_v22, %v3211_v27  ;;  %v9224_v46 = vld [vmem:[#allocation34_spill] sm:$0xff]  ;;  %v3568_v35 = vadd.f32 %v9225_v28, %v3209_v30  ;;  %v9234_v27 = vld [vmem:[#allocation35_spill] sm:$0xff]  ;;  %v9237_v30 = vld [vmem:[#allocation37_spill] sm:$0xff] }
 0x211   : > { %4858 = vst [vmem:[%s8773_s9 + $0x60] sm:$0xff] %v4826_v20  ;;  %v4829_v53 = vmax.f32 %v4797_v50, 0.0  ;;  %v4795_v41 = vadd.f32 %v8757_v45, %v4756_v37  ;;  %v4761_v21 = vadd.f32 %v5989_v18, %v4291_v8  ;;  %v4289_v26 = vadd.f32 %v4210_v0, %v3563_v23  ;;  %v4683_v2 = vpop.f32.mrf.mxu0  ;;  %v9226_v20 = vld [vmem:[#allocation28_spill] sm:$0xff] }
 0x212   : > { %v5956_v58 = vpop.f32.mrf.mxu1  ;;  %v3214_v9 = vadd.f32 %v9224_v46, %v9223_v49  ;;  %v9227_v50 = vld [vmem:[#allocation36_spill] sm:$0xff] }
 0x213   : > { %4861 = vst [vmem:[%s8773_s9 + $0x78] sm:$0xff] %v4829_v53  ;;  %v4827_v60 = vmax.f32 %v4795_v41, 0.0  ;;  %v4800_v34 = vadd.f32 %v8757_v45, %v4761_v21  ;;  %v4759_v42 = vadd.f32 %v4680_v24, %v4289_v26  ;;  %v4292_v19 = vadd.f32 %v5956_v58, %v3566_v25  ;;  %v9229_v53 = vld [vmem:[#allocation7_spill] sm:$0xff]  ;;  %v9230_v41 = vld [vmem:[#allocation38_spill] sm:$0xff] }
 0x214   : > { %v5993_v39 = vpop.f32.mrf.mxu0  ;;  %v4213_v7 = vpop.f32.mrf.mxu1  ;;  %v3212_v37 = vadd.f32 %v9227_v50, %v9226_v20  ;;  %v3573_v0 = vadd.f32 %v9228_v1, %v3214_v9  ;;  %v3215_v21 = vadd.f32 %v9230_v41, %v9229_v53  ;;  %v9240_v9 = vld [vmem:[#allocation39_spill] sm:$0xff]  ;;  %v9242_v20 = vld [vmem:[#allocation41_spill] sm:$0xff] }
 0x215   : > { %4859 = vst [vmem:[%s8773_s9 + $0x68] sm:$0xff] %v4827_v60  ;;  %v4832_v57 = vmax.f32 %v4800_v34, 0.0  ;;  %v4798_v48 = vadd.f32 %v8757_v45, %v4759_v42  ;;  %v4762_v11 = vadd.f32 %v5990_v33, %v4292_v19  ;;  %v4290_v32 = vadd.f32 %v4213_v7, %v3564_v51  ;;  %v9232_v60 = vld [vmem:[#allocation6_spill] sm:$0xff]  ;;  %v9233_v34 = vld [vmem:[#allocation40_spill] sm:$0xff] }
 0x216   : > { %v4696_v43 = vpop.f32.mrf.mxu0  ;;  %v5959_v29 = vpop.f32.mrf.mxu1  ;;  %v3571_v58 = vadd.f32 %v9231_v52, %v3212_v37  ;;  %v3213_v42 = vadd.f32 %v9233_v34, %v9232_v60  ;;  %v3574_v7 = vadd.f32 %v9234_v27, %v3215_v21  ;;  %v9243_v37 = vld [vmem:[#allocation13_spill] sm:$0xff] }
 0x217   : > { %4864 = vst [vmem:[%s8773_s9 + $0x90] sm:$0xff] %v4832_v57  ;;  %v4830_v44 = vmax.f32 %v4798_v48, 0.0  ;;  %v4801_v18 = vadd.f32 %v8757_v45, %v4762_v11  ;;  %v4760_v17 = vadd.f32 %v4683_v2, %v4290_v32  ;;  %v4295_v5 = vadd.f32 %v5959_v29, %v3569_v14  ;;  %v9235_v57 = vld [vmem:[#allocation9_spill] sm:$0xff]  ;;  %v9236_v48 = vld [vmem:[#allocation42_spill] sm:$0xff] }
 0x218   : > { %v5994_v59 = vpop.f32.mrf.mxu0  ;;  %v4226_v3 = vpop.f32.mrf.mxu1  ;;  %v3218_v11 = vadd.f32 %v9236_v48, %v9235_v57  ;;  %v3572_v29 = vadd.f32 %v9237_v30, %v3213_v42 }
 0x219   : > { %4862 = vst [vmem:[%s8773_s9 + $0x80] sm:$0xff] %v4830_v44  ;;  %v4833_v24 = vmax.f32 %v4801_v18, 0.0  ;;  %v4799_v13 = vadd.f32 %v8757_v45, %v4760_v17  ;;  %v4765_v23 = vadd.f32 %v5993_v39, %v4295_v5  ;;  %v4293_v31 = vadd.f32 %v4226_v3, %v3567_v63  ;;  %v9238_v44 = vld [vmem:[#allocation8_spill] sm:$0xff] }
 0x21a   : > { %v4699_v54 = vpop.f32.mrf.mxu0  ;;  %v5960_v8 = vpop.f32.mrf.mxu1  ;;  %v9239_v18 = vld [vmem:[#allocation44_spill] sm:$0xff]  ;;  %v3577_v3 = vadd.f32 %v9240_v9, %v3218_v11 }
 0x21b   : > { %4865 = vst [vmem:[%s8773_s9 + $0x98] sm:$0xff] %v4833_v24  ;;  %v4831_v33 = vmax.f32 %v4799_v13, 0.0  ;;  %v4804_v38 = vadd.f32 %v8757_v45, %v4765_v23  ;;  %v4763_v25 = vadd.f32 %v4696_v43, %v4293_v31  ;;  %v4296_v62 = vadd.f32 %v5960_v8, %v3570_v36  ;;  %v9241_v24 = vld [vmem:[#allocation10_spill] sm:$0xff] }
 0x21c   : > { %v5997_v56 = vpop.f32.mrf.mxu0  ;;  %v4229_v26 = vpop.f32.mrf.mxu1  ;;  %v3216_v17 = vadd.f32 %v9239_v18, %v9238_v44  ;;  %v3219_v13 = vadd.f32 %v8741_v55, %v9241_v24  ;;  %v9244_v8 = vld [vmem:[#allocation46_spill] sm:$0xff] }
 0x21d   : > { %4863 = vst [vmem:[%s8773_s9 + $0x88] sm:$0xff] %v4831_v33  ;;  %v4836_v2 = vmax.f32 %v4804_v38, 0.0  ;;  %v4802_v4 = vadd.f32 %v8757_v45, %v4763_v25  ;;  %v4766_v51 = vadd.f32 %v5994_v59, %v4296_v62  ;;  %v4294_v6 = vadd.f32 %v4229_v26, %v3568_v35 }
 0x21e   : > { %v4712_v12 = vpop.f32.mrf.mxu0  ;;  %v5963_v19 = vpop.f32.mrf.mxu1  ;;  %v3575_v50 = vadd.f32 %v9242_v20, %v3216_v17  ;;  %v3217_v33 = vadd.f32 %v9244_v8, %v9243_v37 }
 0x21f   : > { %4868 = vst [vmem:[%s8773_s9 + $0xb0] sm:$0xff] %v4836_v2  ;;  %v4834_v39 = vmax.f32 %v4802_v4, 0.0  ;;  %v4805_v16 = vadd.f32 %v8757_v45, %v4766_v51  ;;  %v4764_v14 = vadd.f32 %v4699_v54, %v4294_v6  ;;  %v4299_v40 = vadd.f32 %v5963_v19, %v3573_v0  ;;  %v9245_v0 = vld [vmem:[#allocation43_spill] sm:$0xff]  ;;  %v9246_v51 = vld [vmem:[#allocation45_spill] sm:$0xff] }
 0x220   : > { %v5998_v15 = vpop.f32.mrf.mxu0  ;;  %v4242_v32 = vpop.f32.mrf.mxu1  ;;  %v3578_v53 = vadd.f32 %v9245_v0, %v3219_v13  ;;  %v3576_v6 = vadd.f32 %v9246_v51, %v3217_v33 }
 0x221   : > { %4866 = vst [vmem:[%s8773_s9 + $0xa0] sm:$0xff] %v4834_v39  ;;  %v4837_v43 = vmax.f32 %v4805_v16, 0.0  ;;  %v4803_v61 = vadd.f32 %v8757_v45, %v4764_v14  ;;  %v4769_v63 = vadd.f32 %v5997_v56, %v4299_v40  ;;  %v4297_v10 = vadd.f32 %v4242_v32, %v3571_v58 }
 0x222   : > { %v4715_v47 = vpop.f32.mrf.mxu0  ;;  %v5964_v5 = vpop.f32.mrf.mxu1 }
 0x223   : > { %4869 = vst [vmem:[%s8773_s9 + $0xb8] sm:$0xff] %v4837_v43  ;;  %v4835_v59 = vmax.f32 %v4803_v61, 0.0  ;;  %v4808_v22 = vadd.f32 %v8757_v45, %v4769_v63  ;;  %v4767_v36 = vadd.f32 %v4712_v12, %v4297_v10  ;;  %v4300_v49 = vadd.f32 %v5964_v5, %v3574_v7 }
 0x224   : > { %v6001_v46 = vpop.f32.mrf.mxu0  ;;  %v4245_v23 = vpop.f32.mrf.mxu1 }
 0x225   : > { %4867 = vst [vmem:[%s8773_s9 + $0xa8] sm:$0xff] %v4835_v59  ;;  %v4840_v31 = vmax.f32 %v4808_v22, 0.0  ;;  %v4806_v54 = vadd.f32 %v8757_v45, %v4767_v36  ;;  %v4770_v28 = vadd.f32 %v5998_v15, %v4300_v49  ;;  %v4298_v35 = vadd.f32 %v4245_v23, %v3572_v29 }
 0x226   : > { %v5967_v38 = vpop.f32.mrf.mxu1  ;;  %v4728_v25 = vpop.f32.mrf.mxu0 }
 0x227   : > { %4872 = vst [vmem:[%s8773_s9 + $0xd0] sm:$0xff] %v4840_v31  ;;  %v4838_v62 = vmax.f32 %v4806_v54, 0.0  ;;  %v4809_v55 = vadd.f32 %v8757_v45, %v4770_v28  ;;  %v4768_v56 = vadd.f32 %v4715_v47, %v4298_v35  ;;  %v4303_v1 = vadd.f32 %v5967_v38, %v3577_v3 }
 0x228   : > { %v4258_v41 = vpop.f32.mrf.mxu1  ;;  %v6002_v52 = vpop.f32.mrf.mxu0 }
 0x229   : > { %4870 = vst [vmem:[%s8773_s9 + $0xc0] sm:$0xff] %v4838_v62  ;;  %v4841_v21 = vmax.f32 %v4809_v55, 0.0  ;;  %v4807_v26 = vadd.f32 %v8757_v45, %v4768_v56  ;;  %v4773_v2 = vadd.f32 %v6001_v46, %v4303_v1  ;;  %v4301_v4 = vadd.f32 %v4258_v41, %v3575_v50 }
 0x22a   : > { %v5968_v12 = vpop.f32.mrf.mxu1  ;;  %v4731_v15 = vpop.f32.mrf.mxu0 }
 0x22b   : > { %4873 = vst [vmem:[%s8773_s9 + $0xd8] sm:$0xff] %v4841_v21  ;;  %v4839_v58 = vmax.f32 %v4807_v26, 0.0  ;;  %v4812_v60 = vadd.f32 %v8757_v45, %v4773_v2  ;;  %v4771_v34 = vadd.f32 %v4728_v25, %v4301_v4  ;;  %v4304_v42 = vadd.f32 %v5968_v12, %v3578_v53 }
 0x22c   : > { %v4261_v19 = vpop.f32.mrf.mxu1 }
 0x22d   : > { %4871 = vst [vmem:[%s8773_s9 + $0xc8] sm:$0xff] %v4839_v58  ;;  %v4844_v39 = vmax.f32 %v4812_v60, 0.0  ;;  %v4810_v16 = vadd.f32 %v8757_v45, %v4771_v34  ;;  %v4774_v14 = vadd.f32 %v6002_v52, %v4304_v42  ;;  %v4302_v40 = vadd.f32 %v4261_v19, %v3576_v6 }
 0x22f   : > { %4876 = vst [vmem:[%s8773_s9 + $0xf0] sm:$0xff] %v4844_v39  ;;  %v4842_v27 = vmax.f32 %v4810_v16, 0.0  ;;  %v4813_v7 = vadd.f32 %v8757_v45, %v4774_v14  ;;  %v4772_v57 = vadd.f32 %v4731_v15, %v4302_v40 }
 0x231   : > { %4874 = vst [vmem:[%s8773_s9 + $0xe0] sm:$0xff] %v4842_v27  ;;  %v4845_v48 = vmax.f32 %v4813_v7, 0.0  ;;  %v4811_v11 = vadd.f32 %v8757_v45, %v4772_v57 }
 0x233   : > { %4877 = vst [vmem:[%s8773_s9 + $0xf8] sm:$0xff] %v4845_v48  ;;  %v4843_v32 = vmax.f32 %v4811_v11, 0.0 }
 0x235   : > { %4875 = vst [vmem:[%s8773_s9 + $0xe8] sm:$0xff] %v4843_v32 }
 0x236   : > { %6136 = shalt.err (!%p6133_p5)
}
 0x237   : > { %s6137_s29 = scalar_lea.hbm %s8914_s21, 4096  ;;  %s6141_s5 = scalar_lea.hbm %s8970_s3, 8192 }
 0x238   : > { %p6138_p6 = scmp.ne.s32.totalorder %s8914_s21, %s6137_s29  ;;  %p6142_p10 = scmp.lt.s32.totalorder %s8914_s21, %s8970_s3 }
 0x239   : > { %p6143_p11 = scmp.lt.s32.totalorder %s6141_s5, %s6137_s29 }
 0x23a   : > { %p6139_p7 = pnand %p6138_p6, %p6264_p4 }
 0x23b   : > { %p6144_p12 = por %p6143_p11, %p6142_p10 }
 0x23c   : > { %p6140_p9 = pneg %p6139_p7 }
 0x23e   : > { %p6145_p13 = pnand %p6144_p12, %p6140_p9 }
 0x240   : > { %6148 = shalt.err (!%p6145_p13)
}
 0x241   : > { %s6202_s8 = smov 128   ;;  %s6203_s9 = smov 8  }
 0x242   : > { %6016 = dma.vmem_to_hbm [thread:$0]  (%p6264_p4), %s8916_s11, 4096, %s8914_s21, %s8922_s15, %s6202_s8, %s6202_s8, %s6203_s9  }
 0x243 PF: > { %p6022_p0 = scmp.ge.s32.totalorder %s6199_s17, 2  ;;  %s4908_s10 = sand.u32 1, %s6179_s12  }
 0x244   : > { %s4909_s18 = scalar_lea.sflag [#allocation3], %s4908_s10 }
 0x245   : > { %p6019_p1 = pnand %p6022_p0, %p6271_p8 }
 0x247   : > { %p6020_p2 = pneg %p6019_p1 }
 0x249   : > { %6174 = dma.done.wait (%p6020_p2), %s4909_s18, 4096  }
 0x24a   : > { %6176 = vsyncadd (%p6020_p2), %s4909_s18, 4294963200  ;;  %s16_s17 = sadd.s32 1, %s6199_s17   ;;  %s9247_s12 = smov %s6183_s13 }
 0x24b   : > { %p13_p3 = scmp.ge.s32.totalorder %s16_s17, 4   ;;  %s9248_s13 = smov %s6187_s14 }
 0x24c   : > { %s9249_s14 = smov %s6277_s25  ;;  %s9250_s15 = smov %s6195_s16 }
 0x24d   : > { %s9251_s16 = smov %s9253_s20  ;;  %15 = sbr.rel (!%p13_p3) target bundleno = 4 (0x4), region = 83 }
 0x252   :  { %4914 = vsyncpa [#allocation3], 1 }
 0x253   :  { %4916 = vsyncpa [#allocation3 + $0x1], 1 }

</bundles_post_ra>
